<compile_context>
chip_gen: v6e
topology: v6e:2x2x1
jax: 0.10.0
libtpu: 0.0.40
codegen_flags: <defaults>
</compile_context>

<pallas_src>
import functools

import jax
import jax.numpy as jnp
from jax.experimental import pallas as pl
from jax.experimental.pallas import tpu as pltpu


# ----------------------------------------------------------------------------
# Pallas kernel: single-K-step matmul with fused bias + optional ReLU
# ----------------------------------------------------------------------------
def _matmul_bias_kernel(a_ref, b_ref, bias_ref, o_ref, *, relu):
    acc = jnp.dot(a_ref[...], b_ref[...], preferred_element_type=jnp.float32)
    acc = acc + bias_ref[...]
    if relu:
        acc = jnp.maximum(acc, 0.0)
    o_ref[...] = acc.astype(o_ref.dtype)


def _pick_tm(M, target=512):
    """Largest multiple-of-8 divisor of M that is <= target, else full M (grid=1)."""
    t = min(target, (M // 8) * 8)
    while t >= 8:
        if M % t == 0:
            return t
        t -= 8
    return M


def matmul_bias_act(a, b, bias2d, *, relu, out_dtype, tm=None):
    """(optional ReLU of) a @ b + bias.  K and N are kept whole; only M is tiled,
    so launch/grid-step overhead stays minimal for these small GEMMs."""
    M, K = a.shape
    K2, N = b.shape
    assert K == K2 and bias2d.shape == (1, N)
    if tm is None:
        tm = _pick_tm(M)
    assert M % tm == 0
    grid_m = M // tm

    cost = pl.CostEstimate(
        flops=2 * M * K * N,
        transcendentals=0,
        bytes_accessed=int(a.size * a.dtype.itemsize
                           + b.size * b.dtype.itemsize
                           + bias2d.size * 4
                           + M * N * jnp.dtype(out_dtype).itemsize),
    )

    return pl.pallas_call(
        functools.partial(_matmul_bias_kernel, relu=relu),
        out_shape=jax.ShapeDtypeStruct((M, N), out_dtype),
        grid_spec=pltpu.PrefetchScalarGridSpec(
            num_scalar_prefetch=0,
            grid=(grid_m,),
            in_specs=[
                pl.BlockSpec((tm, K), lambda i: (i, 0)),   # activation tile
                pl.BlockSpec((K, N), lambda i: (0, 0)),    # whole weight (fetched once)
                pl.BlockSpec((1, N), lambda i: (0, 0)),    # bias (fetched once)
            ],
            out_specs=pl.BlockSpec((tm, N), lambda i: (i, 0)),
        ),
        compiler_params=pltpu.CompilerParams(
            dimension_semantics=("parallel",)),
        cost_estimate=cost,
    )(a, b, bias2d)


# ----------------------------------------------------------------------------
# Pallas kernel: fused MLP head   out = (relu(x @ Wd + bd)) @ Wo + bo
# ----------------------------------------------------------------------------
def _mlp_head_kernel(x_ref, wd_ref, bd_ref, wo_ref, bo_ref, o_ref):
    h = jnp.dot(x_ref[...], wd_ref[...], preferred_element_type=jnp.float32)
    h = jnp.maximum(h + bd_ref[...], 0.0)
    out = jnp.dot(h, wo_ref[...], preferred_element_type=jnp.float32)
    o_ref[...] = (out + bo_ref[...]).astype(o_ref.dtype)


def mlp_head(x, wd, bd, wo, bo, n_actions):
    M, K = x.shape          # (B, 3136)
    H = wd.shape[1]         # 512
    Np = wo.shape[1]        # head output padded to 128 lanes at init

    cost = pl.CostEstimate(
        flops=2 * M * K * H + 2 * M * H * Np,
        transcendentals=0,
        bytes_accessed=int(x.size * x.dtype.itemsize + wd.size * wd.dtype.itemsize
                           + bd.size * 4 + wo.size * 4 + bo.size * 4 + M * Np * 4),
    )

    out = pl.pallas_call(
        _mlp_head_kernel,
        out_shape=jax.ShapeDtypeStruct((M, Np), jnp.float32),
        grid_spec=pltpu.PrefetchScalarGridSpec(
            num_scalar_prefetch=0,
            grid=(1,),
            in_specs=[
                pl.BlockSpec((M, K), lambda i: (0, 0)),
                pl.BlockSpec((K, H), lambda i: (0, 0)),
                pl.BlockSpec((1, H), lambda i: (0, 0)),
                pl.BlockSpec((H, Np), lambda i: (0, 0)),
                pl.BlockSpec((1, Np), lambda i: (0, 0)),
            ],
            out_specs=pl.BlockSpec((M, Np), lambda i: (0, 0)),
        ),
        compiler_params=pltpu.CompilerParams(
            dimension_semantics=("arbitrary",)),
        cost_estimate=cost,
    )(x, wd, bd, wo, bo)
    return out[:, :n_actions]


# ----------------------------------------------------------------------------
# Conv2d (valid padding) via NHWC im2col + Pallas matmul (bias + ReLU fused)
# ----------------------------------------------------------------------------
def _im2col_nhwc(x, kh, kw, stride):
    """x: [B, H, W, C] -> ([B*Ho*Wo, kh*kw*C], Ho, Wo); columns ordered (kh, kw, C)."""
    B, H, W, C = x.shape
    Ho = (H - kh) // stride + 1
    Wo = (W - kw) // stride + 1
    cols = []
    for i in range(kh):
        for j in range(kw):
            cols.append(x[:, i:i + stride * Ho:stride,
                          j:j + stride * Wo:stride, :])       # [B, Ho, Wo, C]
    patches = jnp.stack(cols, axis=3)                          # [B, Ho, Wo, kh*kw, C]
    return patches.reshape(B * Ho * Wo, kh * kw * C), Ho, Wo


def conv2d_relu_nhwc(x, w_mat, bias2d, *, kh, kw, stride):
    """x: [B,H,W,C] bf16, w_mat: [kh*kw*Cin, Cout] bf16 -> [B,Ho,Wo,Cout] bf16."""
    B = x.shape[0]
    a, Ho, Wo = _im2col_nhwc(x, kh, kw, stride)
    Cout = w_mat.shape[1]
    y = matmul_bias_act(a, w_mat, bias2d, relu=True, out_dtype=jnp.bfloat16)
    return y.reshape(B, Ho, Wo, Cout)


# ----------------------------------------------------------------------------
# Parameters: torch-layout init, then one-time transform into kernel layout
# ----------------------------------------------------------------------------
def init_torch_params(key, n_actions):
    ks = jax.random.split(key, 10)
    s = 0.05
    return {
        "w1": jax.random.normal(ks[0], (32, 4, 8, 8), jnp.float32) * s,
        "b1": jax.random.normal(ks[1], (32,), jnp.float32) * s,
        "w2": jax.random.normal(ks[2], (64, 32, 4, 4), jnp.float32) * s,
        "b2": jax.random.normal(ks[3], (64,), jnp.float32) * s,
        "w3": jax.random.normal(ks[4], (64, 64, 3, 3), jnp.float32) * s,
        "b3": jax.random.normal(ks[5], (64,), jnp.float32) * s,
        "wd": jax.random.normal(ks[6], (512, 3136), jnp.float32) * s,   # torch Linear: [out, in]
        "bd": jax.random.normal(ks[7], (512,), jnp.float32) * s,
        "wo": jax.random.normal(ks[8], (n_actions, 512), jnp.float32) * s,
        "bo": jax.random.normal(ks[9], (n_actions,), jnp.float32) * s,
    }


def prepare_params(p, n_actions):
    """One-time (init) transform: pre-transpose/permute/pad weights into the
    matmul-ready layouts used by the kernels."""
    def conv_mat(w):
        # [Cout, Cin, kh, kw] -> [kh*kw*Cin, Cout], rows ordered (kh, kw, Cin)
        Cout, Cin, kh, kw = w.shape
        return w.transpose(2, 3, 1, 0).reshape(kh * kw * Cin, Cout).astype(jnp.bfloat16)

    # Dense weight: torch expects NCHW-flatten (c*49 + h*7 + w) input ordering.
    # We flatten NHWC, so pre-permute the input columns once here.
    wd = p["wd"].reshape(512, 64, 7, 7).transpose(0, 2, 3, 1).reshape(512, 3136)
    wd = wd.T.astype(jnp.bfloat16)                       # [3136, 512]

    # Head weight: transpose and pad output dim to a lane-dense 128.
    n_pad = max(128, ((n_actions + 127) // 128) * 128)
    wo = jnp.zeros((512, n_pad), jnp.float32).at[:, :n_actions].set(p["wo"].T)
    bo = jnp.zeros((1, n_pad), jnp.float32).at[0, :n_actions].set(p["bo"])

    return {
        "w1": conv_mat(p["w1"]), "b1": p["b1"].reshape(1, -1).astype(jnp.float32),
        "w2": conv_mat(p["w2"]), "b2": p["b2"].reshape(1, -1).astype(jnp.float32),
        "w3": conv_mat(p["w3"]), "b3": p["b3"].reshape(1, -1).astype(jnp.float32),
        "wd": wd, "bd": p["bd"].reshape(1, -1).astype(jnp.float32),
        "wo": wo, "bo": bo,
    }


# ----------------------------------------------------------------------------
# Net (batch_norm=False path) forward
# ----------------------------------------------------------------------------
def net_forward(kp, x, *, n_actions):
    # x: [B, 4, H, W] (torch NCHW). Convert once to NHWC + bf16.
    x = jnp.transpose(x, (0, 2, 3, 1)).astype(jnp.bfloat16)
    x = conv2d_relu_nhwc(x, kp["w1"], kp["b1"], kh=8, kw=8, stride=4)   # [B,20,20,32]
    x = conv2d_relu_nhwc(x, kp["w2"], kp["b2"], kh=4, kw=4, stride=2)   # [B, 9, 9,64]
    x = conv2d_relu_nhwc(x, kp["w3"], kp["b3"], kh=3, kw=3, stride=1)   # [B, 7, 7,64]
    B = x.shape[0]
    x = x.reshape(B, 7 * 7 * 64)   # NHWC flatten; wd columns were pre-permuted to match
    # Fused dense + ReLU + output head in a single pallas_call.
    return mlp_head(x, kp["wd"], kp["bd"], kp["wo"], kp["bo"], n_actions)


if __name__ == "__main__":
    key = jax.random.PRNGKey(0)
    k_params, k_x = jax.random.split(key)

    n_actions = 3
    batch = 2
    # 84x84x4 input is implied by Linear(3136, 512): 84 -> 20 -> 9 -> 7, 64*7*7 = 3136.
    x = jax.random.normal(k_x, (batch, 4, 84, 84), jnp.float32)

    torch_params = init_torch_params(k_params, n_actions)
    kparams = prepare_params(torch_params, n_actions)

    fwd = jax.jit(functools.partial(net_forward, n_actions=n_actions))
    out = fwd(kparams, x)
    out = jax.block_until_ready(out)
    assert out.shape == (batch, n_actions), out.shape
    print("KERNEL_OK")
</pallas_src>

<mosaic_0001>
module attributes {stable_mosaic.version = 11 : i64} {
  func.func @_matmul_bias_kernel(%arg0: i32, %arg1: memref<400x256xbf16, #tpu.memory_space<vmem>>, %arg2: memref<256x32xbf16, #tpu.memory_space<vmem>>, %arg3: memref<1x32xf32, #tpu.memory_space<vmem>>, %arg4: memref<400x32xbf16, #tpu.memory_space<vmem>>) attributes {dimension_semantics = [#tpu.dimension_semantics<parallel>], iteration_bounds = array<i64: 2>, scalar_prefetch = 0 : i64, scratch_operands = 0 : i64, tpu.core_type = #tpu.core_type<tc>, window_params = [{transform_indices = @transform_0, window_bounds = array<i64: 400, 256>}, {pipeline_mode = #tpu.pipeline_mode<synchronous>, transform_indices = @transform_1, window_bounds = array<i64: 256, 32>}, {pipeline_mode = #tpu.pipeline_mode<synchronous>, transform_indices = @transform_2, window_bounds = array<i64: 1, 32>}, {transform_indices = @transform_3, window_bounds = array<i64: 400, 32>}]} {
    %c0 = arith.constant 0 : index
    %c0_0 = arith.constant 0 : index
    %0 = vector.load %arg1[%c0, %c0_0] : memref<400x256xbf16, #tpu.memory_space<vmem>>, vector<400x256xbf16>
    %c0_1 = arith.constant 0 : index
    %c0_2 = arith.constant 0 : index
    %1 = vector.load %arg2[%c0_1, %c0_2] : memref<256x32xbf16, #tpu.memory_space<vmem>>, vector<256x32xbf16>
    %cst = arith.constant dense<0.000000e+00> : vector<400x32xf32>
    %2 = tpu.matmul %0, %1, %cst {dimension_numbers = #tpu.dot_dimension_numbers<[1], [0], [0], [1], [0, 0, 1, 1], [], []>} : vector<400x256xbf16>, vector<256x32xbf16>, vector<400x32xf32> -> vector<400x32xf32>
    %c0_3 = arith.constant 0 : index
    %c0_4 = arith.constant 0 : index
    %3 = vector.load %arg3[%c0_3, %c0_4] : memref<1x32xf32, #tpu.memory_space<vmem>>, vector<1x32xf32>
    %4 = vector.broadcast %3 : vector<1x32xf32> to vector<400x32xf32>
    %5 = arith.addf %2, %4 : vector<400x32xf32>
    %cst_5 = arith.constant 0.000000e+00 : f32
    %6 = vector.broadcast %cst_5 : f32 to vector<400x32xf32>
    %7 = arith.maximumf %5, %6 : vector<400x32xf32>
    %8 = arith.truncf %7 : vector<400x32xf32> to vector<400x32xbf16>
    %c0_6 = arith.constant 0 : index
    %c0_7 = arith.constant 0 : index
    %9 = vector.load %arg4[%c0_6, %c0_7] : memref<400x32xbf16, #tpu.memory_space<vmem>>, vector<400x32xbf16>
    tpu.vector_store %arg4[%c0_6, %c0_7], %8 {strides = array<i32>} : memref<400x32xbf16, #tpu.memory_space<vmem>>, vector<400x32xbf16>,
    return
  }
  func.func @transform_0(%arg0: i32) -> (i32, i32) {
    %c0_i32 = arith.constant 0 : i32
    %c0_i32_0 = arith.constant 0 : i32
    return %arg0, %c0_i32 : i32, i32
  }
  func.func @transform_1(%arg0: i32) -> (i32, i32) {
    %c0_i32 = arith.constant 0 : i32
    %c0_i32_0 = arith.constant 0 : i32
    %c0_i32_1 = arith.constant 0 : i32
    return %c0_i32, %c0_i32_0 : i32, i32
  }
  func.func @transform_2(%arg0: i32) -> (i32, i32) {
    %c0_i32 = arith.constant 0 : i32
    %c0_i32_0 = arith.constant 0 : i32
    %c0_i32_1 = arith.constant 0 : i32
    return %c0_i32, %c0_i32_0 : i32, i32
  }
  func.func @transform_3(%arg0: i32) -> (i32, i32) {
    %c0_i32 = arith.constant 0 : i32
    %c0_i32_0 = arith.constant 0 : i32
    return %arg0, %c0_i32 : i32, i32
  }
}

module attributes {stable_mosaic.version = 11 : i64} {
  func.func @_matmul_bias_kernel(%arg0: i32, %arg1: memref<162x512xbf16, #tpu.memory_space<vmem>>, %arg2: memref<512x64xbf16, #tpu.memory_space<vmem>>, %arg3: memref<1x64xf32, #tpu.memory_space<vmem>>, %arg4: memref<162x64xbf16, #tpu.memory_space<vmem>>) attributes {dimension_semantics = [#tpu.dimension_semantics<parallel>], iteration_bounds = array<i64: 1>, scalar_prefetch = 0 : i64, scratch_operands = 0 : i64, tpu.core_type = #tpu.core_type<tc>, window_params = [{transform_indices = @transform_0, window_bounds = array<i64: 162, 512>}, {pipeline_mode = #tpu.pipeline_mode<synchronous>, transform_indices = @transform_1, window_bounds = array<i64: 512, 64>}, {pipeline_mode = #tpu.pipeline_mode<synchronous>, transform_indices = @transform_2, window_bounds = array<i64: 1, 64>}, {transform_indices = @transform_3, window_bounds = array<i64: 162, 64>}]} {
    %c0 = arith.constant 0 : index
    %c0_0 = arith.constant 0 : index
    %0 = vector.load %arg1[%c0, %c0_0] : memref<162x512xbf16, #tpu.memory_space<vmem>>, vector<162x512xbf16>
    %c0_1 = arith.constant 0 : index
    %c0_2 = arith.constant 0 : index
    %1 = vector.load %arg2[%c0_1, %c0_2] : memref<512x64xbf16, #tpu.memory_space<vmem>>, vector<512x64xbf16>
    %cst = arith.constant dense<0.000000e+00> : vector<162x64xf32>
    %2 = tpu.matmul %0, %1, %cst {dimension_numbers = #tpu.dot_dimension_numbers<[1], [0], [0], [1], [0, 0, 1, 1], [], []>} : vector<162x512xbf16>, vector<512x64xbf16>, vector<162x64xf32> -> vector<162x64xf32>
    %c0_3 = arith.constant 0 : index
    %c0_4 = arith.constant 0 : index
    %3 = vector.load %arg3[%c0_3, %c0_4] : memref<1x64xf32, #tpu.memory_space<vmem>>, vector<1x64xf32>
    %4 = vector.broadcast %3 : vector<1x64xf32> to vector<162x64xf32>
    %5 = arith.addf %2, %4 : vector<162x64xf32>
    %cst_5 = arith.constant 0.000000e+00 : f32
    %6 = vector.broadcast %cst_5 : f32 to vector<162x64xf32>
    %7 = arith.maximumf %5, %6 : vector<162x64xf32>
    %8 = arith.truncf %7 : vector<162x64xf32> to vector<162x64xbf16>
    %c0_6 = arith.constant 0 : index
    %c0_7 = arith.constant 0 : index
    %9 = vector.load %arg4[%c0_6, %c0_7] : memref<162x64xbf16, #tpu.memory_space<vmem>>, vector<162x64xbf16>
    tpu.vector_store %arg4[%c0_6, %c0_7], %8 {strides = array<i32>} : memref<162x64xbf16, #tpu.memory_space<vmem>>, vector<162x64xbf16>,
    return
  }
  func.func @transform_0(%arg0: i32) -> (i32, i32) {
    %c0_i32 = arith.constant 0 : i32
    %c0_i32_0 = arith.constant 0 : i32
    return %arg0, %c0_i32 : i32, i32
  }
  func.func @transform_1(%arg0: i32) -> (i32, i32) {
    %c0_i32 = arith.constant 0 : i32
    %c0_i32_0 = arith.constant 0 : i32
    %c0_i32_1 = arith.constant 0 : i32
    return %c0_i32, %c0_i32_0 : i32, i32
  }
  func.func @transform_2(%arg0: i32) -> (i32, i32) {
    %c0_i32 = arith.constant 0 : i32
    %c0_i32_0 = arith.constant 0 : i32
    %c0_i32_1 = arith.constant 0 : i32
    return %c0_i32, %c0_i32_0 : i32, i32
  }
  func.func @transform_3(%arg0: i32) -> (i32, i32) {
    %c0_i32 = arith.constant 0 : i32
    %c0_i32_0 = arith.constant 0 : i32
    return %arg0, %c0_i32 : i32, i32
  }
}

module attributes {stable_mosaic.version = 11 : i64} {
  func.func @_matmul_bias_kernel(%arg0: i32, %arg1: memref<98x576xbf16, #tpu.memory_space<vmem>>, %arg2: memref<576x64xbf16, #tpu.memory_space<vmem>>, %arg3: memref<1x64xf32, #tpu.memory_space<vmem>>, %arg4: memref<98x64xbf16, #tpu.memory_space<vmem>>) attributes {dimension_semantics = [#tpu.dimension_semantics<parallel>], iteration_bounds = array<i64: 1>, scalar_prefetch = 0 : i64, scratch_operands = 0 : i64, tpu.core_type = #tpu.core_type<tc>, window_params = [{transform_indices = @transform_0, window_bounds = array<i64: 98, 576>}, {pipeline_mode = #tpu.pipeline_mode<synchronous>, transform_indices = @transform_1, window_bounds = array<i64: 576, 64>}, {pipeline_mode = #tpu.pipeline_mode<synchronous>, transform_indices = @transform_2, window_bounds = array<i64: 1, 64>}, {transform_indices = @transform_3, window_bounds = array<i64: 98, 64>}]} {
    %c0 = arith.constant 0 : index
    %c0_0 = arith.constant 0 : index
    %0 = vector.load %arg1[%c0, %c0_0] : memref<98x576xbf16, #tpu.memory_space<vmem>>, vector<98x576xbf16>
    %c0_1 = arith.constant 0 : index
    %c0_2 = arith.constant 0 : index
    %1 = vector.load %arg2[%c0_1, %c0_2] : memref<576x64xbf16, #tpu.memory_space<vmem>>, vector<576x64xbf16>
    %cst = arith.constant dense<0.000000e+00> : vector<98x64xf32>
    %2 = tpu.matmul %0, %1, %cst {dimension_numbers = #tpu.dot_dimension_numbers<[1], [0], [0], [1], [0, 0, 1, 1], [], []>} : vector<98x576xbf16>, vector<576x64xbf16>, vector<98x64xf32> -> vector<98x64xf32>
    %c0_3 = arith.constant 0 : index
    %c0_4 = arith.constant 0 : index
    %3 = vector.load %arg3[%c0_3, %c0_4] : memref<1x64xf32, #tpu.memory_space<vmem>>, vector<1x64xf32>
    %4 = vector.broadcast %3 : vector<1x64xf32> to vector<98x64xf32>
    %5 = arith.addf %2, %4 : vector<98x64xf32>
    %cst_5 = arith.constant 0.000000e+00 : f32
    %6 = vector.broadcast %cst_5 : f32 to vector<98x64xf32>
    %7 = arith.maximumf %5, %6 : vector<98x64xf32>
    %8 = arith.truncf %7 : vector<98x64xf32> to vector<98x64xbf16>
    %c0_6 = arith.constant 0 : index
    %c0_7 = arith.constant 0 : index
    %9 = vector.load %arg4[%c0_6, %c0_7] : memref<98x64xbf16, #tpu.memory_space<vmem>>, vector<98x64xbf16>
    tpu.vector_store %arg4[%c0_6, %c0_7], %8 {strides = array<i32>} : memref<98x64xbf16, #tpu.memory_space<vmem>>, vector<98x64xbf16>,
    return
  }
  func.func @transform_0(%arg0: i32) -> (i32, i32) {
    %c0_i32 = arith.constant 0 : i32
    %c0_i32_0 = arith.constant 0 : i32
    return %arg0, %c0_i32 : i32, i32
  }
  func.func @transform_1(%arg0: i32) -> (i32, i32) {
    %c0_i32 = arith.constant 0 : i32
    %c0_i32_0 = arith.constant 0 : i32
    %c0_i32_1 = arith.constant 0 : i32
    return %c0_i32, %c0_i32_0 : i32, i32
  }
  func.func @transform_2(%arg0: i32) -> (i32, i32) {
    %c0_i32 = arith.constant 0 : i32
    %c0_i32_0 = arith.constant 0 : i32
    %c0_i32_1 = arith.constant 0 : i32
    return %c0_i32, %c0_i32_0 : i32, i32
  }
  func.func @transform_3(%arg0: i32) -> (i32, i32) {
    %c0_i32 = arith.constant 0 : i32
    %c0_i32_0 = arith.constant 0 : i32
    return %arg0, %c0_i32 : i32, i32
  }
}

module attributes {stable_mosaic.version = 11 : i64} {
  func.func @_mlp_head_kernel(%arg0: i32, %arg1: memref<2x3136xbf16, #tpu.memory_space<vmem>>, %arg2: memref<3136x512xbf16, #tpu.memory_space<vmem>>, %arg3: memref<1x512xf32, #tpu.memory_space<vmem>>, %arg4: memref<512x128xf32, #tpu.memory_space<vmem>>, %arg5: memref<1x128xf32, #tpu.memory_space<vmem>>, %arg6: memref<2x128xf32, #tpu.memory_space<vmem>>) attributes {dimension_semantics = [#tpu.dimension_semantics<arbitrary>], iteration_bounds = array<i64: 1>, scalar_prefetch = 0 : i64, scratch_operands = 0 : i64, tpu.core_type = #tpu.core_type<tc>, window_params = [{pipeline_mode = #tpu.pipeline_mode<synchronous>, transform_indices = @transform_0, window_bounds = array<i64: 2, 3136>}, {pipeline_mode = #tpu.pipeline_mode<synchronous>, transform_indices = @transform_1, window_bounds = array<i64: 3136, 512>}, {pipeline_mode = #tpu.pipeline_mode<synchronous>, transform_indices = @transform_2, window_bounds = array<i64: 1, 512>}, {pipeline_mode = #tpu.pipeline_mode<synchronous>, transform_indices = @transform_3, window_bounds = array<i64: 512, 128>}, {pipeline_mode = #tpu.pipeline_mode<synchronous>, transform_indices = @transform_4, window_bounds = array<i64: 1, 128>}, {pipeline_mode = #tpu.pipeline_mode<synchronous>, transform_indices = @transform_5, window_bounds = array<i64: 2, 128>}]} {
    %c0 = arith.constant 0 : index
    %c0_0 = arith.constant 0 : index
    %0 = vector.load %arg1[%c0, %c0_0] : memref<2x3136xbf16, #tpu.memory_space<vmem>>, vector<2x3136xbf16>
    %c0_1 = arith.constant 0 : index
    %c0_2 = arith.constant 0 : index
    %1 = vector.load %arg2[%c0_1, %c0_2] : memref<3136x512xbf16, #tpu.memory_space<vmem>>, vector<3136x512xbf16>
    %cst = arith.constant dense<0.000000e+00> : vector<2x512xf32>
    %2 = tpu.matmul %0, %1, %cst {dimension_numbers = #tpu.dot_dimension_numbers<[1], [0], [0], [1], [0, 0, 1, 1], [], []>} : vector<2x3136xbf16>, vector<3136x512xbf16>, vector<2x512xf32> -> vector<2x512xf32>
    %c0_3 = arith.constant 0 : index
    %c0_4 = arith.constant 0 : index
    %3 = vector.load %arg3[%c0_3, %c0_4] : memref<1x512xf32, #tpu.memory_space<vmem>>, vector<1x512xf32>
    %4 = vector.broadcast %3 : vector<1x512xf32> to vector<2x512xf32>
    %5 = arith.addf %2, %4 : vector<2x512xf32>
    %cst_5 = arith.constant 0.000000e+00 : f32
    %6 = vector.broadcast %cst_5 : f32 to vector<2x512xf32>
    %7 = arith.maximumf %5, %6 : vector<2x512xf32>
    %c0_6 = arith.constant 0 : index
    %c0_7 = arith.constant 0 : index
    %8 = vector.load %arg4[%c0_6, %c0_7] : memref<512x128xf32, #tpu.memory_space<vmem>>, vector<512x128xf32>
    %cst_8 = arith.constant dense<0.000000e+00> : vector<2x128xf32>
    %9 = tpu.matmul %7, %8, %cst_8 {dimension_numbers = #tpu.dot_dimension_numbers<[1], [0], [0], [1], [0, 0, 1, 1], [], []>} : vector<2x512xf32>, vector<512x128xf32>, vector<2x128xf32> -> vector<2x128xf32>
    %c0_9 = arith.constant 0 : index
    %c0_10 = arith.constant 0 : index
    %10 = vector.load %arg5[%c0_9, %c0_10] : memref<1x128xf32, #tpu.memory_space<vmem>>, vector<1x128xf32>
    %11 = vector.broadcast %10 : vector<1x128xf32> to vector<2x128xf32>
    %12 = arith.addf %9, %11 : vector<2x128xf32>
    %c0_11 = arith.constant 0 : index
    %c0_12 = arith.constant 0 : index
    %13 = vector.load %arg6[%c0_11, %c0_12] : memref<2x128xf32, #tpu.memory_space<vmem>>, vector<2x128xf32>
    tpu.vector_store %arg6[%c0_11, %c0_12], %12 {strides = array<i32>} : memref<2x128xf32, #tpu.memory_space<vmem>>, vector<2x128xf32>,
    return
  }
  func.func @transform_0(%arg0: i32) -> (i32, i32) {
    %c0_i32 = arith.constant 0 : i32
    %c0_i32_0 = arith.constant 0 : i32
    %c0_i32_1 = arith.constant 0 : i32
    return %c0_i32, %c0_i32_0 : i32, i32
  }
  func.func @transform_1(%arg0: i32) -> (i32, i32) {
    %c0_i32 = arith.constant 0 : i32
    %c0_i32_0 = arith.constant 0 : i32
    %c0_i32_1 = arith.constant 0 : i32
    return %c0_i32, %c0_i32_0 : i32, i32
  }
  func.func @transform_2(%arg0: i32) -> (i32, i32) {
    %c0_i32 = arith.constant 0 : i32
    %c0_i32_0 = arith.constant 0 : i32
    %c0_i32_1 = arith.constant 0 : i32
    return %c0_i32, %c0_i32_0 : i32, i32
  }
  func.func @transform_3(%arg0: i32) -> (i32, i32) {
    %c0_i32 = arith.constant 0 : i32
    %c0_i32_0 = arith.constant 0 : i32
    %c0_i32_1 = arith.constant 0 : i32
    return %c0_i32, %c0_i32_0 : i32, i32
  }
  func.func @transform_4(%arg0: i32) -> (i32, i32) {
    %c0_i32 = arith.constant 0 : i32
    %c0_i32_0 = arith.constant 0 : i32
    %c0_i32_1 = arith.constant 0 : i32
    return %c0_i32, %c0_i32_0 : i32, i32
  }
  func.func @transform_5(%arg0: i32) -> (i32, i32) {
    %c0_i32 = arith.constant 0 : i32
    %c0_i32_0 = arith.constant 0 : i32
    %c0_i32_1 = arith.constant 0 : i32
    return %c0_i32, %c0_i32_0 : i32, i32
  }
}

</mosaic_0001>

<bundles_post_ra>
// kernel: net_forward.4
= control target key start
LH: loop header
LB: loop body
LE: loop exit
PB: predicated region body
PF: predicated region fallthrough
CT: control target
= control target key end

     0   :  { %s1542_s12 = smov 0   ;;  %s1852_s0 = inlined_call_operand.vmem [shape: bf16[800,256], index: 0, kind: input, shape index: {}]   ;;  %s1853_s1 = inlined_call_operand.vmem [shape: bf16[256,32], index: 1, kind: input, shape index: {}]   ;;  %s1854_s2 = inlined_call_operand.vmem [shape: f32[1,32], index: 2, kind: input, shape index: {}]   ;;  %s1855_s3 = inlined_call_operand.vmem [shape: bf16[800,32], index: 3, kind: output, shape index: {}]  }
   0x1 LB: > { %s1203_s13 = sadd.s32 4294967295, %s1519_s12   ;;  %p1207_p0 = scmp.ge.s32.totalorder %s1519_s12, 1  ;;  %s1519_s12 = sphi %s1542_s12, %s13_s12  }
   0x2   : > { %p139_p1 = scmp.lt.s32.totalorder %s1519_s12, 3 }
   0x4   : > { %p140_p2 = pnand %p1207_p0, %p139_p1 }
   0x5   : > { %s164_s16 = smul.u32 (!%p140_p2), 50, %s1203_s13 }
   0x6   : > { %143 = sbr.rel (%p140_p2) target bundleno = 376 (0x178), region = 32 }
   0x7   : > { %p165_p3 = scmp.lt.s32.totalorder (!%p140_p2), %s164_s16, 99 }
   0xb   : > { %v1422_v0 = vld [vmem:[%s1853_s1 + $0x38] sm:$0xff]   ;;  %v1521_v1 = vmov 0   ;;  %v1423_v2 = vld [vmem:[%s1853_s1 + $0x30] sm:$0xff]   ;;  %v1424_v3 = vld [vmem:[%s1853_s1 + $0x28] sm:$0xff]   ;;  %s1857_s16 = smov (!%p165_p3, %s164_s16), 99  ;;  %vm1096_vm0 = vcmask 257024  }
   0xc   : > { %613 = vmatprep.subr.bf16.mxu0 %v1521_v1  ;;  %1381 = vmatprep.subr.bf16.mxu1 %v1521_v1  ;;  %v1425_v4 = vld [vmem:[%s1853_s1 + $0x20] sm:$0xff]   ;;  %s1330_s23 = sshll.u32 %s1857_s16, 3  ;;  %v1426_v5 = vld [vmem:[%s1853_s1 + $0x18] sm:$0xff]   ;;  %v1427_v7 = vld [vmem:[%s1853_s1 + $0x10] sm:$0xff]   ;;  %s1210_s29 = sshll.u32 %s1857_s16, 2 }
   0xd   : > { %614 = vmatpush1.bf16.msra.mxu0 %v1422_v0  ;;  %1397 = vmatpush1.bf16.msra.mxu1 %v1422_v0  ;;  %s1579_s28 = scalar_lea.vmem %s1852_s0, %s1330_s23  ;;  %v1428_v9 = vld [vmem:[%s1853_s1 + $0x8] sm:$0xff]   ;;  %v1429_v10 = vld [vmem:[%s1853_s1] sm:$0xff]   ;;  %v1430_v11 = vld [vmem:[%s1853_s1 + $0x78] sm:$0xff]  }
   0xe   : > { %615 = vmatprep.subr.bf16.mxu0 %v1521_v1  ;;  %1382 = vmatprep.subr.bf16.mxu1 %v1521_v1  ;;  %v1440_v6 = vld [vmem:[%s1579_s28 + $0x4] ss:$8 sps:$4 sm:$0xff]   ;;  %v1443_v8 = vld [vmem:[%s1579_s28 + $0xd4] ss:$8 sps:$4 sm:$0xff]   ;;  %v1438_v19 = vld [vmem:[%s1579_s28] ss:$8 sps:$4 sm:$0xff]  }
   0xf   : > { %645 = vmatprep.mubr.bf16.mxu0 %v1440_v6  ;;  %749 = vmatprep.mubr.bf16.mxu1 %v1443_v8  ;;  %v1431_v12 = vld [vmem:[%s1853_s1 + $0x70] sm:$0xff]   ;;  %v1432_v13 = vld [vmem:[%s1853_s1 + $0x68] sm:$0xff]   ;;  %v1433_v14 = vld [vmem:[%s1853_s1 + $0x60] sm:$0xff]  }
  0x10   : > { %v1434_v15 = vld [vmem:[%s1853_s1 + $0x58] sm:$0xff]   ;;  %v1435_v16 = vld [vmem:[%s1853_s1 + $0x50] sm:$0xff]   ;;  %v1436_v17 = vld [vmem:[%s1853_s1 + $0x48] sm:$0xff]  }
  0x11   : > { %616 = vmatpush1.bf16.msra.mxu0 %v1423_v2  ;;  %1398 = vmatpush1.bf16.msra.mxu1 %v1423_v2  ;;  %v1437_v18 = vld [vmem:[%s1853_s1 + $0x40] sm:$0xff]   ;;  %v1441_v20 = vld [vmem:[%s1579_s28 + $0xd0] ss:$8 sps:$4 sm:$0xff]   ;;  %v1444_v21 = vld [vmem:[%s1579_s28 + $0x14] ss:$8 sps:$4 sm:$0xff]  }
  0x12   : > { %617 = vmatprep.subr.bf16.mxu0 %v1521_v1  ;;  %1383 = vmatprep.subr.bf16.mxu1 %v1521_v1  ;;  %v1447_v22 = vld [vmem:[%s1579_s28 + $0xe4] ss:$8 sps:$4 sm:$0xff]   ;;  %v1446_v23 = vld [vmem:[%s1579_s28 + $0x10] ss:$8 sps:$4 sm:$0xff]   ;;  %v1449_v24 = vld [vmem:[%s1579_s28 + $0xe0] ss:$8 sps:$4 sm:$0xff]  }
  0x13   : > { %v1450_v25 = vld [vmem:[%s1579_s28 + $0x24] ss:$8 sps:$4 sm:$0xff]   ;;  %v1453_v26 = vld [vmem:[%s1579_s28 + $0xf4] ss:$8 sps:$4 sm:$0xff]   ;;  %v1452_v27 = vld [vmem:[%s1579_s28 + $0x20] ss:$8 sps:$4 sm:$0xff]  }
  0x14   : > { %v1455_v28 = vld [vmem:[%s1579_s28 + $0xf0] ss:$8 sps:$4 sm:$0xff]   ;;  %v1456_v29 = vld [vmem:[%s1579_s28 + $0x34] ss:$8 sps:$4 sm:$0xff]   ;;  %v1459_v30 = vld [vmem:[%s1579_s28 + $0x104] ss:$8 sps:$4 sm:$0xff]  }
  0x15   : > { %618 = vmatpush1.bf16.msra.mxu0 %v1424_v3  ;;  %1399 = vmatpush1.bf16.msra.mxu1 %v1424_v3  ;;  %v1458_v31 = vld [vmem:[%s1579_s28 + $0x30] ss:$8 sps:$4 sm:$0xff]   ;;  %v1461_v32 = vld [vmem:[%s1579_s28 + $0x100] ss:$8 sps:$4 sm:$0xff]   ;;  %v1462_v33 = vld [vmem:[%s1579_s28 + $0x44] ss:$8 sps:$4 sm:$0xff]  }
  0x16   : > { %619 = vmatprep.subr.bf16.mxu0 %v1521_v1  ;;  %1384 = vmatprep.subr.bf16.mxu1 %v1521_v1  ;;  %v1465_v34 = vld [vmem:[%s1579_s28 + $0x114] ss:$8 sps:$4 sm:$0xff]   ;;  %v1464_v35 = vld [vmem:[%s1579_s28 + $0x40] ss:$8 sps:$4 sm:$0xff]   ;;  %v1467_v36 = vld [vmem:[%s1579_s28 + $0x110] ss:$8 sps:$4 sm:$0xff]  }
  0x17   : > { %v1468_v37 = vld [vmem:[%s1579_s28 + $0x54] ss:$8 sps:$4 sm:$0xff]   ;;  %v1471_v38 = vld [vmem:[%s1579_s28 + $0x124] ss:$8 sps:$4 sm:$0xff]   ;;  %v1470_v39 = vld [vmem:[%s1579_s28 + $0x50] ss:$8 sps:$4 sm:$0xff]  }
  0x18   : > { %v1473_v40 = vld [vmem:[%s1579_s28 + $0x120] ss:$8 sps:$4 sm:$0xff]   ;;  %v1474_v41 = vld [vmem:[%s1579_s28 + $0x64] ss:$8 sps:$4 sm:$0xff]   ;;  %v1477_v42 = vld [vmem:[%s1579_s28 + $0x134] ss:$8 sps:$4 sm:$0xff]  }
  0x19   : > { %620 = vmatpush1.bf16.msra.mxu0 %v1425_v4  ;;  %1400 = vmatpush1.bf16.msra.mxu1 %v1425_v4  ;;  %v1476_v43 = vld [vmem:[%s1579_s28 + $0x60] ss:$8 sps:$4 sm:$0xff]   ;;  %v1479_v44 = vld [vmem:[%s1579_s28 + $0x130] ss:$8 sps:$4 sm:$0xff]   ;;  %v1480_v45 = vld [vmem:[%s1579_s28 + $0x74] ss:$8 sps:$4 sm:$0xff]  }
  0x1a   : > { %621 = vmatprep.subr.bf16.mxu0 %v1521_v1  ;;  %1385 = vmatprep.subr.bf16.mxu1 %v1521_v1  ;;  %v1483_v46 = vld [vmem:[%s1579_s28 + $0x144] ss:$8 sps:$4 sm:$0xff]   ;;  %v1482_v47 = vld [vmem:[%s1579_s28 + $0x70] ss:$8 sps:$4 sm:$0xff]   ;;  %v1485_v48 = vld [vmem:[%s1579_s28 + $0x140] ss:$8 sps:$4 sm:$0xff]  }
  0x1b   : > { %v1486_v49 = vld [vmem:[%s1579_s28 + $0x84] ss:$8 sps:$4 sm:$0xff]   ;;  %v1489_v50 = vld [vmem:[%s1579_s28 + $0x154] ss:$8 sps:$4 sm:$0xff]   ;;  %v1488_v51 = vld [vmem:[%s1579_s28 + $0x80] ss:$8 sps:$4 sm:$0xff]  }
  0x1c   : > { %v1491_v52 = vld [vmem:[%s1579_s28 + $0x150] ss:$8 sps:$4 sm:$0xff]   ;;  %v1492_v53 = vld [vmem:[%s1579_s28 + $0x94] ss:$8 sps:$4 sm:$0xff]   ;;  %v1495_v54 = vld [vmem:[%s1579_s28 + $0x164] ss:$8 sps:$4 sm:$0xff]  }
  0x1d   : > { %622 = vmatpush1.bf16.msra.mxu0 %v1426_v5  ;;  %1401 = vmatpush1.bf16.msra.mxu1 %v1426_v5  ;;  %v1494_v55 = vld [vmem:[%s1579_s28 + $0x90] ss:$8 sps:$4 sm:$0xff]   ;;  %v1497_v56 = vld [vmem:[%s1579_s28 + $0x160] ss:$8 sps:$4 sm:$0xff]   ;;  %v1498_v57 = vld [vmem:[%s1579_s28 + $0xa4] ss:$8 sps:$4 sm:$0xff]  }
  0x1e   : > { %623 = vmatprep.subr.bf16.mxu0 %v1521_v1  ;;  %1386 = vmatprep.subr.bf16.mxu1 %v1521_v1  ;;  %v1501_v58 = vld [vmem:[%s1579_s28 + $0x174] ss:$8 sps:$4 sm:$0xff]   ;;  %v1500_v59 = vld [vmem:[%s1579_s28 + $0xa0] ss:$8 sps:$4 sm:$0xff]   ;;  %v1503_v60 = vld [vmem:[%s1579_s28 + $0x170] ss:$8 sps:$4 sm:$0xff]  }
  0x1f   : > { %v1504_v61 = vld [vmem:[%s1579_s28 + $0xb4] ss:$8 sps:$4 sm:$0xff]   ;;  %v1507_v62 = vld [vmem:[%s1579_s28 + $0x184] ss:$8 sps:$4 sm:$0xff]   ;;  %v1506_v63 = vld [vmem:[%s1579_s28 + $0xb0] ss:$8 sps:$4 sm:$0xff]  }
  0x20   : > { %v1509_v0 = vld [vmem:[%s1579_s28 + $0x180] ss:$8 sps:$4 sm:$0xff]  }
  0x21   : > { %624 = vmatpush1.bf16.msra.mxu0 %v1427_v7  ;;  %1402 = vmatpush1.bf16.msra.mxu1 %v1427_v7  ;;  %v1512_v2 = vld [vmem:[%s1579_s28 + $0xc0] ss:$8 sps:$4 sm:$0xff]  }
  0x22   : > { %625 = vmatprep.subr.bf16.mxu0 %v1521_v1  ;;  %1387 = vmatprep.subr.bf16.mxu1 %v1521_v1  ;;  %v1691_v3 = vld [vmem:[%s1854_s2] ss:$0 sm:$0xff] }
  0x25   : > { %626 = vmatpush1.bf16.msra.mxu0 %v1428_v9  ;;  %1403 = vmatpush1.bf16.msra.mxu1 %v1428_v9 }
  0x26   : > { %627 = vmatprep.subr.bf16.mxu0 %v1521_v1  ;;  %1388 = vmatprep.subr.bf16.mxu1 %v1521_v1 }
  0x29   : > { %628 = vmatpush1.bf16.msra.mxu0 %v1429_v10  ;;  %1404 = vmatpush1.bf16.msra.mxu1 %v1429_v10 }
  0x2a   : > { %629 = vmatprep.subr.bf16.mxu0 %v1521_v1  ;;  %1389 = vmatprep.subr.bf16.mxu1 %v1521_v1 }
  0x2d   : > { %630 = vmatpush2.bf16.msra.mxu0 %v1430_v11  ;;  %1405 = vmatpush2.bf16.msra.mxu1 %v1430_v11 }
  0x2e   : > { %631 = vmatprep.subr.bf16.mxu0 %v1521_v1  ;;  %1390 = vmatprep.subr.bf16.mxu1 %v1521_v1 }
  0x31   : > { %632 = vmatpush2.bf16.msra.mxu0 %v1431_v12  ;;  %1406 = vmatpush2.bf16.msra.mxu1 %v1431_v12 }
  0x32   : > { %633 = vmatprep.subr.bf16.mxu0 %v1521_v1  ;;  %1391 = vmatprep.subr.bf16.mxu1 %v1521_v1 }
  0x35   : > { %634 = vmatpush2.bf16.msra.mxu0 %v1432_v13  ;;  %1407 = vmatpush2.bf16.msra.mxu1 %v1432_v13 }
  0x36   : > { %635 = vmatprep.subr.bf16.mxu0 %v1521_v1  ;;  %1392 = vmatprep.subr.bf16.mxu1 %v1521_v1 }
  0x39   : > { %636 = vmatpush2.bf16.msra.mxu0 %v1433_v14  ;;  %1408 = vmatpush2.bf16.msra.mxu1 %v1433_v14 }
  0x3a   : > { %637 = vmatprep.subr.bf16.mxu0 %v1521_v1  ;;  %1393 = vmatprep.subr.bf16.mxu1 %v1521_v1 }
  0x3d   : > { %638 = vmatpush2.bf16.msra.mxu0 %v1434_v15  ;;  %1409 = vmatpush2.bf16.msra.mxu1 %v1434_v15 }
  0x3e   : > { %639 = vmatprep.subr.bf16.mxu0 %v1521_v1  ;;  %1394 = vmatprep.subr.bf16.mxu1 %v1521_v1 }
  0x41   : > { %640 = vmatpush2.bf16.msra.mxu0 %v1435_v16  ;;  %1410 = vmatpush2.bf16.msra.mxu1 %v1435_v16 }
  0x42   : > { %641 = vmatprep.subr.bf16.mxu0 %v1521_v1  ;;  %1395 = vmatprep.subr.bf16.mxu1 %v1521_v1 }
  0x45   : > { %642 = vmatpush2.bf16.msra.mxu0 %v1436_v17  ;;  %1411 = vmatpush2.bf16.msra.mxu1 %v1436_v17 }
  0x46   : > { %643 = vmatprep.subr.bf16.mxu0 %v1521_v1  ;;  %1396 = vmatprep.subr.bf16.mxu1 %v1521_v1  ;;  %v1510_v1 = vld [vmem:[%s1579_s28 + $0xc4] ss:$8 sps:$4 sm:$0xff]   ;;  %s1699_s28 = scalar_lea.vmem %s1855_s3, %s1210_s29 }
  0x49   : > { %644 = vmatpush2.bf16.msra.mxu0 %v1437_v18  ;;  %1412 = vmatpush2.bf16.msra.mxu1 %v1437_v18 }
  0x4c   : > { %646 = vmatmul.mubr.bf16.vlgmr.msra.gmra.mxu0 %v1438_v19  ;;  %750 = vmatmul.mubr.bf16.vlgmr.msra.gmra.mxu1 %v1441_v20 }
  0x4d   : > { %653 = vmatprep.mubr.bf16.mxu0 %v1444_v21  ;;  %757 = vmatprep.mubr.bf16.mxu1 %v1447_v22 }
  0x54   : > { %654 = vmatmul.mubr.bf16.gmra.mxu0 %v1446_v23  ;;  %758 = vmatmul.mubr.bf16.gmra.mxu1 %v1449_v24 }
  0x55   : > { %661 = vmatprep.mubr.bf16.mxu0 %v1450_v25  ;;  %765 = vmatprep.mubr.bf16.mxu1 %v1453_v26 }
  0x5c   : > { %662 = vmatmul.mubr.bf16.gmra.mxu0 %v1452_v27  ;;  %766 = vmatmul.mubr.bf16.gmra.mxu1 %v1455_v28 }
  0x5d   : > { %669 = vmatprep.mubr.bf16.mxu0 %v1456_v29  ;;  %773 = vmatprep.mubr.bf16.mxu1 %v1459_v30 }
  0x64   : > { %670 = vmatmul.mubr.bf16.gmra.mxu0 %v1458_v31  ;;  %774 = vmatmul.mubr.bf16.gmra.mxu1 %v1461_v32 }
  0x65   : > { %677 = vmatprep.mubr.bf16.mxu0 %v1462_v33  ;;  %781 = vmatprep.mubr.bf16.mxu1 %v1465_v34 }
  0x6c   : > { %678 = vmatmul.mubr.bf16.gmra.mxu0 %v1464_v35  ;;  %782 = vmatmul.mubr.bf16.gmra.mxu1 %v1467_v36 }
  0x6d   : > { %685 = vmatprep.mubr.bf16.mxu0 %v1468_v37  ;;  %789 = vmatprep.mubr.bf16.mxu1 %v1471_v38 }
  0x74   : > { %686 = vmatmul.mubr.bf16.gmra.mxu0 %v1470_v39  ;;  %790 = vmatmul.mubr.bf16.gmra.mxu1 %v1473_v40 }
  0x75   : > { %693 = vmatprep.mubr.bf16.mxu0 %v1474_v41  ;;  %797 = vmatprep.mubr.bf16.mxu1 %v1477_v42 }
  0x7c   : > { %694 = vmatmul.mubr.bf16.gmra.mxu0 %v1476_v43  ;;  %798 = vmatmul.mubr.bf16.gmra.mxu1 %v1479_v44 }
  0x7d   : > { %701 = vmatprep.mubr.bf16.mxu0 %v1480_v45  ;;  %805 = vmatprep.mubr.bf16.mxu1 %v1483_v46 }
  0x84   : > { %702 = vmatmul.mubr.bf16.gmra.mxu0 %v1482_v47  ;;  %806 = vmatmul.mubr.bf16.gmra.mxu1 %v1485_v48 }
  0x85   : > { %709 = vmatprep.mubr.bf16.mxu0 %v1486_v49  ;;  %813 = vmatprep.mubr.bf16.mxu1 %v1489_v50 }
  0x8c   : > { %710 = vmatmul.mubr.bf16.gmra.mxu0 %v1488_v51  ;;  %814 = vmatmul.mubr.bf16.gmra.mxu1 %v1491_v52 }
  0x8d   : > { %717 = vmatprep.mubr.bf16.mxu0 %v1492_v53  ;;  %821 = vmatprep.mubr.bf16.mxu1 %v1495_v54 }
  0x94   : > { %718 = vmatmul.mubr.bf16.gmra.mxu0 %v1494_v55  ;;  %822 = vmatmul.mubr.bf16.gmra.mxu1 %v1497_v56 }
  0x95   : > { %725 = vmatprep.mubr.bf16.mxu0 %v1498_v57  ;;  %829 = vmatprep.mubr.bf16.mxu1 %v1501_v58 }
  0x9c   : > { %726 = vmatmul.mubr.bf16.gmra.mxu0 %v1500_v59  ;;  %830 = vmatmul.mubr.bf16.gmra.mxu1 %v1503_v60 }
  0x9d   : > { %733 = vmatprep.mubr.bf16.mxu0 %v1504_v61  ;;  %837 = vmatprep.mubr.bf16.mxu1 %v1507_v62 }
  0xa4   : > { %734 = vmatmul.mubr.bf16.gmra.mxu0 %v1506_v63  ;;  %838 = vmatmul.mubr.bf16.gmra.mxu1 %v1509_v0 }
  0xa5   : > { %741 = vmatprep.mubr.bf16.mxu0 %v1510_v1 }
  0xac   : > { %742 = vmatmul.mubr.bf16.gmra.mxu0 %v1512_v2 }
 0x10c   : > { %v647_v4 = vpop.f32.mrf.mxu0  ;;  %v751_v5 = vpop.f32.mrf.mxu1 }
 0x10d   : > { %v648_v6 = vadd.f32 %v1691_v3, %v647_v4  ;;  %v752_v7 = vadd.f32 %v1691_v3, %v751_v5 }
 0x10e   : > { %v649_v8 = vpop.f32.mrf.mxu0  ;;  %v753_v9 = vpop.f32.mrf.mxu1 }
 0x10f   : > { %v846_v10 = vmax.f32 %v648_v6, 0.0  ;;  %v872_v11 = vmax.f32 %v752_v7, 0.0 }
 0x110   : > { %v650_v12 = vpop.f32.mrf.mxu0  ;;  %v754_v13 = vpop.f32.mrf.mxu1 }
 0x111   : > { %v1331_v14 = vpack.c.bf16 %v846_v10, %v846_v10  ;;  %v1357_v15 = vpack.c.bf16 %v872_v11, %v872_v11  ;;  %v651_v16 = vadd.f32 %v1691_v3, %v650_v12  ;;  %v755_v17 = vadd.f32 %v1691_v3, %v754_v13 }
 0x112   : > { %v652_v18 = vpop.f32.mrf.mxu0  ;;  %v756_v19 = vpop.f32.mrf.mxu1 }
 0x113   : > { %1097 = vst.msk [vmem:[%s1699_s28] sm:$0xf] %vm1096_vm0, %v1331_v14  ;;  %1123 = vst.msk [vmem:[%s1699_s28 + $0x68] sm:$0xf] %vm1096_vm0, %v1357_v15  ;;  %v847_v20 = vmax.f32 %v651_v16, 0.0  ;;  %v873_v21 = vmax.f32 %v755_v17, 0.0 }
 0x114   : > { %v655_v22 = vpop.f32.mrf.mxu0  ;;  %v759_v23 = vpop.f32.mrf.mxu1 }
 0x115   : > { %v1332_v24 = vpack.c.bf16 %v847_v20, %v847_v20  ;;  %v1358_v25 = vpack.c.bf16 %v873_v21, %v873_v21  ;;  %v656_v26 = vadd.f32 %v1691_v3, %v655_v22  ;;  %v760_v27 = vadd.f32 %v1691_v3, %v759_v23 }
 0x116   : > { %v657_v28 = vpop.f32.mrf.mxu0  ;;  %v761_v29 = vpop.f32.mrf.mxu1 }
 0x117   : > { %1098 = vst.msk [vmem:[%s1699_s28 + $0x4] sm:$0xf] %vm1096_vm0, %v1332_v24  ;;  %1124 = vst.msk [vmem:[%s1699_s28 + $0x6c] sm:$0xf] %vm1096_vm0, %v1358_v25  ;;  %v848_v30 = vmax.f32 %v656_v26, 0.0  ;;  %v874_v31 = vmax.f32 %v760_v27, 0.0 }
 0x118   : > { %v658_v32 = vpop.f32.mrf.mxu0  ;;  %v762_v33 = vpop.f32.mrf.mxu1 }
 0x119   : > { %v1333_v34 = vpack.c.bf16 %v848_v30, %v848_v30  ;;  %v1359_v35 = vpack.c.bf16 %v874_v31, %v874_v31  ;;  %v659_v36 = vadd.f32 %v1691_v3, %v658_v32  ;;  %v763_v37 = vadd.f32 %v1691_v3, %v762_v33 }
 0x11a   : > { %v660_v38 = vpop.f32.mrf.mxu0  ;;  %v764_v39 = vpop.f32.mrf.mxu1 }
 0x11b   : > { %1099 = vst.msk [vmem:[%s1699_s28 + $0x8] sm:$0xf] %vm1096_vm0, %v1333_v34  ;;  %1125 = vst.msk [vmem:[%s1699_s28 + $0x70] sm:$0xf] %vm1096_vm0, %v1359_v35  ;;  %v849_v40 = vmax.f32 %v659_v36, 0.0  ;;  %v875_v41 = vmax.f32 %v763_v37, 0.0 }
 0x11c   : > { %v663_v42 = vpop.f32.mrf.mxu0  ;;  %v767_v43 = vpop.f32.mrf.mxu1 }
 0x11d   : > { %v1334_v44 = vpack.c.bf16 %v849_v40, %v849_v40  ;;  %v1360_v45 = vpack.c.bf16 %v875_v41, %v875_v41  ;;  %v664_v46 = vadd.f32 %v1691_v3, %v663_v42  ;;  %v768_v47 = vadd.f32 %v1691_v3, %v767_v43 }
 0x11e   : > { %v665_v48 = vpop.f32.mrf.mxu0  ;;  %v769_v49 = vpop.f32.mrf.mxu1 }
 0x11f   : > { %1100 = vst.msk [vmem:[%s1699_s28 + $0xc] sm:$0xf] %vm1096_vm0, %v1334_v44  ;;  %1126 = vst.msk [vmem:[%s1699_s28 + $0x74] sm:$0xf] %vm1096_vm0, %v1360_v45  ;;  %v850_v50 = vmax.f32 %v664_v46, 0.0  ;;  %v876_v51 = vmax.f32 %v768_v47, 0.0 }
 0x120   : > { %v666_v52 = vpop.f32.mrf.mxu0  ;;  %v770_v53 = vpop.f32.mrf.mxu1 }
 0x121   : > { %v1335_v54 = vpack.c.bf16 %v850_v50, %v850_v50  ;;  %v1361_v55 = vpack.c.bf16 %v876_v51, %v876_v51  ;;  %v667_v56 = vadd.f32 %v1691_v3, %v666_v52  ;;  %v771_v57 = vadd.f32 %v1691_v3, %v770_v53 }
 0x122   : > { %v668_v58 = vpop.f32.mrf.mxu0  ;;  %v772_v59 = vpop.f32.mrf.mxu1 }
 0x123   : > { %1101 = vst.msk [vmem:[%s1699_s28 + $0x10] sm:$0xf] %vm1096_vm0, %v1335_v54  ;;  %1127 = vst.msk [vmem:[%s1699_s28 + $0x78] sm:$0xf] %vm1096_vm0, %v1361_v55  ;;  %v851_v60 = vmax.f32 %v667_v56, 0.0  ;;  %v877_v61 = vmax.f32 %v771_v57, 0.0 }
 0x124   : > { %v671_v62 = vpop.f32.mrf.mxu0  ;;  %v775_v63 = vpop.f32.mrf.mxu1 }
 0x125   : > { %v1336_v0 = vpack.c.bf16 %v851_v60, %v851_v60  ;;  %v1362_v1 = vpack.c.bf16 %v877_v61, %v877_v61  ;;  %v672_v2 = vadd.f32 %v1691_v3, %v671_v62  ;;  %v776_v4 = vadd.f32 %v1691_v3, %v775_v63 }
 0x126   : > { %v673_v5 = vpop.f32.mrf.mxu0  ;;  %v777_v6 = vpop.f32.mrf.mxu1 }
 0x127   : > { %1102 = vst.msk [vmem:[%s1699_s28 + $0x14] sm:$0xf] %vm1096_vm0, %v1336_v0  ;;  %1128 = vst.msk [vmem:[%s1699_s28 + $0x7c] sm:$0xf] %vm1096_vm0, %v1362_v1  ;;  %v852_v7 = vmax.f32 %v672_v2, 0.0  ;;  %v878_v8 = vmax.f32 %v776_v4, 0.0 }
 0x128   : > { %v674_v9 = vpop.f32.mrf.mxu0  ;;  %v778_v10 = vpop.f32.mrf.mxu1 }
 0x129   : > { %v1337_v11 = vpack.c.bf16 %v852_v7, %v852_v7  ;;  %v1363_v12 = vpack.c.bf16 %v878_v8, %v878_v8  ;;  %v675_v13 = vadd.f32 %v1691_v3, %v674_v9  ;;  %v779_v14 = vadd.f32 %v1691_v3, %v778_v10 }
 0x12a   : > { %v676_v15 = vpop.f32.mrf.mxu0  ;;  %v780_v16 = vpop.f32.mrf.mxu1 }
 0x12b   : > { %1103 = vst.msk [vmem:[%s1699_s28 + $0x18] sm:$0xf] %vm1096_vm0, %v1337_v11  ;;  %1129 = vst.msk [vmem:[%s1699_s28 + $0x80] sm:$0xf] %vm1096_vm0, %v1363_v12  ;;  %v853_v17 = vmax.f32 %v675_v13, 0.0  ;;  %v879_v18 = vmax.f32 %v779_v14, 0.0 }
 0x12c   : > { %v679_v19 = vpop.f32.mrf.mxu0  ;;  %v783_v20 = vpop.f32.mrf.mxu1 }
 0x12d   : > { %v1338_v21 = vpack.c.bf16 %v853_v17, %v853_v17  ;;  %v1364_v22 = vpack.c.bf16 %v879_v18, %v879_v18  ;;  %v680_v23 = vadd.f32 %v1691_v3, %v679_v19  ;;  %v784_v24 = vadd.f32 %v1691_v3, %v783_v20 }
 0x12e   : > { %v681_v25 = vpop.f32.mrf.mxu0  ;;  %v785_v26 = vpop.f32.mrf.mxu1 }
 0x12f   : > { %1104 = vst.msk [vmem:[%s1699_s28 + $0x1c] sm:$0xf] %vm1096_vm0, %v1338_v21  ;;  %1130 = vst.msk [vmem:[%s1699_s28 + $0x84] sm:$0xf] %vm1096_vm0, %v1364_v22  ;;  %v854_v27 = vmax.f32 %v680_v23, 0.0  ;;  %v880_v28 = vmax.f32 %v784_v24, 0.0 }
 0x130   : > { %v682_v29 = vpop.f32.mrf.mxu0  ;;  %v786_v30 = vpop.f32.mrf.mxu1 }
 0x131   : > { %v1339_v31 = vpack.c.bf16 %v854_v27, %v854_v27  ;;  %v1365_v32 = vpack.c.bf16 %v880_v28, %v880_v28  ;;  %v683_v33 = vadd.f32 %v1691_v3, %v682_v29  ;;  %v787_v34 = vadd.f32 %v1691_v3, %v786_v30 }
 0x132   : > { %v684_v35 = vpop.f32.mrf.mxu0  ;;  %v788_v36 = vpop.f32.mrf.mxu1 }
 0x133   : > { %1105 = vst.msk [vmem:[%s1699_s28 + $0x20] sm:$0xf] %vm1096_vm0, %v1339_v31  ;;  %1131 = vst.msk [vmem:[%s1699_s28 + $0x88] sm:$0xf] %vm1096_vm0, %v1365_v32  ;;  %v855_v37 = vmax.f32 %v683_v33, 0.0  ;;  %v881_v38 = vmax.f32 %v787_v34, 0.0 }
 0x134   : > { %v687_v39 = vpop.f32.mrf.mxu0  ;;  %v791_v40 = vpop.f32.mrf.mxu1 }
 0x135   : > { %v1340_v41 = vpack.c.bf16 %v855_v37, %v855_v37  ;;  %v1366_v42 = vpack.c.bf16 %v881_v38, %v881_v38  ;;  %v688_v43 = vadd.f32 %v1691_v3, %v687_v39  ;;  %v792_v44 = vadd.f32 %v1691_v3, %v791_v40 }
 0x136   : > { %v689_v45 = vpop.f32.mrf.mxu0  ;;  %v793_v46 = vpop.f32.mrf.mxu1 }
 0x137   : > { %1106 = vst.msk [vmem:[%s1699_s28 + $0x24] sm:$0xf] %vm1096_vm0, %v1340_v41  ;;  %1132 = vst.msk [vmem:[%s1699_s28 + $0x8c] sm:$0xf] %vm1096_vm0, %v1366_v42  ;;  %v856_v47 = vmax.f32 %v688_v43, 0.0  ;;  %v882_v48 = vmax.f32 %v792_v44, 0.0 }
 0x138   : > { %v690_v49 = vpop.f32.mrf.mxu0  ;;  %v794_v50 = vpop.f32.mrf.mxu1 }
 0x139   : > { %v1341_v51 = vpack.c.bf16 %v856_v47, %v856_v47  ;;  %v1367_v52 = vpack.c.bf16 %v882_v48, %v882_v48  ;;  %v691_v53 = vadd.f32 %v1691_v3, %v690_v49  ;;  %v795_v54 = vadd.f32 %v1691_v3, %v794_v50 }
 0x13a   : > { %v692_v55 = vpop.f32.mrf.mxu0  ;;  %v796_v56 = vpop.f32.mrf.mxu1 }
 0x13b   : > { %1107 = vst.msk [vmem:[%s1699_s28 + $0x28] sm:$0xf] %vm1096_vm0, %v1341_v51  ;;  %1133 = vst.msk [vmem:[%s1699_s28 + $0x90] sm:$0xf] %vm1096_vm0, %v1367_v52  ;;  %v857_v57 = vmax.f32 %v691_v53, 0.0  ;;  %v883_v58 = vmax.f32 %v795_v54, 0.0 }
 0x13c   : > { %v695_v59 = vpop.f32.mrf.mxu0  ;;  %v799_v60 = vpop.f32.mrf.mxu1 }
 0x13d   : > { %v1342_v61 = vpack.c.bf16 %v857_v57, %v857_v57  ;;  %v1368_v62 = vpack.c.bf16 %v883_v58, %v883_v58  ;;  %v696_v63 = vadd.f32 %v1691_v3, %v695_v59  ;;  %v800_v0 = vadd.f32 %v1691_v3, %v799_v60 }
 0x13e   : > { %v697_v1 = vpop.f32.mrf.mxu0  ;;  %v801_v2 = vpop.f32.mrf.mxu1 }
 0x13f   : > { %1108 = vst.msk [vmem:[%s1699_s28 + $0x2c] sm:$0xf] %vm1096_vm0, %v1342_v61  ;;  %1134 = vst.msk [vmem:[%s1699_s28 + $0x94] sm:$0xf] %vm1096_vm0, %v1368_v62  ;;  %v858_v4 = vmax.f32 %v696_v63, 0.0  ;;  %v884_v5 = vmax.f32 %v800_v0, 0.0 }
 0x140   : > { %v698_v6 = vpop.f32.mrf.mxu0  ;;  %v802_v7 = vpop.f32.mrf.mxu1 }
 0x141   : > { %v1343_v8 = vpack.c.bf16 %v858_v4, %v858_v4  ;;  %v1369_v9 = vpack.c.bf16 %v884_v5, %v884_v5  ;;  %v699_v10 = vadd.f32 %v1691_v3, %v698_v6  ;;  %v803_v11 = vadd.f32 %v1691_v3, %v802_v7 }
 0x142   : > { %v700_v12 = vpop.f32.mrf.mxu0  ;;  %v804_v13 = vpop.f32.mrf.mxu1 }
 0x143   : > { %1109 = vst.msk [vmem:[%s1699_s28 + $0x30] sm:$0xf] %vm1096_vm0, %v1343_v8  ;;  %1135 = vst.msk [vmem:[%s1699_s28 + $0x98] sm:$0xf] %vm1096_vm0, %v1369_v9  ;;  %v859_v14 = vmax.f32 %v699_v10, 0.0  ;;  %v885_v15 = vmax.f32 %v803_v11, 0.0 }
 0x144   : > { %v703_v16 = vpop.f32.mrf.mxu0  ;;  %v807_v17 = vpop.f32.mrf.mxu1 }
 0x145   : > { %v1344_v18 = vpack.c.bf16 %v859_v14, %v859_v14  ;;  %v1370_v19 = vpack.c.bf16 %v885_v15, %v885_v15  ;;  %v704_v20 = vadd.f32 %v1691_v3, %v703_v16  ;;  %v808_v21 = vadd.f32 %v1691_v3, %v807_v17 }
 0x146   : > { %v705_v22 = vpop.f32.mrf.mxu0  ;;  %v809_v23 = vpop.f32.mrf.mxu1 }
 0x147   : > { %1110 = vst.msk [vmem:[%s1699_s28 + $0x34] sm:$0xf] %vm1096_vm0, %v1344_v18  ;;  %1136 = vst.msk [vmem:[%s1699_s28 + $0x9c] sm:$0xf] %vm1096_vm0, %v1370_v19  ;;  %v860_v24 = vmax.f32 %v704_v20, 0.0  ;;  %v886_v25 = vmax.f32 %v808_v21, 0.0 }
 0x148   : > { %v706_v26 = vpop.f32.mrf.mxu0  ;;  %v810_v27 = vpop.f32.mrf.mxu1 }
 0x149   : > { %v1345_v28 = vpack.c.bf16 %v860_v24, %v860_v24  ;;  %v1371_v29 = vpack.c.bf16 %v886_v25, %v886_v25  ;;  %v707_v30 = vadd.f32 %v1691_v3, %v706_v26  ;;  %v811_v31 = vadd.f32 %v1691_v3, %v810_v27 }
 0x14a   : > { %v708_v32 = vpop.f32.mrf.mxu0  ;;  %v812_v33 = vpop.f32.mrf.mxu1 }
 0x14b   : > { %1111 = vst.msk [vmem:[%s1699_s28 + $0x38] sm:$0xf] %vm1096_vm0, %v1345_v28  ;;  %1137 = vst.msk [vmem:[%s1699_s28 + $0xa0] sm:$0xf] %vm1096_vm0, %v1371_v29  ;;  %v861_v34 = vmax.f32 %v707_v30, 0.0  ;;  %v887_v35 = vmax.f32 %v811_v31, 0.0 }
 0x14c   : > { %v711_v36 = vpop.f32.mrf.mxu0  ;;  %v815_v37 = vpop.f32.mrf.mxu1 }
 0x14d   : > { %v1346_v38 = vpack.c.bf16 %v861_v34, %v861_v34  ;;  %v1372_v39 = vpack.c.bf16 %v887_v35, %v887_v35  ;;  %v712_v40 = vadd.f32 %v1691_v3, %v711_v36  ;;  %v816_v41 = vadd.f32 %v1691_v3, %v815_v37 }
 0x14e   : > { %v713_v42 = vpop.f32.mrf.mxu0  ;;  %v817_v43 = vpop.f32.mrf.mxu1 }
 0x14f   : > { %1112 = vst.msk [vmem:[%s1699_s28 + $0x3c] sm:$0xf] %vm1096_vm0, %v1346_v38  ;;  %1138 = vst.msk [vmem:[%s1699_s28 + $0xa4] sm:$0xf] %vm1096_vm0, %v1372_v39  ;;  %v862_v44 = vmax.f32 %v712_v40, 0.0  ;;  %v888_v45 = vmax.f32 %v816_v41, 0.0 }
 0x150   : > { %v714_v46 = vpop.f32.mrf.mxu0  ;;  %v818_v47 = vpop.f32.mrf.mxu1 }
 0x151   : > { %v1347_v48 = vpack.c.bf16 %v862_v44, %v862_v44  ;;  %v1373_v49 = vpack.c.bf16 %v888_v45, %v888_v45  ;;  %v715_v50 = vadd.f32 %v1691_v3, %v714_v46  ;;  %v819_v51 = vadd.f32 %v1691_v3, %v818_v47 }
 0x152   : > { %v716_v52 = vpop.f32.mrf.mxu0  ;;  %v820_v53 = vpop.f32.mrf.mxu1 }
 0x153   : > { %1113 = vst.msk [vmem:[%s1699_s28 + $0x40] sm:$0xf] %vm1096_vm0, %v1347_v48  ;;  %1139 = vst.msk [vmem:[%s1699_s28 + $0xa8] sm:$0xf] %vm1096_vm0, %v1373_v49  ;;  %v863_v54 = vmax.f32 %v715_v50, 0.0  ;;  %v889_v55 = vmax.f32 %v819_v51, 0.0 }
 0x154   : > { %v719_v56 = vpop.f32.mrf.mxu0  ;;  %v823_v57 = vpop.f32.mrf.mxu1 }
 0x155   : > { %v1348_v58 = vpack.c.bf16 %v863_v54, %v863_v54  ;;  %v1374_v59 = vpack.c.bf16 %v889_v55, %v889_v55  ;;  %v720_v60 = vadd.f32 %v1691_v3, %v719_v56  ;;  %v824_v61 = vadd.f32 %v1691_v3, %v823_v57 }
 0x156   : > { %v721_v62 = vpop.f32.mrf.mxu0  ;;  %v825_v63 = vpop.f32.mrf.mxu1 }
 0x157   : > { %1114 = vst.msk [vmem:[%s1699_s28 + $0x44] sm:$0xf] %vm1096_vm0, %v1348_v58  ;;  %1140 = vst.msk [vmem:[%s1699_s28 + $0xac] sm:$0xf] %vm1096_vm0, %v1374_v59  ;;  %v864_v0 = vmax.f32 %v720_v60, 0.0  ;;  %v890_v1 = vmax.f32 %v824_v61, 0.0 }
 0x158   : > { %v722_v2 = vpop.f32.mrf.mxu0  ;;  %v826_v4 = vpop.f32.mrf.mxu1 }
 0x159   : > { %v1349_v5 = vpack.c.bf16 %v864_v0, %v864_v0  ;;  %v1375_v6 = vpack.c.bf16 %v890_v1, %v890_v1  ;;  %v723_v7 = vadd.f32 %v1691_v3, %v722_v2  ;;  %v827_v8 = vadd.f32 %v1691_v3, %v826_v4 }
 0x15a   : > { %v724_v9 = vpop.f32.mrf.mxu0  ;;  %v828_v10 = vpop.f32.mrf.mxu1 }
 0x15b   : > { %1115 = vst.msk [vmem:[%s1699_s28 + $0x48] sm:$0xf] %vm1096_vm0, %v1349_v5  ;;  %1141 = vst.msk [vmem:[%s1699_s28 + $0xb0] sm:$0xf] %vm1096_vm0, %v1375_v6  ;;  %v865_v11 = vmax.f32 %v723_v7, 0.0  ;;  %v891_v12 = vmax.f32 %v827_v8, 0.0 }
 0x15c   : > { %v727_v13 = vpop.f32.mrf.mxu0  ;;  %v831_v14 = vpop.f32.mrf.mxu1 }
 0x15d   : > { %v1350_v15 = vpack.c.bf16 %v865_v11, %v865_v11  ;;  %v1376_v16 = vpack.c.bf16 %v891_v12, %v891_v12  ;;  %v728_v17 = vadd.f32 %v1691_v3, %v727_v13  ;;  %v832_v18 = vadd.f32 %v1691_v3, %v831_v14 }
 0x15e   : > { %v729_v19 = vpop.f32.mrf.mxu0  ;;  %v833_v20 = vpop.f32.mrf.mxu1 }
 0x15f   : > { %1116 = vst.msk [vmem:[%s1699_s28 + $0x4c] sm:$0xf] %vm1096_vm0, %v1350_v15  ;;  %1142 = vst.msk [vmem:[%s1699_s28 + $0xb4] sm:$0xf] %vm1096_vm0, %v1376_v16  ;;  %v866_v21 = vmax.f32 %v728_v17, 0.0  ;;  %v892_v22 = vmax.f32 %v832_v18, 0.0 }
 0x160   : > { %v730_v23 = vpop.f32.mrf.mxu0  ;;  %v834_v24 = vpop.f32.mrf.mxu1 }
 0x161   : > { %v1351_v25 = vpack.c.bf16 %v866_v21, %v866_v21  ;;  %v1377_v26 = vpack.c.bf16 %v892_v22, %v892_v22  ;;  %v731_v27 = vadd.f32 %v1691_v3, %v730_v23  ;;  %v835_v28 = vadd.f32 %v1691_v3, %v834_v24 }
 0x162   : > { %v732_v29 = vpop.f32.mrf.mxu0  ;;  %v836_v30 = vpop.f32.mrf.mxu1 }
 0x163   : > { %1117 = vst.msk [vmem:[%s1699_s28 + $0x50] sm:$0xf] %vm1096_vm0, %v1351_v25  ;;  %1143 = vst.msk [vmem:[%s1699_s28 + $0xb8] sm:$0xf] %vm1096_vm0, %v1377_v26  ;;  %v867_v31 = vmax.f32 %v731_v27, 0.0  ;;  %v893_v32 = vmax.f32 %v835_v28, 0.0 }
 0x164   : > { %v735_v33 = vpop.f32.mrf.mxu0  ;;  %v839_v34 = vpop.f32.mrf.mxu1 }
 0x165   : > { %v1352_v35 = vpack.c.bf16 %v867_v31, %v867_v31  ;;  %v1378_v36 = vpack.c.bf16 %v893_v32, %v893_v32  ;;  %v736_v37 = vadd.f32 %v1691_v3, %v735_v33  ;;  %v840_v38 = vadd.f32 %v1691_v3, %v839_v34 }
 0x166   : > { %v737_v39 = vpop.f32.mrf.mxu0  ;;  %v841_v40 = vpop.f32.mrf.mxu1 }
 0x167   : > { %1118 = vst.msk [vmem:[%s1699_s28 + $0x54] sm:$0xf] %vm1096_vm0, %v1352_v35  ;;  %1144 = vst.msk [vmem:[%s1699_s28 + $0xbc] sm:$0xf] %vm1096_vm0, %v1378_v36  ;;  %v868_v41 = vmax.f32 %v736_v37, 0.0  ;;  %v894_v42 = vmax.f32 %v840_v38, 0.0 }
 0x168   : > { %v738_v43 = vpop.f32.mrf.mxu0  ;;  %v842_v44 = vpop.f32.mrf.mxu1 }
 0x169   : > { %v1353_v45 = vpack.c.bf16 %v868_v41, %v868_v41  ;;  %v1379_v46 = vpack.c.bf16 %v894_v42, %v894_v42  ;;  %v739_v47 = vadd.f32 %v1691_v3, %v738_v43  ;;  %v843_v48 = vadd.f32 %v1691_v3, %v842_v44 }
 0x16a   : > { %v740_v49 = vpop.f32.mrf.mxu0  ;;  %v844_v50 = vpop.f32.mrf.mxu1 }
 0x16b   : > { %1119 = vst.msk [vmem:[%s1699_s28 + $0x58] sm:$0xf] %vm1096_vm0, %v1353_v45  ;;  %1145 = vst.msk [vmem:[%s1699_s28 + $0xc0] sm:$0xf] %vm1096_vm0, %v1379_v46  ;;  %v869_v51 = vmax.f32 %v739_v47, 0.0  ;;  %v895_v52 = vmax.f32 %v843_v48, 0.0 }
 0x16c   : > { %v743_v53 = vpop.f32.mrf.mxu0 }
 0x16d   : > { %v1354_v54 = vpack.c.bf16 %v869_v51, %v869_v51  ;;  %v1380_v55 = vpack.c.bf16 %v895_v52, %v895_v52  ;;  %v744_v56 = vadd.f32 %v1691_v3, %v743_v53 }
 0x16e   : > { %v745_v57 = vpop.f32.mrf.mxu0 }
 0x16f   : > { %1120 = vst.msk [vmem:[%s1699_s28 + $0x5c] sm:$0xf] %vm1096_vm0, %v1354_v54  ;;  %1146 = vst.msk [vmem:[%s1699_s28 + $0xc4] sm:$0xf] %vm1096_vm0, %v1380_v55  ;;  %v870_v58 = vmax.f32 %v744_v56, 0.0 }
 0x170   : > { %v746_v59 = vpop.f32.mrf.mxu0 }
 0x171   : > { %v1355_v60 = vpack.c.bf16 %v870_v58, %v870_v58  ;;  %v747_v61 = vadd.f32 %v1691_v3, %v746_v59 }
 0x172   : > { %v748_v62 = vpop.f32.mrf.mxu0 }
 0x173   : > { %1121 = vst.msk [vmem:[%s1699_s28 + $0x60] sm:$0xf] %vm1096_vm0, %v1355_v60  ;;  %v871_v63 = vmax.f32 %v747_v61, 0.0 }
 0x175   : > { %v1356_v0 = vpack.c.bf16 %v871_v63, %v871_v63 }
 0x177   : > { %1122 = vst.msk [vmem:[%s1699_s28 + $0x64] sm:$0xf] %vm1096_vm0, %v1356_v0 }
 0x178 PF: > { %s13_s12 = sadd.s32 1, %s1519_s12  }
 0x179   : > { %p10_p4 = scmp.ge.s32.totalorder %s13_s12, 4  }
 0x17b   :  { %12 = sbr.rel (!%p10_p4) target bundleno = 1 (0x1), region = 62 }

// kernel: net_forward.5
= control target key start
LH: loop header
LB: loop body
LE: loop exit
PB: predicated region body
PF: predicated region fallthrough
CT: control target
= control target key end

     0   :  { %vm880_vm0 = vcmask 519168   ;;  %vm901_vm1 = vcmask 516096   ;;  %s1637_s1 = inlined_call_operand.vmem [shape: bf16[512,64], index: 1, kind: input, shape index: {}]   ;;  %s1638_s0 = inlined_call_operand.vmem [shape: bf16[162,512], index: 0, kind: input, shape index: {}]   ;;  %s1639_s2 = inlined_call_operand.vmem [shape: f32[1,64], index: 2, kind: input, shape index: {}]   ;;  %s1640_s3 = inlined_call_operand.vmem [shape: bf16[162,64], index: 3, kind: output, shape index: {}]  }
   0x1   :  { %v1190_v0 = vld [vmem:[%s1637_s1 + $0x78] sm:$0xff]   ;;  %v1194_v4 = vld [vmem:[%s1637_s1 + $0x70] sm:$0xff]   ;;  %v1198_v8 = vld [vmem:[%s1637_s1 + $0x68] sm:$0xff]  }
   0x2   :  { %v1191_v1 = vld [vmem:[%s1637_s1 + $0xf8] sm:$0xff]   ;;  %1026 = vmatprep.subr.bf16.mxu0 %v1190_v0  ;;  %v1195_v5 = vld [vmem:[%s1637_s1 + $0xf0] sm:$0xff]   ;;  %v1199_v9 = vld [vmem:[%s1637_s1 + $0xe8] sm:$0xff]  }
   0x3   :  { %v1192_v2 = vld [vmem:[%s1637_s1 + $0x38] sm:$0xff]   ;;  %1108 = vmatprep.subr.bf16.mxu1 %v1191_v1  ;;  %v1196_v6 = vld [vmem:[%s1637_s1 + $0x30] sm:$0xff]   ;;  %v1200_v10 = vld [vmem:[%s1637_s1 + $0x28] sm:$0xff]  }
   0x4   :  { %v1193_v3 = vld [vmem:[%s1637_s1 + $0xb8] sm:$0xff]   ;;  %1027 = vmatpush3.bf16.msra.mxu0 %v1192_v2  ;;  %v1197_v7 = vld [vmem:[%s1637_s1 + $0xb0] sm:$0xff]   ;;  %v1201_v11 = vld [vmem:[%s1637_s1 + $0xa8] sm:$0xff]  }
   0x5   :  { %1109 = vmatpush3.bf16.msra.mxu1 %v1193_v3  ;;  %1028 = vmatprep.subr.bf16.mxu0 %v1194_v4  ;;  %v1202_v12 = vld [vmem:[%s1637_s1 + $0x60] sm:$0xff]   ;;  %v1206_v16 = vld [vmem:[%s1637_s1 + $0x58] sm:$0xff]   ;;  %v1210_v20 = vld [vmem:[%s1637_s1 + $0x50] sm:$0xff]  }
   0x6   :  { %1110 = vmatprep.subr.bf16.mxu1 %v1195_v5  ;;  %v1203_v13 = vld [vmem:[%s1637_s1 + $0xe0] sm:$0xff]   ;;  %v1207_v17 = vld [vmem:[%s1637_s1 + $0xd8] sm:$0xff]   ;;  %v1211_v21 = vld [vmem:[%s1637_s1 + $0xd0] sm:$0xff]  }
   0x7   :  { %v1204_v14 = vld [vmem:[%s1637_s1 + $0x20] sm:$0xff]   ;;  %v1208_v18 = vld [vmem:[%s1637_s1 + $0x18] sm:$0xff]   ;;  %v1212_v22 = vld [vmem:[%s1637_s1 + $0x10] sm:$0xff]  }
   0x8   :  { %1029 = vmatpush3.bf16.msra.mxu0 %v1196_v6  ;;  %v1205_v15 = vld [vmem:[%s1637_s1 + $0xa0] sm:$0xff]   ;;  %v1209_v19 = vld [vmem:[%s1637_s1 + $0x98] sm:$0xff]   ;;  %v1213_v23 = vld [vmem:[%s1637_s1 + $0x90] sm:$0xff]  }
   0x9   :  { %1111 = vmatpush3.bf16.msra.mxu1 %v1197_v7  ;;  %1030 = vmatprep.subr.bf16.mxu0 %v1198_v8  ;;  %v1214_v24 = vld [vmem:[%s1637_s1 + $0x48] sm:$0xff]   ;;  %v1218_v28 = vld [vmem:[%s1637_s1 + $0x40] sm:$0xff]  }
   0xa   :  { %1112 = vmatprep.subr.bf16.mxu1 %v1199_v9  ;;  %v1215_v25 = vld [vmem:[%s1637_s1 + $0xc8] sm:$0xff]   ;;  %v1219_v29 = vld [vmem:[%s1637_s1 + $0xc0] sm:$0xff]  }
   0xb   :  { %v1216_v26 = vld [vmem:[%s1637_s1 + $0x8] sm:$0xff]   ;;  %v1220_v30 = vld [vmem:[%s1637_s1] sm:$0xff]  }
   0xc   :  { %1031 = vmatpush3.bf16.msra.mxu0 %v1200_v10  ;;  %v1217_v27 = vld [vmem:[%s1637_s1 + $0x88] sm:$0xff]   ;;  %v1221_v31 = vld [vmem:[%s1637_s1 + $0x80] sm:$0xff]  }
   0xd   :  { %1113 = vmatpush3.bf16.msra.mxu1 %v1201_v11  ;;  %1032 = vmatprep.subr.bf16.mxu0 %v1202_v12  ;;  %v1222_v32 = vld [vmem:[%s1638_s0] ss:$16 sps:$4 sm:$0xff]   ;;  %v1224_v33 = vld [vmem:[%s1638_s0 + $0x4] ss:$16 sps:$4 sm:$0xff]   ;;  %v1225_v34 = vld [vmem:[%s1638_s0 + $0x8] ss:$16 sps:$4 sm:$0xff]  }
   0xe   :  { %1114 = vmatprep.subr.bf16.mxu1 %v1203_v13  ;;  %v1227_v35 = vld [vmem:[%s1638_s0 + $0xc] ss:$16 sps:$4 sm:$0xff]   ;;  %566 = vmatprep.mubr.bf16.mxu0 %v1224_v33  ;;  %v1228_v36 = vld [vmem:[%s1638_s0 + $0x24] ss:$16 sps:$4 sm:$0xff]   ;;  %v1232_v38 = vld [vmem:[%s1638_s0 + $0x20] ss:$16 sps:$4 sm:$0xff]  }
   0xf   :  { %686 = vmatprep.mubr.bf16.mxu1 %v1227_v35  ;;  %v1230_v37 = vld [vmem:[%s1638_s0 + $0x2c] ss:$16 sps:$4 sm:$0xff]   ;;  %v1233_v39 = vld [vmem:[%s1638_s0 + $0x28] ss:$16 sps:$4 sm:$0xff]   ;;  %v1234_v40 = vld [vmem:[%s1638_s0 + $0x44] ss:$16 sps:$4 sm:$0xff]  }
  0x10   :  { %1033 = vmatpush3.bf16.msra.mxu0 %v1204_v14  ;;  %v1236_v41 = vld [vmem:[%s1638_s0 + $0x4c] ss:$16 sps:$4 sm:$0xff]   ;;  %v1238_v42 = vld [vmem:[%s1638_s0 + $0x40] ss:$16 sps:$4 sm:$0xff]   ;;  %v1239_v43 = vld [vmem:[%s1638_s0 + $0x48] ss:$16 sps:$4 sm:$0xff]  }
  0x11   :  { %1115 = vmatpush3.bf16.msra.mxu1 %v1205_v15  ;;  %1034 = vmatprep.subr.bf16.mxu0 %v1206_v16  ;;  %v1240_v44 = vld [vmem:[%s1638_s0 + $0x64] ss:$16 sps:$4 sm:$0xff]   ;;  %v1242_v45 = vld [vmem:[%s1638_s0 + $0x6c] ss:$16 sps:$4 sm:$0xff]   ;;  %v1244_v46 = vld [vmem:[%s1638_s0 + $0x60] ss:$16 sps:$4 sm:$0xff]  }
  0x12   :  { %1116 = vmatprep.subr.bf16.mxu1 %v1207_v17  ;;  %v1245_v47 = vld [vmem:[%s1638_s0 + $0x68] ss:$16 sps:$4 sm:$0xff]   ;;  %v1246_v48 = vld [vmem:[%s1638_s0 + $0x84] ss:$16 sps:$4 sm:$0xff]   ;;  %v1248_v49 = vld [vmem:[%s1638_s0 + $0x8c] ss:$16 sps:$4 sm:$0xff]  }
  0x13   :  { %v1250_v50 = vld [vmem:[%s1638_s0 + $0x80] ss:$16 sps:$4 sm:$0xff]   ;;  %v1251_v51 = vld [vmem:[%s1638_s0 + $0x88] ss:$16 sps:$4 sm:$0xff]   ;;  %v1252_v52 = vld [vmem:[%s1638_s0 + $0xa4] ss:$16 sps:$4 sm:$0xff]  }
  0x14   :  { %1035 = vmatpush3.bf16.msra.mxu0 %v1208_v18  ;;  %v1254_v53 = vld [vmem:[%s1638_s0 + $0xac] ss:$16 sps:$4 sm:$0xff]   ;;  %v1256_v54 = vld [vmem:[%s1638_s0 + $0xa0] ss:$16 sps:$4 sm:$0xff]   ;;  %v1257_v55 = vld [vmem:[%s1638_s0 + $0xa8] ss:$16 sps:$4 sm:$0xff]  }
  0x15   :  { %1117 = vmatpush3.bf16.msra.mxu1 %v1209_v19  ;;  %1036 = vmatprep.subr.bf16.mxu0 %v1210_v20  ;;  %v1258_v56 = vld [vmem:[%s1638_s0 + $0xc4] ss:$16 sps:$4 sm:$0xff]   ;;  %v1260_v57 = vld [vmem:[%s1638_s0 + $0xcc] ss:$16 sps:$4 sm:$0xff]   ;;  %v1262_v58 = vld [vmem:[%s1638_s0 + $0xc0] ss:$16 sps:$4 sm:$0xff]  }
  0x16   :  { %1118 = vmatprep.subr.bf16.mxu1 %v1211_v21  ;;  %v1263_v59 = vld [vmem:[%s1638_s0 + $0xc8] ss:$16 sps:$4 sm:$0xff]   ;;  %v1264_v60 = vld [vmem:[%s1638_s0 + $0xe4] ss:$16 sps:$4 sm:$0xff]   ;;  %v1266_v61 = vld [vmem:[%s1638_s0 + $0xec] ss:$16 sps:$4 sm:$0xff]  }
  0x17   :  { %v1268_v62 = vld [vmem:[%s1638_s0 + $0xe0] ss:$16 sps:$4 sm:$0xff]   ;;  %v1269_v63 = vld [vmem:[%s1638_s0 + $0xe8] ss:$16 sps:$4 sm:$0xff]   ;;  %v1270_v0 = vld [vmem:[%s1638_s0 + $0x104] ss:$16 sps:$4 sm:$0xff]  }
  0x18   :  { %1037 = vmatpush3.bf16.msra.mxu0 %v1212_v22  ;;  %v1272_v1 = vld [vmem:[%s1638_s0 + $0x10c] ss:$16 sps:$4 sm:$0xff]   ;;  %v1274_v2 = vld [vmem:[%s1638_s0 + $0x100] ss:$16 sps:$4 sm:$0xff]   ;;  %v1275_v3 = vld [vmem:[%s1638_s0 + $0x108] ss:$16 sps:$4 sm:$0xff]  }
  0x19   :  { %1119 = vmatpush3.bf16.msra.mxu1 %v1213_v23  ;;  %1038 = vmatprep.subr.bf16.mxu0 %v1214_v24  ;;  %v1276_v4 = vld [vmem:[%s1638_s0 + $0x124] ss:$16 sps:$4 sm:$0xff]   ;;  %v1278_v5 = vld [vmem:[%s1638_s0 + $0x12c] ss:$16 sps:$4 sm:$0xff]   ;;  %v1280_v8 = vld [vmem:[%s1638_s0 + $0x120] ss:$16 sps:$4 sm:$0xff]  }
  0x1a   :  { %1120 = vmatprep.subr.bf16.mxu1 %v1215_v25  ;;  %v55_v6 = vld [vmem:[%s1638_s0 + $0x140] sm:$0x11]  ;;  %v56_v7 = vld [vmem:[%s1638_s0 + $0x148] sm:$0x11] }
  0x1b   :  { %v1281_v9 = vld [vmem:[%s1638_s0 + $0x128] ss:$16 sps:$4 sm:$0xff]   ;;  %v949_v10 = vcombine.high %v55_v6, %v55_v6  ;;  %v951_v11 = vcombine.high %v56_v7, %v56_v7  ;;  %v948_v12 = vcombine.low %v55_v6, %v55_v6  ;;  %v950_v13 = vcombine.low %v56_v7, %v56_v7  ;;  %v1531_v16 = vld [vmem:[%s1639_s2] ss:$0 sm:$0xff] }
  0x1c   :  { %1039 = vmatpush3.bf16.msra.mxu0 %v1216_v26 }
  0x1d   :  { %1121 = vmatpush3.bf16.msra.mxu1 %v1217_v27  ;;  %1040 = vmatprep.subr.bf16.mxu0 %v1218_v28 }
  0x1e   :  { %1122 = vmatprep.subr.bf16.mxu1 %v1219_v29 }
  0x20   :  { %1041 = vmatpush3.bf16.msra.mxu0 %v1220_v30 }
  0x21   :  { %1123 = vmatpush3.bf16.msra.mxu1 %v1221_v31 }
  0x23   :  { %567 = vmatmul.mubr.bf16.vlgmr.msra.gmra.mxu0 %v1222_v32 }
  0x24   :  { %687 = vmatmul.mubr.bf16.vlgmr.msra.gmra.mxu1 %v1225_v34  ;;  %574 = vmatprep.mubr.bf16.mxu0 %v1228_v36 }
  0x25   :  { %694 = vmatprep.mubr.bf16.mxu1 %v1230_v37 }
  0x2b   :  { %575 = vmatmul.mubr.bf16.gmra.mxu0 %v1232_v38 }
  0x2c   :  { %695 = vmatmul.mubr.bf16.gmra.mxu1 %v1233_v39  ;;  %582 = vmatprep.mubr.bf16.mxu0 %v1234_v40 }
  0x2d   :  { %702 = vmatprep.mubr.bf16.mxu1 %v1236_v41 }
  0x33   :  { %583 = vmatmul.mubr.bf16.gmra.mxu0 %v1238_v42 }
  0x34   :  { %703 = vmatmul.mubr.bf16.gmra.mxu1 %v1239_v43  ;;  %590 = vmatprep.mubr.bf16.mxu0 %v1240_v44 }
  0x35   :  { %710 = vmatprep.mubr.bf16.mxu1 %v1242_v45 }
  0x3b   :  { %591 = vmatmul.mubr.bf16.gmra.mxu0 %v1244_v46 }
  0x3c   :  { %711 = vmatmul.mubr.bf16.gmra.mxu1 %v1245_v47  ;;  %598 = vmatprep.mubr.bf16.mxu0 %v1246_v48 }
  0x3d   :  { %718 = vmatprep.mubr.bf16.mxu1 %v1248_v49 }
  0x43   :  { %599 = vmatmul.mubr.bf16.gmra.mxu0 %v1250_v50 }
  0x44   :  { %719 = vmatmul.mubr.bf16.gmra.mxu1 %v1251_v51  ;;  %606 = vmatprep.mubr.bf16.mxu0 %v1252_v52 }
  0x45   :  { %726 = vmatprep.mubr.bf16.mxu1 %v1254_v53 }
  0x4b   :  { %607 = vmatmul.mubr.bf16.gmra.mxu0 %v1256_v54 }
  0x4c   :  { %727 = vmatmul.mubr.bf16.gmra.mxu1 %v1257_v55  ;;  %614 = vmatprep.mubr.bf16.mxu0 %v1258_v56 }
  0x4d   :  { %734 = vmatprep.mubr.bf16.mxu1 %v1260_v57 }
  0x53   :  { %615 = vmatmul.mubr.bf16.gmra.mxu0 %v1262_v58 }
  0x54   :  { %735 = vmatmul.mubr.bf16.gmra.mxu1 %v1263_v59  ;;  %622 = vmatprep.mubr.bf16.mxu0 %v1264_v60 }
  0x55   :  { %742 = vmatprep.mubr.bf16.mxu1 %v1266_v61 }
  0x5b   :  { %623 = vmatmul.mubr.bf16.gmra.mxu0 %v1268_v62 }
  0x5c   :  { %743 = vmatmul.mubr.bf16.gmra.mxu1 %v1269_v63  ;;  %630 = vmatprep.mubr.bf16.mxu0 %v1270_v0 }
  0x5d   :  { %750 = vmatprep.mubr.bf16.mxu1 %v1272_v1 }
  0x63   :  { %631 = vmatmul.mubr.bf16.gmra.mxu0 %v1274_v2 }
  0x64   :  { %751 = vmatmul.mubr.bf16.gmra.mxu1 %v1275_v3  ;;  %638 = vmatprep.mubr.bf16.mxu0 %v1276_v4 }
  0x65   :  { %758 = vmatprep.mubr.bf16.mxu1 %v1278_v5 }
  0x6b   :  { %639 = vmatmul.mubr.bf16.gmra.mxu0 %v1280_v8 }
  0x6c   :  { %759 = vmatmul.mubr.bf16.gmra.mxu1 %v1281_v9  ;;  %646 = vmatprep.mubr.bf16.mxu0 %v949_v10 }
  0x6d   :  { %766 = vmatprep.mubr.bf16.mxu1 %v951_v11 }
  0x73   :  { %647 = vmatmul.mubr.bf16.gmra.mxu0 %v948_v12 }
  0x74   :  { %767 = vmatmul.mubr.bf16.gmra.mxu1 %v950_v13 }
  0xe3   :  { %v1042_v14 = vpop.f32.mrf.mxu0 }
  0xe4   :  { %v1124_v15 = vpop.f32.mrf.mxu1 }
  0xe5   :  { %v1043_v17 = vpop.f32.mrf.mxu0 }
  0xe6   :  { %v1044_v18 = vadd.f32 %v1043_v17, %v1042_v14  ;;  %v1125_v19 = vpop.f32.mrf.mxu1 }
  0xe7   :  { %v1045_v20 = vpop.f32.mrf.mxu0  ;;  %v1126_v22 = vadd.f32 %v1125_v19, %v1124_v15 }
  0xe8   :  { %v569_v21 = vadd.f32 %v1044_v18, %v1531_v16  ;;  %v1127_v23 = vpop.f32.mrf.mxu1 }
  0xe9   :  { %v1046_v24 = vpop.f32.mrf.mxu0 }
  0xea   :  { %v689_v25 = vadd.f32 %v1126_v22, %v569_v21  ;;  %v1047_v26 = vadd.f32 %v1046_v24, %v1045_v20  ;;  %v1128_v27 = vpop.f32.mrf.mxu1 }
  0xeb   :  { %v1048_v28 = vpop.f32.mrf.mxu0  ;;  %v1129_v31 = vadd.f32 %v1128_v27, %v1127_v23 }
  0xec   :  { %v774_v29 = vmax.f32 %v689_v25, 0.0  ;;  %v572_v30 = vadd.f32 %v1047_v26, %v1531_v16  ;;  %v1130_v32 = vpop.f32.mrf.mxu1 }
  0xed   :  { %v1049_v33 = vpop.f32.mrf.mxu0 }
  0xee   :  { %v1005_v34 = vpack.c.bf16 %v774_v29, %v774_v29  ;;  %v692_v35 = vadd.f32 %v1129_v31, %v572_v30  ;;  %v1050_v36 = vadd.f32 %v1049_v33, %v1048_v28  ;;  %v1131_v37 = vpop.f32.mrf.mxu1 }
  0xef   :  { %v1051_v38 = vpop.f32.mrf.mxu0  ;;  %v1132_v41 = vadd.f32 %v1131_v37, %v1130_v32 }
  0xf0   :  { %881 = vst.msk [vmem:[%s1640_s3] sm:$0xf] %vm880_vm0, %v1005_v34  ;;  %v775_v39 = vmax.f32 %v692_v35, 0.0  ;;  %v577_v40 = vadd.f32 %v1050_v36, %v1531_v16  ;;  %v1133_v42 = vpop.f32.mrf.mxu1 }
  0xf1   :  { %v1052_v43 = vpop.f32.mrf.mxu0 }
  0xf2   :  { %v1006_v44 = vpack.c.bf16 %v775_v39, %v775_v39  ;;  %v697_v45 = vadd.f32 %v1132_v41, %v577_v40  ;;  %v1053_v46 = vadd.f32 %v1052_v43, %v1051_v38  ;;  %v1134_v47 = vpop.f32.mrf.mxu1 }
  0xf3   :  { %v1054_v48 = vpop.f32.mrf.mxu0  ;;  %v1135_v51 = vadd.f32 %v1134_v47, %v1133_v42 }
  0xf4   :  { %882 = vst.msk [vmem:[%s1640_s3 + $0x4] sm:$0xf] %vm880_vm0, %v1006_v44  ;;  %v776_v49 = vmax.f32 %v697_v45, 0.0  ;;  %v580_v50 = vadd.f32 %v1053_v46, %v1531_v16  ;;  %v1136_v52 = vpop.f32.mrf.mxu1 }
  0xf5   :  { %v1055_v53 = vpop.f32.mrf.mxu0 }
  0xf6   :  { %v1007_v54 = vpack.c.bf16 %v776_v49, %v776_v49  ;;  %v700_v55 = vadd.f32 %v1135_v51, %v580_v50  ;;  %v1056_v56 = vadd.f32 %v1055_v53, %v1054_v48  ;;  %v1137_v57 = vpop.f32.mrf.mxu1 }
  0xf7   :  { %v1057_v58 = vpop.f32.mrf.mxu0  ;;  %v1138_v61 = vadd.f32 %v1137_v57, %v1136_v52 }
  0xf8   :  { %883 = vst.msk [vmem:[%s1640_s3 + $0x8] sm:$0xf] %vm880_vm0, %v1007_v54  ;;  %v777_v59 = vmax.f32 %v700_v55, 0.0  ;;  %v585_v60 = vadd.f32 %v1056_v56, %v1531_v16  ;;  %v1139_v62 = vpop.f32.mrf.mxu1 }
  0xf9   :  { %v1058_v63 = vpop.f32.mrf.mxu0 }
  0xfa   :  { %v1008_v0 = vpack.c.bf16 %v777_v59, %v777_v59  ;;  %v705_v1 = vadd.f32 %v1138_v61, %v585_v60  ;;  %v1059_v2 = vadd.f32 %v1058_v63, %v1057_v58  ;;  %v1140_v3 = vpop.f32.mrf.mxu1 }
  0xfb   :  { %v1060_v4 = vpop.f32.mrf.mxu0  ;;  %v1141_v7 = vadd.f32 %v1140_v3, %v1139_v62 }
  0xfc   :  { %884 = vst.msk [vmem:[%s1640_s3 + $0xc] sm:$0xf] %vm880_vm0, %v1008_v0  ;;  %v778_v5 = vmax.f32 %v705_v1, 0.0  ;;  %v588_v6 = vadd.f32 %v1059_v2, %v1531_v16  ;;  %v1142_v8 = vpop.f32.mrf.mxu1 }
  0xfd   :  { %v1061_v9 = vpop.f32.mrf.mxu0 }
  0xfe   :  { %v1009_v10 = vpack.c.bf16 %v778_v5, %v778_v5  ;;  %v708_v11 = vadd.f32 %v1141_v7, %v588_v6  ;;  %v1062_v12 = vadd.f32 %v1061_v9, %v1060_v4  ;;  %v1143_v13 = vpop.f32.mrf.mxu1 }
  0xff   :  { %v1063_v14 = vpop.f32.mrf.mxu0  ;;  %v1144_v18 = vadd.f32 %v1143_v13, %v1142_v8 }
 0x100   :  { %885 = vst.msk [vmem:[%s1640_s3 + $0x10] sm:$0xf] %vm880_vm0, %v1009_v10  ;;  %v779_v15 = vmax.f32 %v708_v11, 0.0  ;;  %v593_v17 = vadd.f32 %v1062_v12, %v1531_v16  ;;  %v1145_v19 = vpop.f32.mrf.mxu1 }
 0x101   :  { %v1064_v20 = vpop.f32.mrf.mxu0 }
 0x102   :  { %v1010_v21 = vpack.c.bf16 %v779_v15, %v779_v15  ;;  %v713_v22 = vadd.f32 %v1144_v18, %v593_v17  ;;  %v1065_v23 = vadd.f32 %v1064_v20, %v1063_v14  ;;  %v1146_v24 = vpop.f32.mrf.mxu1 }
 0x103   :  { %v1066_v25 = vpop.f32.mrf.mxu0  ;;  %v1147_v28 = vadd.f32 %v1146_v24, %v1145_v19 }
 0x104   :  { %886 = vst.msk [vmem:[%s1640_s3 + $0x14] sm:$0xf] %vm880_vm0, %v1010_v21  ;;  %v780_v26 = vmax.f32 %v713_v22, 0.0  ;;  %v596_v27 = vadd.f32 %v1065_v23, %v1531_v16  ;;  %v1148_v29 = vpop.f32.mrf.mxu1 }
 0x105   :  { %v1067_v30 = vpop.f32.mrf.mxu0 }
 0x106   :  { %v1011_v31 = vpack.c.bf16 %v780_v26, %v780_v26  ;;  %v716_v32 = vadd.f32 %v1147_v28, %v596_v27  ;;  %v1068_v33 = vadd.f32 %v1067_v30, %v1066_v25  ;;  %v1149_v34 = vpop.f32.mrf.mxu1 }
 0x107   :  { %v1069_v35 = vpop.f32.mrf.mxu0  ;;  %v1150_v38 = vadd.f32 %v1149_v34, %v1148_v29 }
 0x108   :  { %887 = vst.msk [vmem:[%s1640_s3 + $0x18] sm:$0xf] %vm880_vm0, %v1011_v31  ;;  %v781_v36 = vmax.f32 %v716_v32, 0.0  ;;  %v601_v37 = vadd.f32 %v1068_v33, %v1531_v16  ;;  %v1151_v39 = vpop.f32.mrf.mxu1 }
 0x109   :  { %v1070_v40 = vpop.f32.mrf.mxu0 }
 0x10a   :  { %v1012_v41 = vpack.c.bf16 %v781_v36, %v781_v36  ;;  %v721_v42 = vadd.f32 %v1150_v38, %v601_v37  ;;  %v1071_v43 = vadd.f32 %v1070_v40, %v1069_v35  ;;  %v1152_v44 = vpop.f32.mrf.mxu1 }
 0x10b   :  { %v1072_v45 = vpop.f32.mrf.mxu0  ;;  %v1153_v48 = vadd.f32 %v1152_v44, %v1151_v39 }
 0x10c   :  { %888 = vst.msk [vmem:[%s1640_s3 + $0x1c] sm:$0xf] %vm880_vm0, %v1012_v41  ;;  %v782_v46 = vmax.f32 %v721_v42, 0.0  ;;  %v604_v47 = vadd.f32 %v1071_v43, %v1531_v16  ;;  %v1154_v49 = vpop.f32.mrf.mxu1 }
 0x10d   :  { %v1073_v50 = vpop.f32.mrf.mxu0 }
 0x10e   :  { %v1013_v51 = vpack.c.bf16 %v782_v46, %v782_v46  ;;  %v724_v52 = vadd.f32 %v1153_v48, %v604_v47  ;;  %v1074_v53 = vadd.f32 %v1073_v50, %v1072_v45  ;;  %v1155_v54 = vpop.f32.mrf.mxu1 }
 0x10f   :  { %v1075_v55 = vpop.f32.mrf.mxu0  ;;  %v1156_v58 = vadd.f32 %v1155_v54, %v1154_v49 }
 0x110   :  { %889 = vst.msk [vmem:[%s1640_s3 + $0x20] sm:$0xf] %vm880_vm0, %v1013_v51  ;;  %v783_v56 = vmax.f32 %v724_v52, 0.0  ;;  %v609_v57 = vadd.f32 %v1074_v53, %v1531_v16  ;;  %v1157_v59 = vpop.f32.mrf.mxu1 }
 0x111   :  { %v1076_v60 = vpop.f32.mrf.mxu0 }
 0x112   :  { %v1014_v61 = vpack.c.bf16 %v783_v56, %v783_v56  ;;  %v729_v62 = vadd.f32 %v1156_v58, %v609_v57  ;;  %v1077_v63 = vadd.f32 %v1076_v60, %v1075_v55  ;;  %v1158_v0 = vpop.f32.mrf.mxu1 }
 0x113   :  { %v1078_v1 = vpop.f32.mrf.mxu0  ;;  %v1159_v4 = vadd.f32 %v1158_v0, %v1157_v59 }
 0x114   :  { %890 = vst.msk [vmem:[%s1640_s3 + $0x24] sm:$0xf] %vm880_vm0, %v1014_v61  ;;  %v784_v2 = vmax.f32 %v729_v62, 0.0  ;;  %v612_v3 = vadd.f32 %v1077_v63, %v1531_v16  ;;  %v1160_v5 = vpop.f32.mrf.mxu1 }
 0x115   :  { %v1079_v6 = vpop.f32.mrf.mxu0 }
 0x116   :  { %v1015_v7 = vpack.c.bf16 %v784_v2, %v784_v2  ;;  %v732_v8 = vadd.f32 %v1159_v4, %v612_v3  ;;  %v1080_v9 = vadd.f32 %v1079_v6, %v1078_v1  ;;  %v1161_v10 = vpop.f32.mrf.mxu1 }
 0x117   :  { %v1081_v11 = vpop.f32.mrf.mxu0  ;;  %v1162_v14 = vadd.f32 %v1161_v10, %v1160_v5 }
 0x118   :  { %891 = vst.msk [vmem:[%s1640_s3 + $0x28] sm:$0xf] %vm880_vm0, %v1015_v7  ;;  %v785_v12 = vmax.f32 %v732_v8, 0.0  ;;  %v617_v13 = vadd.f32 %v1080_v9, %v1531_v16  ;;  %v1163_v15 = vpop.f32.mrf.mxu1 }
 0x119   :  { %v1082_v17 = vpop.f32.mrf.mxu0 }
 0x11a   :  { %v1016_v18 = vpack.c.bf16 %v785_v12, %v785_v12  ;;  %v737_v19 = vadd.f32 %v1162_v14, %v617_v13  ;;  %v1083_v20 = vadd.f32 %v1082_v17, %v1081_v11  ;;  %v1164_v21 = vpop.f32.mrf.mxu1 }
 0x11b   :  { %v1084_v22 = vpop.f32.mrf.mxu0  ;;  %v1165_v25 = vadd.f32 %v1164_v21, %v1163_v15 }
 0x11c   :  { %892 = vst.msk [vmem:[%s1640_s3 + $0x2c] sm:$0xf] %vm880_vm0, %v1016_v18  ;;  %v786_v23 = vmax.f32 %v737_v19, 0.0  ;;  %v620_v24 = vadd.f32 %v1083_v20, %v1531_v16  ;;  %v1166_v26 = vpop.f32.mrf.mxu1 }
 0x11d   :  { %v1085_v27 = vpop.f32.mrf.mxu0 }
 0x11e   :  { %v1017_v28 = vpack.c.bf16 %v786_v23, %v786_v23  ;;  %v740_v29 = vadd.f32 %v1165_v25, %v620_v24  ;;  %v1086_v30 = vadd.f32 %v1085_v27, %v1084_v22  ;;  %v1167_v31 = vpop.f32.mrf.mxu1 }
 0x11f   :  { %v1087_v32 = vpop.f32.mrf.mxu0  ;;  %v1168_v35 = vadd.f32 %v1167_v31, %v1166_v26 }
 0x120   :  { %893 = vst.msk [vmem:[%s1640_s3 + $0x30] sm:$0xf] %vm880_vm0, %v1017_v28  ;;  %v787_v33 = vmax.f32 %v740_v29, 0.0  ;;  %v625_v34 = vadd.f32 %v1086_v30, %v1531_v16  ;;  %v1169_v36 = vpop.f32.mrf.mxu1 }
 0x121   :  { %v1088_v37 = vpop.f32.mrf.mxu0 }
 0x122   :  { %v1018_v38 = vpack.c.bf16 %v787_v33, %v787_v33  ;;  %v745_v39 = vadd.f32 %v1168_v35, %v625_v34  ;;  %v1089_v40 = vadd.f32 %v1088_v37, %v1087_v32  ;;  %v1170_v41 = vpop.f32.mrf.mxu1 }
 0x123   :  { %v1090_v42 = vpop.f32.mrf.mxu0  ;;  %v1171_v45 = vadd.f32 %v1170_v41, %v1169_v36 }
 0x124   :  { %894 = vst.msk [vmem:[%s1640_s3 + $0x34] sm:$0xf] %vm880_vm0, %v1018_v38  ;;  %v788_v43 = vmax.f32 %v745_v39, 0.0  ;;  %v628_v44 = vadd.f32 %v1089_v40, %v1531_v16  ;;  %v1172_v46 = vpop.f32.mrf.mxu1 }
 0x125   :  { %v1091_v47 = vpop.f32.mrf.mxu0 }
 0x126   :  { %v1019_v48 = vpack.c.bf16 %v788_v43, %v788_v43  ;;  %v748_v49 = vadd.f32 %v1171_v45, %v628_v44  ;;  %v1092_v50 = vadd.f32 %v1091_v47, %v1090_v42  ;;  %v1173_v51 = vpop.f32.mrf.mxu1 }
 0x127   :  { %v1093_v52 = vpop.f32.mrf.mxu0  ;;  %v1174_v55 = vadd.f32 %v1173_v51, %v1172_v46 }
 0x128   :  { %895 = vst.msk [vmem:[%s1640_s3 + $0x38] sm:$0xf] %vm880_vm0, %v1019_v48  ;;  %v789_v53 = vmax.f32 %v748_v49, 0.0  ;;  %v633_v54 = vadd.f32 %v1092_v50, %v1531_v16  ;;  %v1175_v56 = vpop.f32.mrf.mxu1 }
 0x129   :  { %v1094_v57 = vpop.f32.mrf.mxu0 }
 0x12a   :  { %v1020_v58 = vpack.c.bf16 %v789_v53, %v789_v53  ;;  %v753_v59 = vadd.f32 %v1174_v55, %v633_v54  ;;  %v1095_v60 = vadd.f32 %v1094_v57, %v1093_v52  ;;  %v1176_v61 = vpop.f32.mrf.mxu1 }
 0x12b   :  { %v1096_v62 = vpop.f32.mrf.mxu0  ;;  %v1177_v1 = vadd.f32 %v1176_v61, %v1175_v56 }
 0x12c   :  { %896 = vst.msk [vmem:[%s1640_s3 + $0x3c] sm:$0xf] %vm880_vm0, %v1020_v58  ;;  %v790_v63 = vmax.f32 %v753_v59, 0.0  ;;  %v636_v0 = vadd.f32 %v1095_v60, %v1531_v16  ;;  %v1178_v2 = vpop.f32.mrf.mxu1 }
 0x12d   :  { %v1097_v3 = vpop.f32.mrf.mxu0 }
 0x12e   :  { %v1021_v4 = vpack.c.bf16 %v790_v63, %v790_v63  ;;  %v756_v5 = vadd.f32 %v1177_v1, %v636_v0  ;;  %v1098_v6 = vadd.f32 %v1097_v3, %v1096_v62  ;;  %v1179_v7 = vpop.f32.mrf.mxu1 }
 0x12f   :  { %v1099_v8 = vpop.f32.mrf.mxu0  ;;  %v1180_v11 = vadd.f32 %v1179_v7, %v1178_v2 }
 0x130   :  { %897 = vst.msk [vmem:[%s1640_s3 + $0x40] sm:$0xf] %vm880_vm0, %v1021_v4  ;;  %v791_v9 = vmax.f32 %v756_v5, 0.0  ;;  %v641_v10 = vadd.f32 %v1098_v6, %v1531_v16  ;;  %v1181_v12 = vpop.f32.mrf.mxu1 }
 0x131   :  { %v1100_v13 = vpop.f32.mrf.mxu0 }
 0x132   :  { %v1022_v14 = vpack.c.bf16 %v791_v9, %v791_v9  ;;  %v761_v15 = vadd.f32 %v1180_v11, %v641_v10  ;;  %v1101_v17 = vadd.f32 %v1100_v13, %v1099_v8  ;;  %v1182_v18 = vpop.f32.mrf.mxu1 }
 0x133   :  { %v1102_v19 = vpop.f32.mrf.mxu0  ;;  %v1183_v22 = vadd.f32 %v1182_v18, %v1181_v12 }
 0x134   :  { %898 = vst.msk [vmem:[%s1640_s3 + $0x44] sm:$0xf] %vm880_vm0, %v1022_v14  ;;  %v792_v20 = vmax.f32 %v761_v15, 0.0  ;;  %v644_v21 = vadd.f32 %v1101_v17, %v1531_v16  ;;  %v1184_v23 = vpop.f32.mrf.mxu1 }
 0x135   :  { %v1103_v24 = vpop.f32.mrf.mxu0 }
 0x136   :  { %v1023_v25 = vpack.c.bf16 %v792_v20, %v792_v20  ;;  %v764_v26 = vadd.f32 %v1183_v22, %v644_v21  ;;  %v1104_v27 = vadd.f32 %v1103_v24, %v1102_v19  ;;  %v1185_v28 = vpop.f32.mrf.mxu1 }
 0x137   :  { %v1105_v29 = vpop.f32.mrf.mxu0  ;;  %v1186_v32 = vadd.f32 %v1185_v28, %v1184_v23 }
 0x138   :  { %899 = vst.msk [vmem:[%s1640_s3 + $0x48] sm:$0xf] %vm880_vm0, %v1023_v25  ;;  %v793_v30 = vmax.f32 %v764_v26, 0.0  ;;  %v649_v31 = vadd.f32 %v1104_v27, %v1531_v16  ;;  %v1187_v33 = vpop.f32.mrf.mxu1 }
 0x139   :  { %v1106_v34 = vpop.f32.mrf.mxu0 }
 0x13a   :  { %v1024_v35 = vpack.c.bf16 %v793_v30, %v793_v30  ;;  %v769_v36 = vadd.f32 %v1186_v32, %v649_v31  ;;  %v1188_v37 = vpop.f32.mrf.mxu1 }
 0x13c   :  { %900 = vst.msk [vmem:[%s1640_s3 + $0x4c] sm:$0xf] %vm880_vm0, %v1024_v35  ;;  %v794_v38 = vmax.f32 %v769_v36, 0.0 }
 0x13e   :  { %v1025_v39 = vpack.c.bf16 %v794_v38, %v794_v38 }
 0x140   :  { %902 = vst.msk [vmem:[%s1640_s3 + $0x50] sm:$0x1] %vm901_vm1, %v1025_v39 }

// kernel: net_forward.6
= control target key start
LH: loop header
LB: loop body
LE: loop exit
PB: predicated region body
PF: predicated region fallthrough
CT: control target
= control target key end

     0   :  { %v1248_v34 = vmov 0.0   ;;  %vm1249_vm0 = vmmov 0   ;;  %vm516_vm1 = vcmask 523264   ;;  %vm868_vm2 = vcmask 519168   ;;  %s1647_s1 = inlined_call_operand.vmem [shape: bf16[576,64], index: 1, kind: input, shape index: {}]   ;;  %s1648_s0 = inlined_call_operand.vmem [shape: bf16[98,576], index: 0, kind: input, shape index: {}]   ;;  %s1649_s2 = inlined_call_operand.vmem [shape: f32[1,64], index: 2, kind: input, shape index: {}]   ;;  %s1650_s3 = inlined_call_operand.vmem [shape: bf16[98,64], index: 3, kind: output, shape index: {}]  }
   0x1   :  { %v1165_v0 = vld [vmem:[%s1647_s1 + $0x78] sm:$0xff]   ;;  %v1169_v4 = vld [vmem:[%s1647_s1 + $0x70] sm:$0xff]   ;;  %v1173_v8 = vld [vmem:[%s1647_s1 + $0x68] sm:$0xff]   ;;  %vm881_vm3 = vcmask 516096  }
   0x2   :  { %v1166_v1 = vld [vmem:[%s1647_s1 + $0xf8] sm:$0xff]   ;;  %992 = vmatprep.subr.bf16.mxu0 %v1165_v0  ;;  %v1170_v5 = vld [vmem:[%s1647_s1 + $0xf0] sm:$0xff]   ;;  %v1174_v9 = vld [vmem:[%s1647_s1 + $0xe8] sm:$0xff]  }
   0x3   :  { %v1167_v2 = vld [vmem:[%s1647_s1 + $0x38] sm:$0xff]   ;;  %1050 = vmatprep.subr.bf16.mxu1 %v1166_v1  ;;  %v1171_v6 = vld [vmem:[%s1647_s1 + $0x30] sm:$0xff]   ;;  %v1175_v10 = vld [vmem:[%s1647_s1 + $0x28] sm:$0xff]  }
   0x4   :  { %v1168_v3 = vld [vmem:[%s1647_s1 + $0xb8] sm:$0xff]   ;;  %993 = vmatpush3.bf16.msra.mxu0 %v1167_v2  ;;  %v1172_v7 = vld [vmem:[%s1647_s1 + $0xb0] sm:$0xff]   ;;  %v1176_v11 = vld [vmem:[%s1647_s1 + $0xa8] sm:$0xff]  }
   0x5   :  { %1051 = vmatpush3.bf16.msra.mxu1 %v1168_v3  ;;  %994 = vmatprep.subr.bf16.mxu0 %v1169_v4  ;;  %v1177_v12 = vld [vmem:[%s1647_s1 + $0x60] sm:$0xff]   ;;  %v1181_v16 = vld [vmem:[%s1647_s1 + $0x58] sm:$0xff]   ;;  %v1185_v20 = vld [vmem:[%s1647_s1 + $0x50] sm:$0xff]  }
   0x6   :  { %1052 = vmatprep.subr.bf16.mxu1 %v1170_v5  ;;  %v1178_v13 = vld [vmem:[%s1647_s1 + $0xe0] sm:$0xff]   ;;  %v1182_v17 = vld [vmem:[%s1647_s1 + $0xd8] sm:$0xff]   ;;  %v1186_v21 = vld [vmem:[%s1647_s1 + $0xd0] sm:$0xff]  }
   0x7   :  { %v1179_v14 = vld [vmem:[%s1647_s1 + $0x20] sm:$0xff]   ;;  %v1183_v18 = vld [vmem:[%s1647_s1 + $0x18] sm:$0xff]   ;;  %v1187_v22 = vld [vmem:[%s1647_s1 + $0x10] sm:$0xff]  }
   0x8   :  { %995 = vmatpush3.bf16.msra.mxu0 %v1171_v6  ;;  %v1180_v15 = vld [vmem:[%s1647_s1 + $0xa0] sm:$0xff]   ;;  %v1184_v19 = vld [vmem:[%s1647_s1 + $0x98] sm:$0xff]   ;;  %v1188_v23 = vld [vmem:[%s1647_s1 + $0x90] sm:$0xff]  }
   0x9   :  { %1053 = vmatpush3.bf16.msra.mxu1 %v1172_v7  ;;  %996 = vmatprep.subr.bf16.mxu0 %v1173_v8  ;;  %v1189_v24 = vld [vmem:[%s1647_s1 + $0x48] sm:$0xff]   ;;  %v1193_v28 = vld [vmem:[%s1647_s1 + $0x40] sm:$0xff]   ;;  %v1203_v37 = vld [vmem:[%s1647_s1 + $0x118] sm:$0xff]  }
   0xa   :  { %1054 = vmatprep.subr.bf16.mxu1 %v1174_v9  ;;  %v1190_v25 = vld [vmem:[%s1647_s1 + $0xc8] sm:$0xff]   ;;  %v1194_v29 = vld [vmem:[%s1647_s1 + $0xc0] sm:$0xff]   ;;  %v1214_v43 = vld [vmem:[%s1647_s1 + $0x110] sm:$0xff]  }
   0xb   :  { %v1191_v26 = vld [vmem:[%s1647_s1 + $0x8] sm:$0xff]   ;;  %v1195_v30 = vld [vmem:[%s1647_s1] sm:$0xff]   ;;  %v1212_v44 = vld [vmem:[%s1648_s0 + $0x5c] ss:$20 sps:$4 sm:$0xff]  }
   0xc   :  { %997 = vmatpush3.bf16.msra.mxu0 %v1175_v10  ;;  %v1192_v27 = vld [vmem:[%s1647_s1 + $0x88] sm:$0xff]   ;;  %v1196_v31 = vld [vmem:[%s1647_s1 + $0x80] sm:$0xff]   ;;  %v1217_v48 = vld [vmem:[%s1648_s0 + $0x7c] ss:$20 sps:$4 sm:$0xff]  }
   0xd   :  { %1055 = vmatpush3.bf16.msra.mxu1 %v1176_v11  ;;  %998 = vmatprep.subr.bf16.mxu0 %v1177_v12  ;;  %v1197_v32 = vld [vmem:[%s1648_s0] ss:$20 sps:$4 sm:$0xff]   ;;  %v1199_v33 = vld [vmem:[%s1648_s0 + $0x4] ss:$20 sps:$4 sm:$0xff]   ;;  %v1200_v35 = vld [vmem:[%s1648_s0 + $0x8] ss:$20 sps:$4 sm:$0xff]  }
   0xe   :  { %1056 = vmatprep.subr.bf16.mxu1 %v1178_v13  ;;  %v1202_v36 = vld [vmem:[%s1648_s0 + $0xc] ss:$20 sps:$4 sm:$0xff]   ;;  %570 = vmatprep.mubr.bf16.mxu0 %v1199_v33  ;;  %v1206_v39 = vld [vmem:[%s1648_s0 + $0x34] ss:$20 sps:$4 sm:$0xff]   ;;  %v1209_v41 = vld [vmem:[%s1648_s0 + $0x30] ss:$20 sps:$4 sm:$0xff]  }
   0xf   :  { %658 = vmatprep.mubr.bf16.mxu1 %v1202_v36  ;;  %v1204_v38 = vld [vmem:[%s1648_s0 + $0x2c] ss:$20 sps:$4 sm:$0xff]   ;;  %v1208_v40 = vld [vmem:[%s1648_s0 + $0x28] ss:$20 sps:$4 sm:$0xff]   ;;  %v1215_v46 = vld [vmem:[%s1648_s0 + $0x50] ss:$20 sps:$4 sm:$0xff]  }
  0x10   :  { %999 = vmatpush3.bf16.msra.mxu0 %v1179_v14  ;;  %v1210_v42 = vld [vmem:[%s1648_s0 + $0x54] ss:$20 sps:$4 sm:$0xff]   ;;  %v1216_v47 = vld [vmem:[%s1648_s0 + $0x58] ss:$20 sps:$4 sm:$0xff]   ;;  %v1236_v50 = vld [vmem:[%s1647_s1 + $0x100] sm:$0xff]  }
  0x11   :  { %1057 = vmatpush3.bf16.msra.mxu1 %v1180_v15  ;;  %1000 = vmatprep.subr.bf16.mxu0 %v1181_v16  ;;  %v1223_v45 = vld [vmem:[%s1647_s1 + $0x108] sm:$0xff]   ;;  %v1219_v49 = vld [vmem:[%s1648_s0 + $0x84] ss:$20 sps:$4 sm:$0xff]   ;;  %v1222_v52 = vld [vmem:[%s1648_s0 + $0x80] ss:$20 sps:$4 sm:$0xff]  }
  0x12   :  { %1058 = vmatprep.subr.bf16.mxu1 %v1182_v17  ;;  %v1221_v51 = vld [vmem:[%s1648_s0 + $0x78] ss:$20 sps:$4 sm:$0xff]   ;;  %v1228_v55 = vld [vmem:[%s1648_s0 + $0xa0] ss:$20 sps:$4 sm:$0xff]   ;;  %v1229_v56 = vld [vmem:[%s1648_s0 + $0xa8] ss:$20 sps:$4 sm:$0xff]  }
  0x13   :  { %v1224_v53 = vld [vmem:[%s1648_s0 + $0xa4] ss:$20 sps:$4 sm:$0xff]   ;;  %v1226_v54 = vld [vmem:[%s1648_s0 + $0xac] ss:$20 sps:$4 sm:$0xff]   ;;  %v1232_v58 = vld [vmem:[%s1648_s0 + $0xd4] ss:$20 sps:$4 sm:$0xff]  }
  0x14   :  { %1001 = vmatpush3.bf16.msra.mxu0 %v1183_v18  ;;  %v1230_v57 = vld [vmem:[%s1648_s0 + $0xcc] ss:$20 sps:$4 sm:$0xff]   ;;  %v51_v59 = vld [vmem:[%s1648_s0 + $0xf0] sm:$0x11]  ;;  %v52_v60 = vld [vmem:[%s1648_s0 + $0xf8] sm:$0x11] }
  0x15   :  { %1059 = vmatpush3.bf16.msra.mxu1 %v1184_v19  ;;  %1002 = vmatprep.subr.bf16.mxu0 %v1185_v20  ;;  %v1234_v61 = vld [vmem:[%s1648_s0 + $0xc8] ss:$20 sps:$4 sm:$0xff]   ;;  %v1235_v62 = vld [vmem:[%s1648_s0 + $0xd0] ss:$20 sps:$4 sm:$0xff]   ;;  %v919_v63 = vcombine.high %v51_v59, %v51_v59  ;;  %v921_v0 = vcombine.high %v52_v60, %v52_v60  ;;  %v918_v1 = vcombine.low %v51_v59, %v51_v59  ;;  %v1243_v5 = vld [vmem:[%s1648_s0 + $0x38] ss:$20 sps:$4 sm:$0xff]  }
  0x16   :  { %1060 = vmatprep.subr.bf16.mxu1 %v1186_v21  ;;  %v920_v2 = vcombine.low %v52_v60, %v52_v60  ;;  %v1241_v3 = vld [vmem:[%s1648_s0 + $0x10] ss:$20 sps:$4 sm:$0xff]   ;;  %v1244_v6 = vld [vmem:[%s1648_s0 + $0xd8] ss:$20 sps:$4 sm:$0xff]   ;;  %v1245_v7 = vld [vmem:[%s1648_s0 + $0x60] ss:$20 sps:$4 sm:$0xff]  }
  0x17   :  { %v1242_v4 = vld [vmem:[%s1648_s0 + $0xb0] ss:$20 sps:$4 sm:$0xff]   ;;  %v1246_v8 = vld [vmem:[%s1648_s0 + $0x100] ss:$0 sps:$4 sm:$0x11]  }
  0x18   :  { %1003 = vmatpush3.bf16.msra.mxu0 %v1187_v22  ;;  %v1247_v9 = vld [vmem:[%s1648_s0 + $0x88] ss:$20 sps:$4 sm:$0xff]   ;;  %v1553_v59 = vld [vmem:[%s1649_s2] ss:$0 sm:$0xff] }
  0x19   :  { %1061 = vmatpush3.bf16.msra.mxu1 %v1188_v23  ;;  %1004 = vmatprep.subr.bf16.mxu0 %v1189_v24 }
  0x1a   :  { %1062 = vmatprep.subr.bf16.mxu1 %v1190_v25 }
  0x1c   :  { %1005 = vmatpush3.bf16.msra.mxu0 %v1191_v26 }
  0x1d   :  { %1063 = vmatpush3.bf16.msra.mxu1 %v1192_v27  ;;  %1006 = vmatprep.subr.bf16.mxu0 %v1193_v28 }
  0x1e   :  { %1064 = vmatprep.subr.bf16.mxu1 %v1194_v29 }
  0x20   :  { %1007 = vmatpush3.bf16.msra.mxu0 %v1195_v30 }
  0x21   :  { %1065 = vmatpush3.bf16.msra.mxu1 %v1196_v31  ;;  %1119 = vmatprep.subr.bf16.mxu0 %v1248_v34 }
  0x22   :  { %1155 = vmatprep.subr.bf16.mxu1 %v1248_v34 }
  0x23   :  { %571 = vmatmul.mubr.bf16.vlgmr.msra.gmra.mxu0 %v1197_v32 }
  0x24   :  { %659 = vmatmul.mubr.bf16.vlgmr.msra.gmra.mxu1 %v1200_v35  ;;  %1120 = vmatpush3.bf16.msra.mxu0 %v1203_v37 }
  0x25   :  { %578 = vmatprep.mubr.bf16.mxu0 %v1204_v38  ;;  %1159 = vmatpush3.bf16.msra.mxu1 %v1203_v37 }
  0x26   :  { %666 = vmatprep.mubr.bf16.mxu1 %v1206_v39  ;;  %1121 = vmatprep.subr.bf16.mxu0 %v1248_v34 }
  0x27   :  { %1156 = vmatprep.subr.bf16.mxu1 %v1248_v34 }
  0x28   :  { %1122 = vmatpush3.bf16.msra.mxu0 %v1214_v43 }
  0x29   :  { %1160 = vmatpush3.bf16.msra.mxu1 %v1214_v43  ;;  %1123 = vmatprep.subr.bf16.mxu0 %v1248_v34 }
  0x2a   :  { %1157 = vmatprep.subr.bf16.mxu1 %v1248_v34 }
  0x2b   :  { %579 = vmatmul.mubr.bf16.gmra.mxu0 %v1208_v40 }
  0x2c   :  { %667 = vmatmul.mubr.bf16.gmra.mxu1 %v1209_v41  ;;  %586 = vmatprep.mubr.bf16.mxu0 %v1210_v42 }
  0x2d   :  { %674 = vmatprep.mubr.bf16.mxu1 %v1212_v44  ;;  %1124 = vmatpush3.bf16.msra.mxu0 %v1223_v45 }
  0x2e   :  { %1161 = vmatpush3.bf16.msra.mxu1 %v1223_v45  ;;  %1125 = vmatprep.subr.bf16.mxu0 %v1248_v34 }
  0x2f   :  { %1158 = vmatprep.subr.bf16.mxu1 %v1248_v34 }
  0x31   :  { %1126 = vmatpush3.bf16.msra.mxu0 %v1236_v50 }
  0x32   :  { %1162 = vmatpush3.bf16.msra.mxu1 %v1236_v50 }
  0x33   :  { %587 = vmatmul.mubr.bf16.gmra.mxu0 %v1215_v46 }
  0x34   :  { %675 = vmatmul.mubr.bf16.gmra.mxu1 %v1216_v47  ;;  %594 = vmatprep.mubr.bf16.mxu0 %v1217_v48 }
  0x35   :  { %682 = vmatprep.mubr.bf16.mxu1 %v1219_v49 }
  0x3b   :  { %595 = vmatmul.mubr.bf16.gmra.mxu0 %v1221_v51 }
  0x3c   :  { %683 = vmatmul.mubr.bf16.gmra.mxu1 %v1222_v52  ;;  %602 = vmatprep.mubr.bf16.mxu0 %v1224_v53 }
  0x3d   :  { %690 = vmatprep.mubr.bf16.mxu1 %v1226_v54 }
  0x43   :  { %603 = vmatmul.mubr.bf16.gmra.mxu0 %v1228_v55 }
  0x44   :  { %691 = vmatmul.mubr.bf16.gmra.mxu1 %v1229_v56  ;;  %610 = vmatprep.mubr.bf16.mxu0 %v1230_v57 }
  0x45   :  { %698 = vmatprep.mubr.bf16.mxu1 %v1232_v58 }
  0x4b   :  { %611 = vmatmul.mubr.bf16.gmra.mxu0 %v1234_v61 }
  0x4c   :  { %699 = vmatmul.mubr.bf16.gmra.mxu1 %v1235_v62  ;;  %618 = vmatprep.mubr.bf16.mxu0 %v919_v63 }
  0x4d   :  { %706 = vmatprep.mubr.bf16.mxu1 %v921_v0 }
  0x53   :  { %619 = vmatmul.mubr.bf16.gmra.mxu0 %v918_v1 }
  0x54   :  { %707 = vmatmul.mubr.bf16.gmra.mxu1 %v920_v2  ;;  %1127 = vmatprep.mubr.msk.bf16.mxu0 %vm1249_vm0, %v1248_v34 }
  0x55   :  { %1143 = vmatprep.mubr.msk.bf16.mxu1 %vm1249_vm0, %v1248_v34 }
  0x5b   :  { %1128 = vmatmul.mubr.msk.bf16.vlgmr.msra.gmra.mxu0 %vm516_vm1, %v1241_v3 }
  0x5c   :  { %1144 = vmatmul.mubr.msk.bf16.vlgmr.msra.gmra.mxu1 %vm516_vm1, %v1242_v4  ;;  %1131 = vmatprep.mubr.msk.bf16.mxu0 %vm1249_vm0, %v1248_v34 }
  0x5d   :  { %1147 = vmatprep.mubr.msk.bf16.mxu1 %vm1249_vm0, %v1248_v34 }
  0x63   :  { %1132 = vmatmul.mubr.msk.bf16.gmra.mxu0 %vm516_vm1, %v1243_v5 }
  0x64   :  { %1148 = vmatmul.mubr.msk.bf16.gmra.mxu1 %vm516_vm1, %v1244_v6  ;;  %1135 = vmatprep.mubr.msk.bf16.mxu0 %vm1249_vm0, %v1248_v34 }
  0x65   :  { %1151 = vmatprep.mubr.msk.bf16.mxu1 %vm1249_vm0, %v1248_v34 }
  0x6b   :  { %1136 = vmatmul.mubr.msk.bf16.gmra.mxu0 %vm516_vm1, %v1245_v7 }
  0x6c   :  { %1152 = vmatmul.mubr.msk.bf16.gmra.mxu1 %vm516_vm1, %v1246_v8  ;;  %1139 = vmatprep.mubr.msk.bf16.mxu0 %vm1249_vm0, %v1248_v34 }
  0x73   :  { %1140 = vmatmul.mubr.msk.bf16.gmra.mxu0 %vm516_vm1, %v1247_v9 }
  0xe3   :  { %v1008_v10 = vpop.f32.mrf.mxu0 }
  0xe4   :  { %v1066_v11 = vpop.f32.mrf.mxu1 }
  0xe5   :  { %v1009_v12 = vpop.f32.mrf.mxu0 }
  0xe6   :  { %v1067_v13 = vpop.f32.mrf.mxu1  ;;  %v1010_v57 = vadd.f32 %v1009_v12, %v1008_v10 }
  0xe7   :  { %v1011_v14 = vpop.f32.mrf.mxu0  ;;  %v1068_v2 = vadd.f32 %v1067_v13, %v1066_v11 }
  0xe8   :  { %v1069_v15 = vpop.f32.mrf.mxu1  ;;  %v573_v1 = vadd.f32 %v1010_v57, %v1553_v59 }
  0xe9   :  { %v1012_v16 = vpop.f32.mrf.mxu0 }
  0xea   :  { %v1070_v17 = vpop.f32.mrf.mxu1  ;;  %v1013_v63 = vadd.f32 %v1012_v16, %v1011_v14  ;;  %v661_v14 = vadd.f32 %v1068_v2, %v573_v1 }
  0xeb   :  { %v1014_v18 = vpop.f32.mrf.mxu0  ;;  %v1071_v10 = vadd.f32 %v1070_v17, %v1069_v15 }
  0xec   :  { %v1506_v19 = vpop.f32.mrf.mxu1  ;;  %v576_v9 = vadd.f32 %v1013_v63, %v1553_v59 }
  0xed   :  { %v1015_v20 = vpop.f32.mrf.mxu0 }
  0xee   :  { %v1508_v21 = vpop.f32.mrf.mxu1  ;;  %v1016_v12 = vadd.f32 %v1015_v20, %v1014_v18  ;;  %v664_v15 = vadd.f32 %v1071_v10, %v576_v9 }
  0xef   :  { %v1510_v22 = vpop.f32.mrf.mxu0 }
  0xf0   :  { %v1512_v23 = vpop.f32.mrf.mxu1 }
  0xf1   :  { %v1514_v24 = vpop.f32.mrf.mxu0 }
  0xf2   :  { %v1516_v25 = vpop.f32.mrf.mxu1  ;;  %v1019_v17 = vadd.f32 %v1514_v24, %v1510_v22 }
  0xf3   :  { %v1518_v26 = vpop.f32.mrf.mxu0 }
  0xf4   :  { %v1520_v27 = vpop.f32.mrf.mxu1  ;;  %v584_v24 = vadd.f32 %v1019_v17, %v1553_v59 }
  0xf5   :  { %v1522_v28 = vpop.f32.mrf.mxu0 }
  0xf6   :  { %v1524_v29 = vpop.f32.mrf.mxu1 }
  0xf7   :  { %v1526_v30 = vpop.f32.mrf.mxu0 }
  0xf8   :  { %v1528_v31 = vpop.f32.mrf.mxu1 }
  0xf9   :  { %v1530_v32 = vpop.f32.mrf.mxu0 }
  0xfa   :  { %v1532_v33 = vpop.f32.mrf.mxu1 }
  0xfb   :  { %v1534_v34 = vpop.f32.mrf.mxu0 }
  0xfc   :  { %v1536_v35 = vpop.f32.mrf.mxu1 }
  0xfd   :  { %v1538_v36 = vpop.f32.mrf.mxu0 }
  0xfe   :  { %v1540_v37 = vpop.f32.mrf.mxu1 }
  0xff   :  { %v1542_v38 = vpop.f32.mrf.mxu0 }
 0x100   :  { %v1544_v39 = vpop.f32.mrf.mxu1 }
 0x101   :  { %1651 = vst [vmem:[#allocation2_spill] sm:$0xff] %v1544_v39  ;;  %v1546_v40 = vpop.f32.mrf.mxu0 }
 0x102   :  { %1652 = vst [vmem:[#allocation3_spill] sm:$0xff] %v1546_v40  ;;  %v1548_v41 = vpop.f32.mrf.mxu1 }
 0x103   :  { %1653 = vst [vmem:[#allocation4_spill] sm:$0xff] %v1548_v41  ;;  %v1032_v42 = vpop.f32.mrf.mxu0 }
 0x104   :  { %v1090_v43 = vpop.f32.mrf.mxu1 }
 0x105   :  { %v1033_v44 = vpop.f32.mrf.mxu0 }
 0x106   :  { %v1091_v45 = vpop.f32.mrf.mxu1  ;;  %v1034_v60 = vadd.f32 %v1033_v44, %v1032_v42 }
 0x107   :  { %v1035_v46 = vpop.f32.mrf.mxu0  ;;  %v1092_v5 = vadd.f32 %v1091_v45, %v1090_v43  ;;  %v581_v43 = vadd.f32 %v1016_v12, %v1553_v59  ;;  %v1074_v45 = vadd.f32 %v1508_v21, %v1506_v19  ;;  %v1077_v19 = vadd.f32 %v1516_v25, %v1512_v23 }
 0x108   :  { %v1093_v47 = vpop.f32.mrf.mxu1  ;;  %v605_v4 = vadd.f32 %v1034_v60, %v1553_v59 }
 0x109   :  { %v1036_v48 = vpop.f32.mrf.mxu0  ;;  %v669_v22 = vadd.f32 %v1074_v45, %v581_v43 }
 0x10a   :  { %v1094_v49 = vpop.f32.mrf.mxu1  ;;  %v1037_v6 = vadd.f32 %v1036_v48, %v1035_v46  ;;  %v693_v13 = vadd.f32 %v1092_v5, %v605_v4 }
 0x10b   :  { %v1038_v50 = vpop.f32.mrf.mxu0  ;;  %v1095_v57 = vadd.f32 %v1094_v49, %v1093_v47 }
 0x10c   :  { %v1096_v51 = vpop.f32.mrf.mxu1  ;;  %v608_v16 = vadd.f32 %v1037_v6, %v1553_v59 }
 0x10d   :  { %v1039_v52 = vpop.f32.mrf.mxu0 }
 0x10e   :  { %v1097_v53 = vpop.f32.mrf.mxu1  ;;  %v1040_v44 = vadd.f32 %v1039_v52, %v1038_v50  ;;  %v696_v60 = vadd.f32 %v1095_v57, %v608_v16 }
 0x10f   :  { %v1041_v54 = vpop.f32.mrf.mxu0  ;;  %v1098_v20 = vadd.f32 %v1097_v53, %v1096_v51 }
 0x110   :  { %v1099_v55 = vpop.f32.mrf.mxu1  ;;  %v613_v18 = vadd.f32 %v1040_v44, %v1553_v59 }
 0x111   :  { %v1042_v56 = vpop.f32.mrf.mxu0 }
 0x112   :  { %v1100_v58 = vpop.f32.mrf.mxu1  ;;  %v1043_v49 = vadd.f32 %v1042_v56, %v1041_v54  ;;  %v701_v54 = vadd.f32 %v1098_v20, %v613_v18 }
 0x113   :  { %v1044_v61 = vpop.f32.mrf.mxu0  ;;  %v1101_v23 = vadd.f32 %v1100_v58, %v1099_v55  ;;  %v1080_v55 = vadd.f32 %v1524_v29, %v1520_v27 }
 0x114   :  { %v1555_v62 = vpop.f32.mrf.mxu1  ;;  %v616_v56 = vadd.f32 %v1043_v49, %v1553_v59 }
 0x115   :  { %v1045_v0 = vpop.f32.mrf.mxu0 }
 0x116   :  { %v1558_v3 = vpop.f32.mrf.mxu1  ;;  %v1046_v25 = vadd.f32 %v1045_v0, %v1044_v61  ;;  %v672_v0 = vadd.f32 %v1077_v19, %v584_v24  ;;  %v704_v29 = vadd.f32 %v1101_v23, %v616_v56  ;;  %v1655_v24 = vld [vmem:[#allocation2_spill] sm:$0xff] }
 0x117   :  { %v1047_v7 = vpop.f32.mrf.mxu0 }
 0x118   :  { %v1105_v8 = vpop.f32.mrf.mxu1  ;;  %v621_v44 = vadd.f32 %v1046_v25, %v1553_v59 }
 0x119   :  { %v1048_v42 = vpop.f32.mrf.mxu0  ;;  %v1025_v8 = vadd.f32 %v1530_v32, %v1526_v30  ;;  %v1104_v30 = vadd.f32 %v1558_v3, %v1555_v62  ;;  %v1028_v62 = vadd.f32 %v1538_v36, %v1534_v34 }
 0x11a   :  { %v1106_v41 = vpop.f32.mrf.mxu1 }
 0x11b   :  { %v748_v11 = vpop.f32.mrf.mxu0  ;;  %v709_v17 = vadd.f32 %v1104_v30, %v621_v44 }
 0x11c   :  { %v749_v39 = vadd.f32 %v748_v11, %v661_v14  ;;  %v780_v40 = vpop.f32.mrf.mxu1  ;;  %v592_v11 = vadd.f32 %v1025_v8, %v1553_v59 }
 0x11d   :  { %v781_v46 = vadd.f32 %v780_v40, %v693_v13  ;;  %v1129_v48 = vpop.f32.mrf.mxu0  ;;  %v1083_v13 = vadd.f32 %v1532_v33, %v1528_v31 }
 0x11e   :  { %v802_v41 = vmax.f32 %v749_v39, 0.0  ;;  %v1145_v47 = vpop.f32.mrf.mxu1  ;;  %v1022_v39 = vadd.f32 %v1522_v28, %v1518_v26 }
 0x11f   :  { %v810_v50 = vmax.f32 %v781_v46, 0.0  ;;  %v751_v52 = vpop.f32.mrf.mxu0  ;;  %v680_v49 = vadd.f32 %v1083_v13, %v592_v11 }
 0x120   :  { %v979_v63 = vpack.c.bf16 %v802_v41, %v802_v41  ;;  %v752_v1 = vadd.f32 %v751_v52, %v664_v15  ;;  %v783_v2 = vpop.f32.mrf.mxu1  ;;  %v589_v42 = vadd.f32 %v1022_v39, %v1553_v59  ;;  %v1086_v52 = vadd.f32 %v1540_v37, %v1536_v35  ;;  %v1656_v39 = vld [vmem:[#allocation4_spill] sm:$0xff] }
 0x121   :  { %v987_v21 = vpack.c.bf16 %v810_v50, %v810_v50  ;;  %v784_v40 = vadd.f32 %v783_v2, %v696_v60  ;;  %v1130_v4 = vpop.f32.mrf.mxu0  ;;  %v597_v50 = vadd.f32 %v1028_v62, %v1553_v59  ;;  %v1654_v60 = vld [vmem:[#allocation3_spill] sm:$0xff] }
 0x122   :  { %869 = vst.msk [vmem:[%s1650_s3] sm:$0xf] %vm868_vm2, %v979_v63  ;;  %v803_v51 = vmax.f32 %v752_v1, 0.0  ;;  %v1146_v53 = vpop.f32.mrf.mxu1  ;;  %v677_v15 = vadd.f32 %v1080_v55, %v589_v42  ;;  %v1031_v63 = vadd.f32 %v1654_v60, %v1542_v38 }
 0x123   :  { %877 = vst.msk [vmem:[%s1650_s3 + $0x20] sm:$0xf] %vm868_vm2, %v987_v21  ;;  %v811_v5 = vmax.f32 %v784_v40, 0.0  ;;  %v756_v6 = vpop.f32.mrf.mxu0 }
 0x124   :  { %v980_v26 = vpack.c.bf16 %v803_v51, %v803_v51  ;;  %v757_v28 = vadd.f32 %v756_v6, %v669_v22  ;;  %v788_v7 = vpop.f32.mrf.mxu1  ;;  %v600_v22 = vadd.f32 %v1031_v63, %v1553_v59  ;;  %v1089_v51 = vadd.f32 %v1656_v39, %v1655_v24 }
 0x125   :  { %v988_v9 = vpack.c.bf16 %v811_v5, %v811_v5  ;;  %v789_v10 = vadd.f32 %v788_v7, %v701_v54  ;;  %v1133_v12 = vpop.f32.mrf.mxu0  ;;  %v685_v54 = vadd.f32 %v1086_v52, %v597_v50 }
 0x126   :  { %870 = vst.msk [vmem:[%s1650_s3 + $0x4] sm:$0xf] %vm868_vm2, %v980_v26  ;;  %v804_v58 = vmax.f32 %v757_v28, 0.0  ;;  %v1149_v61 = vpop.f32.mrf.mxu1  ;;  %v688_v26 = vadd.f32 %v1089_v51, %v600_v22 }
 0x127   :  { %878 = vst.msk [vmem:[%s1650_s3 + $0x24] sm:$0xf] %vm868_vm2, %v988_v9  ;;  %v812_v32 = vmax.f32 %v789_v10, 0.0  ;;  %v759_v27 = vpop.f32.mrf.mxu0 }
 0x128   :  { %v981_v14 = vpack.c.bf16 %v804_v58, %v804_v58  ;;  %v760_v16 = vadd.f32 %v759_v27, %v672_v0  ;;  %v791_v57 = vpop.f32.mrf.mxu1 }
 0x129   :  { %v989_v43 = vpack.c.bf16 %v812_v32, %v812_v32  ;;  %v792_v45 = vadd.f32 %v791_v57, %v704_v29  ;;  %v1134_v46 = vpop.f32.mrf.mxu0 }
 0x12a   :  { %871 = vst.msk [vmem:[%s1650_s3 + $0x8] sm:$0xf] %vm868_vm2, %v981_v14  ;;  %v805_v3 = vmax.f32 %v760_v16, 0.0  ;;  %v1150_v48 = vpop.f32.mrf.mxu1 }
 0x12b   :  { %879 = vst.msk [vmem:[%s1650_s3 + $0x28] sm:$0xf] %vm868_vm2, %v989_v43  ;;  %v813_v31 = vmax.f32 %v792_v45, 0.0  ;;  %v764_v33 = vpop.f32.mrf.mxu0 }
 0x12c   :  { %v982_v18 = vpack.c.bf16 %v805_v3, %v805_v3  ;;  %v765_v20 = vadd.f32 %v764_v33, %v677_v15  ;;  %v796_v41 = vpop.f32.mrf.mxu1 }
 0x12d   :  { %v990_v34 = vpack.c.bf16 %v813_v31, %v813_v31  ;;  %v797_v36 = vadd.f32 %v796_v41, %v709_v17  ;;  %v1137_v47 = vpop.f32.mrf.mxu0 }
 0x12e   :  { %872 = vst.msk [vmem:[%s1650_s3 + $0xc] sm:$0xf] %vm868_vm2, %v982_v18  ;;  %v806_v1 = vmax.f32 %v765_v20, 0.0  ;;  %v1153_v2 = vpop.f32.mrf.mxu1 }
 0x12f   :  { %880 = vst.msk [vmem:[%s1650_s3 + $0x2c] sm:$0xf] %vm868_vm2, %v990_v34  ;;  %v814_v19 = vmax.f32 %v797_v36, 0.0  ;;  %v767_v21 = vpop.f32.mrf.mxu0 }
 0x130   :  { %v983_v40 = vpack.c.bf16 %v806_v1, %v806_v1  ;;  %v768_v35 = vadd.f32 %v767_v21, %v680_v49  ;;  %v799_v37 = vpop.f32.mrf.mxu1 }
 0x131   :  { %v991_v4 = vpack.c.bf16 %v814_v19, %v814_v19  ;;  %v1138_v38 = vpop.f32.mrf.mxu0 }
 0x132   :  { %873 = vst.msk [vmem:[%s1650_s3 + $0x10] sm:$0xf] %vm868_vm2, %v983_v40  ;;  %v807_v53 = vmax.f32 %v768_v35, 0.0  ;;  %v1154_v56 = vpop.f32.mrf.mxu1 }
 0x133   :  { %882 = vst.msk [vmem:[%s1650_s3 + $0x30] sm:$0x1] %vm881_vm3, %v991_v4  ;;  %v772_v23 = vpop.f32.mrf.mxu0 }
 0x134   :  { %v984_v25 = vpack.c.bf16 %v807_v53, %v807_v53  ;;  %v773_v5 = vadd.f32 %v772_v23, %v685_v54 }
 0x135   :  { %v1141_v6 = vpop.f32.mrf.mxu0 }
 0x136   :  { %874 = vst.msk [vmem:[%s1650_s3 + $0x14] sm:$0xf] %vm868_vm2, %v984_v25  ;;  %v808_v59 = vmax.f32 %v773_v5, 0.0 }
 0x137   :  { %v775_v28 = vpop.f32.mrf.mxu0 }
 0x138   :  { %v985_v7 = vpack.c.bf16 %v808_v59, %v808_v59  ;;  %v776_v8 = vadd.f32 %v775_v28, %v688_v26 }
 0x139   :  { %v1142_v9 = vpop.f32.mrf.mxu0 }
 0x13a   :  { %875 = vst.msk [vmem:[%s1650_s3 + $0x18] sm:$0xf] %vm868_vm2, %v985_v7  ;;  %v809_v10 = vmax.f32 %v776_v8, 0.0 }
 0x13c   :  { %v986_v12 = vpack.c.bf16 %v809_v10, %v809_v10 }
 0x13e   :  { %876 = vst.msk [vmem:[%s1650_s3 + $0x1c] sm:$0xf] %vm868_vm2, %v986_v12 }

// kernel: net_forward.7
= control target key start
LH: loop header
LB: loop body
LE: loop exit
PB: predicated region body
PF: predicated region fallthrough
CT: control target
= control target key end

     0   :  { %v812_v36 = vlaneseq  ;;  %v8304_v37 = vmov 1966171168   ;;  %vm4941_vm0 = vcmask 523264   ;;  %s11150_s0 = inlined_call_operand.vmem [shape: bf16[2,3136], index: 0, kind: input, shape index: {}]   ;;  %s11151_s1 = inlined_call_operand.vmem [shape: bf16[3136,512], index: 1, kind: input, shape index: {}]   ;;  %s11152_s2 = inlined_call_operand.vmem [shape: f32[1,512], index: 2, kind: input, shape index: {}]   ;;  %s11153_s3 = inlined_call_operand.vmem [shape: f32[512,128], index: 3, kind: input, shape index: {}]   ;;  %s11154_s4 = inlined_call_operand.vmem [shape: f32[1,128], index: 4, kind: input, shape index: {}]   ;;  %s11155_s5 = inlined_call_operand.hbm [shape: f32[2,128], index: 5, kind: output, shape index: {}]  }
   0x1   :  { %v7102_v0 = vld [vmem:[%s11151_s1 + $0xe4] ss:$16 sps:$4 sm:$0xff]   ;;  %v7106_v2 = vld [vmem:[%s11151_s1 + $0xe0] ss:$16 sps:$4 sm:$0xff]   ;;  %v838_v38 = vunpack.c.l.s4 %v8304_v37 }
   0x2   :  { %v7104_v1 = vld [vmem:[%s11151_s1 + $0x2e4] ss:$16 sps:$4 sm:$0xff]   ;;  %4945 = vmatprep.subr.bf16.mxu0 %v7102_v0  ;;  %v7107_v3 = vld [vmem:[%s11151_s1 + $0x2e0] ss:$16 sps:$4 sm:$0xff]   ;;  %v8454_v42 = vshrl.u32 %v812_v36, 7 }
   0x3   :  { %4986 = vmatprep.subr.bf16.mxu1 %v7104_v1  ;;  %v7108_v4 = vld [vmem:[%s11151_s1 + $0xc4] ss:$16 sps:$4 sm:$0xff]   ;;  %4946 = vmatpush1.bf16.msra.mxu0 %v7106_v2  ;;  %v7112_v6 = vld [vmem:[%s11151_s1 + $0xc0] ss:$16 sps:$4 sm:$0xff]   ;;  %v839_v43 = vunpack.c.0.s8 %v838_v38 }
   0x4   :  { %4987 = vmatpush1.bf16.msra.mxu1 %v7107_v3  ;;  %v7110_v5 = vld [vmem:[%s11151_s1 + $0x2c4] ss:$16 sps:$4 sm:$0xff]   ;;  %4947 = vmatprep.subr.bf16.mxu0 %v7108_v4  ;;  %v7113_v7 = vld [vmem:[%s11151_s1 + $0x2c0] ss:$16 sps:$4 sm:$0xff]  }
   0x5   :  { %4988 = vmatprep.subr.bf16.mxu1 %v7110_v5  ;;  %v7114_v8 = vld [vmem:[%s11151_s1 + $0xa4] ss:$16 sps:$4 sm:$0xff]   ;;  %v7118_v10 = vld [vmem:[%s11151_s1 + $0xa0] ss:$16 sps:$4 sm:$0xff]   ;;  %v8472_v49 = vsub.s32 %v839_v43, %v8454_v42 }
   0x6   :  { %v7116_v9 = vld [vmem:[%s11151_s1 + $0x2a4] ss:$16 sps:$4 sm:$0xff]   ;;  %v7119_v11 = vld [vmem:[%s11151_s1 + $0x2a0] ss:$16 sps:$4 sm:$0xff]  }
   0x7   :  { %4948 = vmatpush1.bf16.msra.mxu0 %v7112_v6  ;;  %v7120_v12 = vld [vmem:[%s11151_s1 + $0x84] ss:$16 sps:$4 sm:$0xff]   ;;  %v7124_v14 = vld [vmem:[%s11151_s1 + $0x80] ss:$16 sps:$4 sm:$0xff]  }
   0x8   :  { %4989 = vmatpush1.bf16.msra.mxu1 %v7113_v7  ;;  %4949 = vmatprep.subr.bf16.mxu0 %v7114_v8  ;;  %v7122_v13 = vld [vmem:[%s11151_s1 + $0x284] ss:$16 sps:$4 sm:$0xff]   ;;  %v7125_v15 = vld [vmem:[%s11151_s1 + $0x280] ss:$16 sps:$4 sm:$0xff]  }
   0x9   :  { %4990 = vmatprep.subr.bf16.mxu1 %v7116_v9  ;;  %v7126_v16 = vld [vmem:[%s11151_s1 + $0x64] ss:$16 sps:$4 sm:$0xff]   ;;  %v7130_v18 = vld [vmem:[%s11151_s1 + $0x60] ss:$16 sps:$4 sm:$0xff]  }
   0xa   :  { %v7128_v17 = vld [vmem:[%s11151_s1 + $0x264] ss:$16 sps:$4 sm:$0xff]   ;;  %v7131_v19 = vld [vmem:[%s11151_s1 + $0x260] ss:$16 sps:$4 sm:$0xff]  }
   0xb   :  { %4950 = vmatpush1.bf16.msra.mxu0 %v7118_v10  ;;  %v7132_v20 = vld [vmem:[%s11151_s1 + $0x44] ss:$16 sps:$4 sm:$0xff]   ;;  %v7136_v22 = vld [vmem:[%s11151_s1 + $0x40] ss:$16 sps:$4 sm:$0xff]  }
   0xc   :  { %4991 = vmatpush1.bf16.msra.mxu1 %v7119_v11  ;;  %4951 = vmatprep.subr.bf16.mxu0 %v7120_v12  ;;  %v7134_v21 = vld [vmem:[%s11151_s1 + $0x244] ss:$16 sps:$4 sm:$0xff]   ;;  %v7137_v23 = vld [vmem:[%s11151_s1 + $0x240] ss:$16 sps:$4 sm:$0xff]  }
   0xd   :  { %4992 = vmatprep.subr.bf16.mxu1 %v7122_v13  ;;  %v7138_v24 = vld [vmem:[%s11151_s1 + $0x24] ss:$16 sps:$4 sm:$0xff]   ;;  %v7142_v26 = vld [vmem:[%s11151_s1 + $0x20] ss:$16 sps:$4 sm:$0xff]  }
   0xe   :  { %v7140_v25 = vld [vmem:[%s11151_s1 + $0x224] ss:$16 sps:$4 sm:$0xff]   ;;  %v7143_v27 = vld [vmem:[%s11151_s1 + $0x220] ss:$16 sps:$4 sm:$0xff]  }
   0xf   :  { %4952 = vmatpush1.bf16.msra.mxu0 %v7124_v14  ;;  %v7144_v28 = vld [vmem:[%s11151_s1 + $0x4] ss:$16 sps:$4 sm:$0xff]   ;;  %v7148_v30 = vld [vmem:[%s11151_s1] ss:$16 sps:$4 sm:$0xff]  }
  0x10   :  { %4993 = vmatpush1.bf16.msra.mxu1 %v7125_v15  ;;  %4953 = vmatprep.subr.bf16.mxu0 %v7126_v16  ;;  %v7146_v29 = vld [vmem:[%s11151_s1 + $0x204] ss:$16 sps:$4 sm:$0xff]   ;;  %v7149_v31 = vld [vmem:[%s11151_s1 + $0x200] ss:$16 sps:$4 sm:$0xff]  }
  0x11   :  { %4994 = vmatprep.subr.bf16.mxu1 %v7128_v17  ;;  %v7150_v32 = vld [vmem:[%s11151_s1 + $0x1e4] ss:$16 sps:$4 sm:$0xff]   ;;  %v7154_v34 = vld [vmem:[%s11151_s1 + $0x1e0] ss:$16 sps:$4 sm:$0xff]  }
  0x12   :  { %v7152_v33 = vld [vmem:[%s11151_s1 + $0x3e4] ss:$16 sps:$4 sm:$0xff]   ;;  %v7155_v35 = vld [vmem:[%s11151_s1 + $0x3e0] ss:$16 sps:$4 sm:$0xff]  }
  0x13   :  { %4954 = vmatpush1.bf16.msra.mxu0 %v7130_v18  ;;  %v7156_v39 = vld [vmem:[%s11151_s1 + $0x1c4] ss:$16 sps:$4 sm:$0xff]   ;;  %v7160_v41 = vld [vmem:[%s11151_s1 + $0x1c0] ss:$16 sps:$4 sm:$0xff]  }
  0x14   :  { %4995 = vmatpush1.bf16.msra.mxu1 %v7131_v19  ;;  %4955 = vmatprep.subr.bf16.mxu0 %v7132_v20  ;;  %v7158_v40 = vld [vmem:[%s11151_s1 + $0x3c4] ss:$16 sps:$4 sm:$0xff]   ;;  %v7161_v44 = vld [vmem:[%s11151_s1 + $0x3c0] ss:$16 sps:$4 sm:$0xff]  }
  0x15   :  { %4996 = vmatprep.subr.bf16.mxu1 %v7134_v21  ;;  %v7162_v45 = vld [vmem:[%s11151_s1 + $0x1a4] ss:$16 sps:$4 sm:$0xff]   ;;  %v7166_v47 = vld [vmem:[%s11151_s1 + $0x1a0] ss:$16 sps:$4 sm:$0xff]  }
  0x16   :  { %v7164_v46 = vld [vmem:[%s11151_s1 + $0x3a4] ss:$16 sps:$4 sm:$0xff]   ;;  %v7167_v48 = vld [vmem:[%s11151_s1 + $0x3a0] ss:$16 sps:$4 sm:$0xff]  }
  0x17   :  { %4956 = vmatpush1.bf16.msra.mxu0 %v7136_v22  ;;  %v7168_v50 = vld [vmem:[%s11151_s1 + $0x184] ss:$16 sps:$4 sm:$0xff]   ;;  %v7172_v53 = vld [vmem:[%s11151_s1 + $0x180] ss:$16 sps:$4 sm:$0xff]  }
  0x18   :  { %4997 = vmatpush1.bf16.msra.mxu1 %v7137_v23  ;;  %4957 = vmatprep.subr.bf16.mxu0 %v7138_v24  ;;  %v7170_v51 = vld [vmem:[%s11151_s1 + $0x384] ss:$16 sps:$4 sm:$0xff]   ;;  %v7173_v55 = vld [vmem:[%s11151_s1 + $0x380] ss:$16 sps:$4 sm:$0xff]  }
  0x19   :  { %4998 = vmatprep.subr.bf16.mxu1 %v7140_v25  ;;  %v22_v52 = vld [vmem:[%s11150_s0] sm:$0xff] }
  0x1a   :  { %v843_v54 = vrot.slane %v22_v52, %v8472_v49  ;;  %v7174_v56 = vld [vmem:[%s11151_s1 + $0x164] ss:$16 sps:$4 sm:$0xff]   ;;  %v7178_v59 = vld [vmem:[%s11151_s1 + $0x160] ss:$16 sps:$4 sm:$0xff]   ;;  %v836_v1 = vcombine.high %v22_v52, %v22_v52 }
  0x1b   :  { %4958 = vmatpush1.bf16.msra.mxu0 %v7142_v26  ;;  %v7176_v57 = vld [vmem:[%s11151_s1 + $0x364] ss:$16 sps:$4 sm:$0xff]   ;;  %v7179_v61 = vld [vmem:[%s11151_s1 + $0x360] ss:$16 sps:$4 sm:$0xff]  }
  0x1c   :  { %4999 = vmatpush1.bf16.msra.mxu1 %v7143_v27  ;;  %4959 = vmatprep.subr.bf16.mxu0 %v7144_v28  ;;  %v851_v58 = vcombine.high %v843_v54, %v843_v54  ;;  %v7180_v62 = vld [vmem:[%s11151_s1 + $0x144] ss:$16 sps:$4 sm:$0xff]   ;;  %v7184_v2 = vld [vmem:[%s11151_s1 + $0x140] ss:$16 sps:$4 sm:$0xff]   ;;  %v8530_v6 = vrot.slane %v836_v1, %v8472_v49  ;;  %v8550_v13 = vrot.slane %v843_v54, %v8472_v49 }
  0x1d   :  { %5000 = vmatprep.subr.bf16.mxu1 %v7146_v29  ;;  %v7182_v63 = vld [vmem:[%s11151_s1 + $0x344] ss:$16 sps:$4 sm:$0xff]   ;;  %v7185_v3 = vld [vmem:[%s11151_s1 + $0x340] ss:$16 sps:$4 sm:$0xff]  }
  0x1e   :  { %v8500_v60 = vrot.slane %v851_v58, %v8472_v49  ;;  %v7186_v4 = vld [vmem:[%s11151_s1 + $0x124] ss:$16 sps:$4 sm:$0xff]   ;;  %v7190_v7 = vld [vmem:[%s11151_s1 + $0x120] ss:$16 sps:$4 sm:$0xff]   ;;  %v852_v11 = vcombine.high %v8530_v6, %v8530_v6  ;;  %v8566_v18 = vcombine.high %v8550_v13, %v8550_v13 }
  0x1f   :  { %4960 = vmatpush1.bf16.msra.mxu0 %v7148_v30  ;;  %v7188_v5 = vld [vmem:[%s11151_s1 + $0x324] ss:$16 sps:$4 sm:$0xff]   ;;  %v7191_v8 = vld [vmem:[%s11151_s1 + $0x320] ss:$16 sps:$4 sm:$0xff]  }
  0x20   :  { %5001 = vmatpush1.bf16.msra.mxu1 %v7149_v31  ;;  %4961 = vmatprep.subr.bf16.mxu0 %v7150_v32  ;;  %v8513_v0 = vcombine.high %v8500_v60, %v8500_v60  ;;  %v7192_v9 = vld [vmem:[%s11151_s1 + $0x104] ss:$16 sps:$4 sm:$0xff]   ;;  %v7196_v12 = vld [vmem:[%s11151_s1 + $0x100] ss:$16 sps:$4 sm:$0xff]   ;;  %v8562_v17 = vrot.slane %v852_v11, %v8472_v49 }
  0x21   :  { %5002 = vmatprep.subr.bf16.mxu1 %v7152_v33  ;;  %4977 = vmatprep.mubr.bf16.mxu0 %v8500_v60  ;;  %v7194_v10 = vld [vmem:[%s11151_s1 + $0x304] ss:$16 sps:$4 sm:$0xff]   ;;  %v7197_v14 = vld [vmem:[%s11151_s1 + $0x300] ss:$16 sps:$4 sm:$0xff]  }
  0x22   :  { %5018 = vmatprep.mubr.bf16.mxu1 %v8513_v0  ;;  %v7200_v15 = vld [vmem:[%s11151_s1 + $0x4e4] ss:$16 sps:$4 sm:$0xff]   ;;  %v7198_v19 = vld [vmem:[%s11151_s1 + $0x4e0] ss:$16 sps:$4 sm:$0xff]   ;;  %v8582_v23 = vcombine.high %v8562_v17, %v8562_v17 }
  0x23   :  { %4962 = vmatpush2.bf16.msra.mxu0 %v7154_v34  ;;  %v7203_v16 = vld [vmem:[%s11151_s1 + $0x6e4] ss:$16 sps:$4 sm:$0xff]   ;;  %v7201_v20 = vld [vmem:[%s11151_s1 + $0x6e0] ss:$16 sps:$4 sm:$0xff]  }
  0x24   :  { %5003 = vmatpush2.bf16.msra.mxu1 %v7155_v35  ;;  %4963 = vmatprep.subr.bf16.mxu0 %v7156_v39  ;;  %v7206_v21 = vld [vmem:[%s11151_s1 + $0x4c4] ss:$16 sps:$4 sm:$0xff]   ;;  %v7204_v24 = vld [vmem:[%s11151_s1 + $0x4c0] ss:$16 sps:$4 sm:$0xff]  }
  0x25   :  { %5004 = vmatprep.subr.bf16.mxu1 %v7158_v40  ;;  %v7209_v22 = vld [vmem:[%s11151_s1 + $0x6c4] ss:$16 sps:$4 sm:$0xff]   ;;  %v7207_v25 = vld [vmem:[%s11151_s1 + $0x6c0] ss:$16 sps:$4 sm:$0xff]  }
  0x26   :  { %v7212_v26 = vld [vmem:[%s11151_s1 + $0x4a4] ss:$16 sps:$4 sm:$0xff]   ;;  %v7210_v28 = vld [vmem:[%s11151_s1 + $0x4a0] ss:$16 sps:$4 sm:$0xff]  }
  0x27   :  { %4964 = vmatpush2.bf16.msra.mxu0 %v7160_v41  ;;  %v7215_v27 = vld [vmem:[%s11151_s1 + $0x6a4] ss:$16 sps:$4 sm:$0xff]   ;;  %v7213_v29 = vld [vmem:[%s11151_s1 + $0x6a0] ss:$16 sps:$4 sm:$0xff]  }
  0x28   :  { %5005 = vmatpush2.bf16.msra.mxu1 %v7161_v44  ;;  %4965 = vmatprep.subr.bf16.mxu0 %v7162_v45  ;;  %v7218_v30 = vld [vmem:[%s11151_s1 + $0x484] ss:$16 sps:$4 sm:$0xff]   ;;  %v7216_v32 = vld [vmem:[%s11151_s1 + $0x480] ss:$16 sps:$4 sm:$0xff]  }
  0x29   :  { %5006 = vmatprep.subr.bf16.mxu1 %v7164_v46  ;;  %v7221_v31 = vld [vmem:[%s11151_s1 + $0x684] ss:$16 sps:$4 sm:$0xff]   ;;  %v7219_v33 = vld [vmem:[%s11151_s1 + $0x680] ss:$16 sps:$4 sm:$0xff]  }
  0x2a   :  { %v7224_v34 = vld [vmem:[%s11151_s1 + $0x464] ss:$16 sps:$4 sm:$0xff]   ;;  %v7222_v36 = vld [vmem:[%s11151_s1 + $0x460] ss:$16 sps:$4 sm:$0xff]  }
  0x2b   :  { %4966 = vmatpush2.bf16.msra.mxu0 %v7166_v47  ;;  %v7227_v35 = vld [vmem:[%s11151_s1 + $0x664] ss:$16 sps:$4 sm:$0xff]   ;;  %v7225_v37 = vld [vmem:[%s11151_s1 + $0x660] ss:$16 sps:$4 sm:$0xff]  }
  0x2c   :  { %5007 = vmatpush2.bf16.msra.mxu1 %v7167_v48  ;;  %4967 = vmatprep.subr.bf16.mxu0 %v7168_v50  ;;  %v7230_v38 = vld [vmem:[%s11151_s1 + $0x444] ss:$16 sps:$4 sm:$0xff]   ;;  %v7228_v40 = vld [vmem:[%s11151_s1 + $0x440] ss:$16 sps:$4 sm:$0xff]  }
  0x2d   :  { %5008 = vmatprep.subr.bf16.mxu1 %v7170_v51  ;;  %v7233_v39 = vld [vmem:[%s11151_s1 + $0x644] ss:$16 sps:$4 sm:$0xff]   ;;  %v7231_v41 = vld [vmem:[%s11151_s1 + $0x640] ss:$16 sps:$4 sm:$0xff]  }
  0x2e   :  { %v7236_v43 = vld [vmem:[%s11151_s1 + $0x424] ss:$16 sps:$4 sm:$0xff]   ;;  %v7234_v45 = vld [vmem:[%s11151_s1 + $0x420] ss:$16 sps:$4 sm:$0xff]  }
  0x2f   :  { %4968 = vmatpush2.bf16.msra.mxu0 %v7172_v53  ;;  %v7239_v44 = vld [vmem:[%s11151_s1 + $0x624] ss:$16 sps:$4 sm:$0xff]   ;;  %v7237_v46 = vld [vmem:[%s11151_s1 + $0x620] ss:$16 sps:$4 sm:$0xff]  }
  0x30   :  { %5009 = vmatpush2.bf16.msra.mxu1 %v7173_v55  ;;  %4969 = vmatprep.subr.bf16.mxu0 %v7174_v56  ;;  %v7242_v47 = vld [vmem:[%s11151_s1 + $0x404] ss:$16 sps:$4 sm:$0xff]   ;;  %v7240_v50 = vld [vmem:[%s11151_s1 + $0x400] ss:$16 sps:$4 sm:$0xff]  }
  0x31   :  { %5010 = vmatprep.subr.bf16.mxu1 %v7176_v57  ;;  %v7245_v48 = vld [vmem:[%s11151_s1 + $0x604] ss:$16 sps:$4 sm:$0xff]   ;;  %v7243_v51 = vld [vmem:[%s11151_s1 + $0x600] ss:$16 sps:$4 sm:$0xff]  }
  0x32   :  { %v7248_v52 = vld [vmem:[%s11151_s1 + $0x5e4] ss:$16 sps:$4 sm:$0xff]   ;;  %v7246_v54 = vld [vmem:[%s11151_s1 + $0x5e0] ss:$16 sps:$4 sm:$0xff]  }
  0x33   :  { %4970 = vmatpush2.bf16.msra.mxu0 %v7178_v59  ;;  %v7251_v53 = vld [vmem:[%s11151_s1 + $0x7e4] ss:$16 sps:$4 sm:$0xff]   ;;  %v7249_v55 = vld [vmem:[%s11151_s1 + $0x7e0] ss:$16 sps:$4 sm:$0xff]  }
  0x34   :  { %5011 = vmatpush2.bf16.msra.mxu1 %v7179_v61  ;;  %4971 = vmatprep.subr.bf16.mxu0 %v7180_v62  ;;  %v7254_v56 = vld [vmem:[%s11151_s1 + $0x5c4] ss:$16 sps:$4 sm:$0xff]   ;;  %v7252_v58 = vld [vmem:[%s11151_s1 + $0x5c0] ss:$16 sps:$4 sm:$0xff]  }
  0x35   :  { %5012 = vmatprep.subr.bf16.mxu1 %v7182_v63  ;;  %v7257_v57 = vld [vmem:[%s11151_s1 + $0x7c4] ss:$16 sps:$4 sm:$0xff]   ;;  %v7255_v59 = vld [vmem:[%s11151_s1 + $0x7c0] ss:$16 sps:$4 sm:$0xff]  }
  0x36   :  { %v7260_v61 = vld [vmem:[%s11151_s1 + $0x5a4] ss:$16 sps:$4 sm:$0xff]   ;;  %v7258_v63 = vld [vmem:[%s11151_s1 + $0x5a0] ss:$16 sps:$4 sm:$0xff]  }
  0x37   :  { %4972 = vmatpush2.bf16.msra.mxu0 %v7184_v2  ;;  %v7263_v62 = vld [vmem:[%s11151_s1 + $0x7a4] ss:$16 sps:$4 sm:$0xff]   ;;  %v7261_v1 = vld [vmem:[%s11151_s1 + $0x7a0] ss:$16 sps:$4 sm:$0xff]  }
  0x38   :  { %5013 = vmatpush2.bf16.msra.mxu1 %v7185_v3  ;;  %4973 = vmatprep.subr.bf16.mxu0 %v7186_v4  ;;  %v7266_v2 = vld [vmem:[%s11151_s1 + $0x584] ss:$16 sps:$4 sm:$0xff]   ;;  %v7264_v4 = vld [vmem:[%s11151_s1 + $0x580] ss:$16 sps:$4 sm:$0xff]  }
  0x39   :  { %5014 = vmatprep.subr.bf16.mxu1 %v7188_v5  ;;  %v7269_v3 = vld [vmem:[%s11151_s1 + $0x784] ss:$16 sps:$4 sm:$0xff]   ;;  %v7267_v5 = vld [vmem:[%s11151_s1 + $0x780] ss:$16 sps:$4 sm:$0xff]  }
  0x3a   :  { %v7278_v11 = vld [vmem:[%s11151_s1 + $0x544] ss:$16 sps:$4 sm:$0xff]  }
  0x3b   :  { %4974 = vmatpush2.bf16.msra.mxu0 %v7190_v7  ;;  %v7272_v7 = vld [vmem:[%s11151_s1 + $0x564] ss:$16 sps:$4 sm:$0xff]  }
  0x3c   :  { %5015 = vmatpush2.bf16.msra.mxu1 %v7191_v8  ;;  %4975 = vmatprep.subr.bf16.mxu0 %v7192_v9  ;;  %v7275_v8 = vld [vmem:[%s11151_s1 + $0x764] ss:$16 sps:$4 sm:$0xff]   ;;  %v7270_v9 = vld [vmem:[%s11151_s1 + $0x560] ss:$16 sps:$4 sm:$0xff]  }
  0x3d   :  { %5016 = vmatprep.subr.bf16.mxu1 %v7194_v10  ;;  %v7273_v10 = vld [vmem:[%s11151_s1 + $0x760] ss:$16 sps:$4 sm:$0xff]  }
  0x3f   :  { %4976 = vmatpush2.bf16.msra.mxu0 %v7196_v12  ;;  %v7281_v12 = vld [vmem:[%s11151_s1 + $0x744] ss:$16 sps:$4 sm:$0xff]  }
  0x40   :  { %5017 = vmatpush2.bf16.msra.mxu1 %v7197_v14  ;;  %5027 = vmatprep.subr.bf16.mxu0 %v7200_v15  ;;  %v7276_v14 = vld [vmem:[%s11151_s1 + $0x540] ss:$16 sps:$4 sm:$0xff]  }
  0x41   :  { %5068 = vmatprep.subr.bf16.mxu1 %v7203_v16  ;;  %v7279_v15 = vld [vmem:[%s11151_s1 + $0x740] ss:$16 sps:$4 sm:$0xff]   ;;  %v7284_v16 = vld [vmem:[%s11151_s1 + $0x524] ss:$16 sps:$4 sm:$0xff]  }
  0x42   :  { %4978 = vmatmul.mubr.bf16.vlgmr.msra.gmra.mxu0 %v8550_v13 }
  0x43   :  { %5019 = vmatmul.mubr.bf16.vlgmr.msra.gmra.mxu1 %v8566_v18  ;;  %5028 = vmatpush1.bf16.msra.mxu0 %v7198_v19  ;;  %v7287_v19 = vld [vmem:[%s11151_s1 + $0x724] ss:$16 sps:$4 sm:$0xff]  }
  0x44   :  { %5069 = vmatpush1.bf16.msra.mxu1 %v7201_v20  ;;  %5029 = vmatprep.subr.bf16.mxu0 %v7206_v21  ;;  %v7282_v20 = vld [vmem:[%s11151_s1 + $0x520] ss:$16 sps:$4 sm:$0xff]  }
  0x45   :  { %5070 = vmatprep.subr.bf16.mxu1 %v7209_v22  ;;  %5059 = vmatprep.mubr.bf16.mxu0 %v8562_v17  ;;  %v7285_v21 = vld [vmem:[%s11151_s1 + $0x720] ss:$16 sps:$4 sm:$0xff]   ;;  %v7290_v22 = vld [vmem:[%s11151_s1 + $0x504] ss:$16 sps:$4 sm:$0xff]  }
  0x46   :  { %5100 = vmatprep.mubr.bf16.mxu1 %v8582_v23 }
  0x47   :  { %5030 = vmatpush1.bf16.msra.mxu0 %v7204_v24  ;;  %v7293_v24 = vld [vmem:[%s11151_s1 + $0x704] ss:$16 sps:$4 sm:$0xff]  }
  0x48   :  { %5071 = vmatpush1.bf16.msra.mxu1 %v7207_v25  ;;  %5031 = vmatprep.subr.bf16.mxu0 %v7212_v26  ;;  %v7288_v25 = vld [vmem:[%s11151_s1 + $0x500] ss:$16 sps:$4 sm:$0xff]   ;;  %v8761_v26 = vrot.slane %v8530_v6, %v8472_v49 }
  0x49   :  { %5072 = vmatprep.subr.bf16.mxu1 %v7215_v27  ;;  %v7291_v27 = vld [vmem:[%s11151_s1 + $0x700] ss:$16 sps:$4 sm:$0xff]  }
  0x4a   :  { %v8774_v6 = vcombine.high %v8761_v26, %v8761_v26 }
  0x4b   :  { %5032 = vmatpush1.bf16.msra.mxu0 %v7210_v28  ;;  %v7297_v28 = vld [vmem:[%s11151_s1 + $0x8e4] ss:$16 sps:$4 sm:$0xff]  }
  0x4c   :  { %5073 = vmatpush1.bf16.msra.mxu1 %v7213_v29  ;;  %5033 = vmatprep.subr.bf16.mxu0 %v7218_v30  ;;  %v7300_v29 = vld [vmem:[%s11151_s1 + $0xae4] ss:$16 sps:$4 sm:$0xff]   ;;  %v7295_v30 = vld [vmem:[%s11151_s1 + $0x8e0] ss:$16 sps:$4 sm:$0xff]  }
  0x4d   :  { %5074 = vmatprep.subr.bf16.mxu1 %v7221_v31  ;;  %v7298_v31 = vld [vmem:[%s11151_s1 + $0xae0] ss:$16 sps:$4 sm:$0xff]  }
  0x4f   :  { %5034 = vmatpush1.bf16.msra.mxu0 %v7216_v32  ;;  %v8785_v32 = vld [vmem:[%s11150_s0 + $0x8] sm:$0xff] }
  0x50   :  { %5075 = vmatpush1.bf16.msra.mxu1 %v7219_v33  ;;  %5035 = vmatprep.subr.bf16.mxu0 %v7224_v34  ;;  %v7303_v33 = vld [vmem:[%s11151_s1 + $0x8c4] ss:$16 sps:$4 sm:$0xff]  }
  0x51   :  { %5076 = vmatprep.subr.bf16.mxu1 %v7227_v35  ;;  %v7306_v34 = vld [vmem:[%s11151_s1 + $0xac4] ss:$16 sps:$4 sm:$0xff]   ;;  %v8795_v35 = vrot.slane %v8785_v32, %v8472_v49 }
  0x53   :  { %5036 = vmatpush1.bf16.msra.mxu0 %v7222_v36  ;;  %v900_v36 = vcombine.high %v8795_v35, %v8795_v35 }
  0x54   :  { %5077 = vmatpush1.bf16.msra.mxu1 %v7225_v37  ;;  %5037 = vmatprep.subr.bf16.mxu0 %v7230_v38  ;;  %v7301_v37 = vld [vmem:[%s11151_s1 + $0x8c0] ss:$16 sps:$4 sm:$0xff]  }
  0x55   :  { %5078 = vmatprep.subr.bf16.mxu1 %v7233_v39  ;;  %v7304_v38 = vld [vmem:[%s11151_s1 + $0xac0] ss:$16 sps:$4 sm:$0xff]   ;;  %v7309_v39 = vld [vmem:[%s11151_s1 + $0x8a4] ss:$16 sps:$4 sm:$0xff]  }
  0x57   :  { %5038 = vmatpush1.bf16.msra.mxu0 %v7228_v40  ;;  %v7312_v40 = vld [vmem:[%s11151_s1 + $0xaa4] ss:$16 sps:$4 sm:$0xff]  }
  0x58   :  { %5079 = vmatpush1.bf16.msra.mxu1 %v7231_v41  ;;  %5039 = vmatprep.subr.bf16.mxu0 %v7236_v43  ;;  %v8814_v41 = vrot.slane %v900_v36, %v8472_v49  ;;  %v7373_v36 = vld [vmem:[%s11151_s1 + $0x940] ss:$16 sps:$4 sm:$0xff]  }
  0x59   :  { %5080 = vmatprep.subr.bf16.mxu1 %v7239_v44  ;;  %v7307_v44 = vld [vmem:[%s11151_s1 + $0x8a0] ss:$16 sps:$4 sm:$0xff]  }
  0x5a   :  { %v8819_v43 = vcombine.high %v8814_v41, %v8814_v41 }
  0x5b   :  { %5040 = vmatpush1.bf16.msra.mxu0 %v7234_v45  ;;  %v7310_v45 = vld [vmem:[%s11151_s1 + $0xaa0] ss:$16 sps:$4 sm:$0xff]  }
  0x5c   :  { %5081 = vmatpush1.bf16.msra.mxu1 %v7237_v46  ;;  %5041 = vmatprep.subr.bf16.mxu0 %v7242_v47  ;;  %v7315_v46 = vld [vmem:[%s11151_s1 + $0x884] ss:$16 sps:$4 sm:$0xff]  }
  0x5d   :  { %5082 = vmatprep.subr.bf16.mxu1 %v7245_v48  ;;  %v7318_v47 = vld [vmem:[%s11151_s1 + $0xa84] ss:$16 sps:$4 sm:$0xff]   ;;  %v7313_v48 = vld [vmem:[%s11151_s1 + $0x880] ss:$16 sps:$4 sm:$0xff]  }
  0x5f   :  { %5042 = vmatpush1.bf16.msra.mxu0 %v7240_v50  ;;  %v7316_v50 = vld [vmem:[%s11151_s1 + $0xa80] ss:$16 sps:$4 sm:$0xff]  }
  0x60   :  { %5083 = vmatpush1.bf16.msra.mxu1 %v7243_v51  ;;  %5043 = vmatprep.subr.bf16.mxu0 %v7248_v52  ;;  %v7321_v51 = vld [vmem:[%s11151_s1 + $0x864] ss:$16 sps:$4 sm:$0xff]  }
  0x61   :  { %5084 = vmatprep.subr.bf16.mxu1 %v7251_v53  ;;  %v7324_v52 = vld [vmem:[%s11151_s1 + $0xa64] ss:$16 sps:$4 sm:$0xff]   ;;  %v7319_v53 = vld [vmem:[%s11151_s1 + $0x860] ss:$16 sps:$4 sm:$0xff]  }
  0x63   :  { %5044 = vmatpush2.bf16.msra.mxu0 %v7246_v54  ;;  %v7322_v54 = vld [vmem:[%s11151_s1 + $0xa60] ss:$16 sps:$4 sm:$0xff]  }
  0x64   :  { %5085 = vmatpush2.bf16.msra.mxu1 %v7249_v55  ;;  %5045 = vmatprep.subr.bf16.mxu0 %v7254_v56  ;;  %v7327_v55 = vld [vmem:[%s11151_s1 + $0x844] ss:$16 sps:$4 sm:$0xff]  }
  0x65   :  { %5086 = vmatprep.subr.bf16.mxu1 %v7257_v57  ;;  %v7330_v56 = vld [vmem:[%s11151_s1 + $0xa44] ss:$16 sps:$4 sm:$0xff]   ;;  %v7325_v57 = vld [vmem:[%s11151_s1 + $0x840] ss:$16 sps:$4 sm:$0xff]  }
  0x67   :  { %5046 = vmatpush2.bf16.msra.mxu0 %v7252_v58  ;;  %v7328_v58 = vld [vmem:[%s11151_s1 + $0xa40] ss:$16 sps:$4 sm:$0xff]  }
  0x68   :  { %5087 = vmatpush2.bf16.msra.mxu1 %v7255_v59  ;;  %5047 = vmatprep.subr.bf16.mxu0 %v7260_v61  ;;  %v7333_v59 = vld [vmem:[%s11151_s1 + $0x824] ss:$16 sps:$4 sm:$0xff]  }
  0x69   :  { %5088 = vmatprep.subr.bf16.mxu1 %v7263_v62  ;;  %v7336_v61 = vld [vmem:[%s11151_s1 + $0xa24] ss:$16 sps:$4 sm:$0xff]   ;;  %v7331_v62 = vld [vmem:[%s11151_s1 + $0x820] ss:$16 sps:$4 sm:$0xff]  }
  0x6b   :  { %5048 = vmatpush2.bf16.msra.mxu0 %v7258_v63  ;;  %v7334_v63 = vld [vmem:[%s11151_s1 + $0xa20] ss:$16 sps:$4 sm:$0xff]  }
  0x6c   :  { %5089 = vmatpush2.bf16.msra.mxu1 %v7261_v1  ;;  %5049 = vmatprep.subr.bf16.mxu0 %v7266_v2  ;;  %v7339_v1 = vld [vmem:[%s11151_s1 + $0x804] ss:$16 sps:$4 sm:$0xff]  }
  0x6d   :  { %5090 = vmatprep.subr.bf16.mxu1 %v7269_v3  ;;  %v7342_v2 = vld [vmem:[%s11151_s1 + $0xa04] ss:$16 sps:$4 sm:$0xff]   ;;  %v7337_v3 = vld [vmem:[%s11151_s1 + $0x800] ss:$16 sps:$4 sm:$0xff]  }
  0x6f   :  { %5050 = vmatpush2.bf16.msra.mxu0 %v7264_v4  ;;  %v7340_v4 = vld [vmem:[%s11151_s1 + $0xa00] ss:$16 sps:$4 sm:$0xff]  }
  0x70   :  { %5091 = vmatpush2.bf16.msra.mxu1 %v7267_v5  ;;  %5051 = vmatprep.subr.bf16.mxu0 %v7272_v7  ;;  %v7345_v5 = vld [vmem:[%s11151_s1 + $0x9e4] ss:$16 sps:$4 sm:$0xff]  }
  0x71   :  { %5092 = vmatprep.subr.bf16.mxu1 %v7275_v8  ;;  %v7348_v7 = vld [vmem:[%s11151_s1 + $0xbe4] ss:$16 sps:$4 sm:$0xff]   ;;  %v7343_v8 = vld [vmem:[%s11151_s1 + $0x9e0] ss:$16 sps:$4 sm:$0xff]  }
  0x73   :  { %5052 = vmatpush2.bf16.msra.mxu0 %v7270_v9  ;;  %v7346_v9 = vld [vmem:[%s11151_s1 + $0xbe0] ss:$16 sps:$4 sm:$0xff]  }
  0x74   :  { %5093 = vmatpush2.bf16.msra.mxu1 %v7273_v10  ;;  %5053 = vmatprep.subr.bf16.mxu0 %v7278_v11  ;;  %v7351_v10 = vld [vmem:[%s11151_s1 + $0x9c4] ss:$16 sps:$4 sm:$0xff]  }
  0x75   :  { %5094 = vmatprep.subr.bf16.mxu1 %v7281_v12  ;;  %v7354_v11 = vld [vmem:[%s11151_s1 + $0xbc4] ss:$16 sps:$4 sm:$0xff]   ;;  %v7349_v12 = vld [vmem:[%s11151_s1 + $0x9c0] ss:$16 sps:$4 sm:$0xff]  }
  0x77   :  { %5054 = vmatpush2.bf16.msra.mxu0 %v7276_v14  ;;  %v7352_v14 = vld [vmem:[%s11151_s1 + $0xbc0] ss:$16 sps:$4 sm:$0xff]  }
  0x78   :  { %5095 = vmatpush2.bf16.msra.mxu1 %v7279_v15  ;;  %5055 = vmatprep.subr.bf16.mxu0 %v7284_v16  ;;  %v7357_v15 = vld [vmem:[%s11151_s1 + $0x9a4] ss:$16 sps:$4 sm:$0xff]  }
  0x79   :  { %5096 = vmatprep.subr.bf16.mxu1 %v7287_v19  ;;  %v7360_v16 = vld [vmem:[%s11151_s1 + $0xba4] ss:$16 sps:$4 sm:$0xff]   ;;  %v7355_v19 = vld [vmem:[%s11151_s1 + $0x9a0] ss:$16 sps:$4 sm:$0xff]  }
  0x7b   :  { %5056 = vmatpush2.bf16.msra.mxu0 %v7282_v20  ;;  %v7358_v20 = vld [vmem:[%s11151_s1 + $0xba0] ss:$16 sps:$4 sm:$0xff]  }
  0x7c   :  { %5097 = vmatpush2.bf16.msra.mxu1 %v7285_v21  ;;  %5057 = vmatprep.subr.bf16.mxu0 %v7290_v22  ;;  %v7363_v21 = vld [vmem:[%s11151_s1 + $0x984] ss:$16 sps:$4 sm:$0xff]  }
  0x7d   :  { %5098 = vmatprep.subr.bf16.mxu1 %v7293_v24  ;;  %v7366_v22 = vld [vmem:[%s11151_s1 + $0xb84] ss:$16 sps:$4 sm:$0xff]   ;;  %v7361_v24 = vld [vmem:[%s11151_s1 + $0x980] ss:$16 sps:$4 sm:$0xff]  }
  0x7f   :  { %5058 = vmatpush2.bf16.msra.mxu0 %v7288_v25  ;;  %v7364_v25 = vld [vmem:[%s11151_s1 + $0xb80] ss:$16 sps:$4 sm:$0xff]  }
  0x80   :  { %5099 = vmatpush2.bf16.msra.mxu1 %v7291_v27  ;;  %5109 = vmatprep.subr.bf16.mxu0 %v7297_v28  ;;  %v7369_v27 = vld [vmem:[%s11151_s1 + $0x964] ss:$16 sps:$4 sm:$0xff]  }
  0x81   :  { %5150 = vmatprep.subr.bf16.mxu1 %v7300_v29  ;;  %v7372_v28 = vld [vmem:[%s11151_s1 + $0xb64] ss:$16 sps:$4 sm:$0xff]   ;;  %v7367_v29 = vld [vmem:[%s11151_s1 + $0x960] ss:$16 sps:$4 sm:$0xff]  }
  0x82   :  { %5060 = vmatmul.mubr.bf16.vlgmr.msra.gmra.mxu0 %v8761_v26 }
  0x83   :  { %5101 = vmatmul.mubr.bf16.vlgmr.msra.gmra.mxu1 %v8774_v6  ;;  %5110 = vmatpush1.bf16.msra.mxu0 %v7295_v30  ;;  %v7370_v30 = vld [vmem:[%s11151_s1 + $0xb60] ss:$16 sps:$4 sm:$0xff]  }
  0x84   :  { %5151 = vmatpush1.bf16.msra.mxu1 %v7298_v31  ;;  %5111 = vmatprep.subr.bf16.mxu0 %v7303_v33  ;;  %v7375_v31 = vld [vmem:[%s11151_s1 + $0x944] ss:$16 sps:$4 sm:$0xff]  }
  0x85   :  { %5152 = vmatprep.subr.bf16.mxu1 %v7306_v34  ;;  %5141 = vmatprep.mubr.bf16.mxu0 %v8814_v41  ;;  %v7378_v33 = vld [vmem:[%s11151_s1 + $0xb44] ss:$16 sps:$4 sm:$0xff]   ;;  %v885_v34 = vcombine.high %v8785_v32, %v8785_v32 }
  0x86   :  { %5182 = vmatprep.mubr.bf16.mxu1 %v8819_v43  ;;  %v7384_v32 = vld [vmem:[%s11151_s1 + $0xb24] ss:$16 sps:$4 sm:$0xff]  }
  0x87   :  { %5112 = vmatpush1.bf16.msra.mxu0 %v7301_v37  ;;  %v7376_v37 = vld [vmem:[%s11151_s1 + $0xb40] ss:$16 sps:$4 sm:$0xff]  }
  0x88   :  { %5153 = vmatpush1.bf16.msra.mxu1 %v7304_v38  ;;  %5113 = vmatprep.subr.bf16.mxu0 %v7309_v39  ;;  %v7381_v38 = vld [vmem:[%s11151_s1 + $0x924] ss:$16 sps:$4 sm:$0xff]   ;;  %v8969_v39 = vrot.slane %v885_v34, %v8472_v49  ;;  %v7442_v34 = vld [vmem:[%s11151_s1 + $0xfe0] ss:$16 sps:$4 sm:$0xff]  }
  0x89   :  { %5154 = vmatprep.subr.bf16.mxu1 %v7312_v40  ;;  %v7379_v40 = vld [vmem:[%s11151_s1 + $0x920] ss:$16 sps:$4 sm:$0xff]  }
  0x8b   :  { %5114 = vmatpush1.bf16.msra.mxu0 %v7307_v44  ;;  %v7382_v44 = vld [vmem:[%s11151_s1 + $0xb20] ss:$16 sps:$4 sm:$0xff]  }
  0x8c   :  { %5155 = vmatpush1.bf16.msra.mxu1 %v7310_v45  ;;  %5115 = vmatprep.subr.bf16.mxu0 %v7315_v46  ;;  %v7387_v45 = vld [vmem:[%s11151_s1 + $0x904] ss:$16 sps:$4 sm:$0xff]  }
  0x8d   :  { %5156 = vmatprep.subr.bf16.mxu1 %v7318_v47  ;;  %v7390_v46 = vld [vmem:[%s11151_s1 + $0xb04] ss:$16 sps:$4 sm:$0xff]   ;;  %v901_v47 = vcombine.high %v8969_v39, %v8969_v39 }
  0x8f   :  { %5116 = vmatpush1.bf16.msra.mxu0 %v7313_v48  ;;  %v7385_v48 = vld [vmem:[%s11151_s1 + $0x900] ss:$16 sps:$4 sm:$0xff]  }
  0x90   :  { %5157 = vmatpush1.bf16.msra.mxu1 %v7316_v50  ;;  %5117 = vmatprep.subr.bf16.mxu0 %v7321_v51  ;;  %v8990_v50 = vrot.slane %v8795_v35, %v8472_v49  ;;  %v7388_v51 = vld [vmem:[%s11151_s1 + $0xb00] ss:$16 sps:$4 sm:$0xff]  }
  0x91   :  { %5158 = vmatprep.subr.bf16.mxu1 %v7324_v52  ;;  %v7393_v52 = vld [vmem:[%s11151_s1 + $0xce4] ss:$16 sps:$4 sm:$0xff]  }
  0x92   :  { %v9006_v35 = vcombine.high %v8990_v50, %v8990_v50 }
  0x93   :  { %5118 = vmatpush1.bf16.msra.mxu0 %v7319_v53  ;;  %v7396_v53 = vld [vmem:[%s11151_s1 + $0xee4] ss:$16 sps:$4 sm:$0xff]  }
  0x94   :  { %5159 = vmatpush1.bf16.msra.mxu1 %v7322_v54  ;;  %5119 = vmatprep.subr.bf16.mxu0 %v7327_v55  ;;  %v9002_v54 = vrot.slane %v901_v47, %v8472_v49  ;;  %v7391_v55 = vld [vmem:[%s11151_s1 + $0xce0] ss:$16 sps:$4 sm:$0xff]   ;;  %v7459_v47 = vld [vmem:[%s11151_s1 + $0xd84] ss:$16 sps:$4 sm:$0xff]  }
  0x95   :  { %5160 = vmatprep.subr.bf16.mxu1 %v7330_v56  ;;  %v7394_v56 = vld [vmem:[%s11151_s1 + $0xee0] ss:$16 sps:$4 sm:$0xff]  }
  0x97   :  { %5120 = vmatpush1.bf16.msra.mxu0 %v7325_v57  ;;  %v7399_v57 = vld [vmem:[%s11151_s1 + $0xcc4] ss:$16 sps:$4 sm:$0xff]  }
  0x98   :  { %5161 = vmatpush1.bf16.msra.mxu1 %v7328_v58  ;;  %5121 = vmatprep.subr.bf16.mxu0 %v7333_v59  ;;  %v7402_v58 = vld [vmem:[%s11151_s1 + $0xec4] ss:$16 sps:$4 sm:$0xff]   ;;  %v9022_v59 = vcombine.high %v9002_v54, %v9002_v54 }
  0x99   :  { %5162 = vmatprep.subr.bf16.mxu1 %v7336_v61  ;;  %v7397_v61 = vld [vmem:[%s11151_s1 + $0xcc0] ss:$16 sps:$4 sm:$0xff]  }
  0x9b   :  { %5122 = vmatpush1.bf16.msra.mxu0 %v7331_v62  ;;  %v7400_v62 = vld [vmem:[%s11151_s1 + $0xec0] ss:$16 sps:$4 sm:$0xff]  }
  0x9c   :  { %5163 = vmatpush1.bf16.msra.mxu1 %v7334_v63  ;;  %5123 = vmatprep.subr.bf16.mxu0 %v7339_v1  ;;  %v7405_v63 = vld [vmem:[%s11151_s1 + $0xca4] ss:$16 sps:$4 sm:$0xff]  }
  0x9d   :  { %5164 = vmatprep.subr.bf16.mxu1 %v7342_v2  ;;  %v7408_v1 = vld [vmem:[%s11151_s1 + $0xea4] ss:$16 sps:$4 sm:$0xff]   ;;  %v7403_v2 = vld [vmem:[%s11151_s1 + $0xca0] ss:$16 sps:$4 sm:$0xff]  }
  0x9f   :  { %5124 = vmatpush1.bf16.msra.mxu0 %v7337_v3  ;;  %v7406_v3 = vld [vmem:[%s11151_s1 + $0xea0] ss:$16 sps:$4 sm:$0xff]  }
  0xa0   :  { %5165 = vmatpush1.bf16.msra.mxu1 %v7340_v4  ;;  %5125 = vmatprep.subr.bf16.mxu0 %v7345_v5  ;;  %v7411_v4 = vld [vmem:[%s11151_s1 + $0xc84] ss:$16 sps:$4 sm:$0xff]  }
  0xa1   :  { %5166 = vmatprep.subr.bf16.mxu1 %v7348_v7  ;;  %v7414_v5 = vld [vmem:[%s11151_s1 + $0xe84] ss:$16 sps:$4 sm:$0xff]   ;;  %v7409_v7 = vld [vmem:[%s11151_s1 + $0xc80] ss:$16 sps:$4 sm:$0xff]  }
  0xa3   :  { %5126 = vmatpush2.bf16.msra.mxu0 %v7343_v8  ;;  %v7412_v8 = vld [vmem:[%s11151_s1 + $0xe80] ss:$16 sps:$4 sm:$0xff]  }
  0xa4   :  { %5167 = vmatpush2.bf16.msra.mxu1 %v7346_v9  ;;  %5127 = vmatprep.subr.bf16.mxu0 %v7351_v10  ;;  %v7417_v9 = vld [vmem:[%s11151_s1 + $0xc64] ss:$16 sps:$4 sm:$0xff]  }
  0xa5   :  { %5168 = vmatprep.subr.bf16.mxu1 %v7354_v11  ;;  %v7420_v10 = vld [vmem:[%s11151_s1 + $0xe64] ss:$16 sps:$4 sm:$0xff]   ;;  %v7415_v11 = vld [vmem:[%s11151_s1 + $0xc60] ss:$16 sps:$4 sm:$0xff]  }
  0xa7   :  { %5128 = vmatpush2.bf16.msra.mxu0 %v7349_v12  ;;  %v7418_v12 = vld [vmem:[%s11151_s1 + $0xe60] ss:$16 sps:$4 sm:$0xff]  }
  0xa8   :  { %5169 = vmatpush2.bf16.msra.mxu1 %v7352_v14  ;;  %5129 = vmatprep.subr.bf16.mxu0 %v7357_v15  ;;  %v7423_v14 = vld [vmem:[%s11151_s1 + $0xc44] ss:$16 sps:$4 sm:$0xff]  }
  0xa9   :  { %5170 = vmatprep.subr.bf16.mxu1 %v7360_v16  ;;  %v7426_v15 = vld [vmem:[%s11151_s1 + $0xe44] ss:$16 sps:$4 sm:$0xff]   ;;  %v7421_v16 = vld [vmem:[%s11151_s1 + $0xc40] ss:$16 sps:$4 sm:$0xff]  }
  0xab   :  { %5130 = vmatpush2.bf16.msra.mxu0 %v7355_v19  ;;  %v7424_v19 = vld [vmem:[%s11151_s1 + $0xe40] ss:$16 sps:$4 sm:$0xff]  }
  0xac   :  { %5171 = vmatpush2.bf16.msra.mxu1 %v7358_v20  ;;  %5131 = vmatprep.subr.bf16.mxu0 %v7363_v21  ;;  %v7429_v20 = vld [vmem:[%s11151_s1 + $0xc24] ss:$16 sps:$4 sm:$0xff]  }
  0xad   :  { %5172 = vmatprep.subr.bf16.mxu1 %v7366_v22  ;;  %v7432_v21 = vld [vmem:[%s11151_s1 + $0xe24] ss:$16 sps:$4 sm:$0xff]   ;;  %v7427_v22 = vld [vmem:[%s11151_s1 + $0xc20] ss:$16 sps:$4 sm:$0xff]  }
  0xaf   :  { %5132 = vmatpush2.bf16.msra.mxu0 %v7361_v24  ;;  %v7430_v24 = vld [vmem:[%s11151_s1 + $0xe20] ss:$16 sps:$4 sm:$0xff]  }
  0xb0   :  { %5173 = vmatpush2.bf16.msra.mxu1 %v7364_v25  ;;  %5133 = vmatprep.subr.bf16.mxu0 %v7369_v27  ;;  %v7435_v25 = vld [vmem:[%s11151_s1 + $0xc04] ss:$16 sps:$4 sm:$0xff]  }
  0xb1   :  { %5174 = vmatprep.subr.bf16.mxu1 %v7372_v28  ;;  %v7438_v27 = vld [vmem:[%s11151_s1 + $0xe04] ss:$16 sps:$4 sm:$0xff]   ;;  %v7433_v28 = vld [vmem:[%s11151_s1 + $0xc00] ss:$16 sps:$4 sm:$0xff]  }
  0xb3   :  { %5134 = vmatpush2.bf16.msra.mxu0 %v7367_v29  ;;  %v7436_v29 = vld [vmem:[%s11151_s1 + $0xe00] ss:$16 sps:$4 sm:$0xff]  }
  0xb4   :  { %5175 = vmatpush2.bf16.msra.mxu1 %v7370_v30  ;;  %5135 = vmatprep.subr.bf16.mxu0 %v7375_v31  ;;  %v7441_v30 = vld [vmem:[%s11151_s1 + $0xde4] ss:$16 sps:$4 sm:$0xff]  }
  0xb5   :  { %5176 = vmatprep.subr.bf16.mxu1 %v7378_v33  ;;  %v7444_v31 = vld [vmem:[%s11151_s1 + $0xfe4] ss:$16 sps:$4 sm:$0xff]   ;;  %v7439_v33 = vld [vmem:[%s11151_s1 + $0xde0] ss:$16 sps:$4 sm:$0xff]  }
  0xb7   :  { %5136 = vmatpush2.bf16.msra.mxu0 %v7373_v36  ;;  %v7447_v36 = vld [vmem:[%s11151_s1 + $0xdc4] ss:$16 sps:$4 sm:$0xff]  }
  0xb8   :  { %5177 = vmatpush2.bf16.msra.mxu1 %v7376_v37  ;;  %5137 = vmatprep.subr.bf16.mxu0 %v7381_v38  ;;  %v7450_v37 = vld [vmem:[%s11151_s1 + $0xfc4] ss:$16 sps:$4 sm:$0xff]   ;;  %v7445_v38 = vld [vmem:[%s11151_s1 + $0xdc0] ss:$16 sps:$4 sm:$0xff]  }
  0xb9   :  { %5178 = vmatprep.subr.bf16.mxu1 %v7384_v32  ;;  %v7448_v32 = vld [vmem:[%s11151_s1 + $0xfc0] ss:$16 sps:$4 sm:$0xff]  }
  0xbb   :  { %5138 = vmatpush2.bf16.msra.mxu0 %v7379_v40  ;;  %v7453_v40 = vld [vmem:[%s11151_s1 + $0xda4] ss:$16 sps:$4 sm:$0xff]  }
  0xbc   :  { %5179 = vmatpush2.bf16.msra.mxu1 %v7382_v44  ;;  %5139 = vmatprep.subr.bf16.mxu0 %v7387_v45  ;;  %v7456_v44 = vld [vmem:[%s11151_s1 + $0xfa4] ss:$16 sps:$4 sm:$0xff]   ;;  %v7451_v45 = vld [vmem:[%s11151_s1 + $0xda0] ss:$16 sps:$4 sm:$0xff]  }
  0xbd   :  { %5180 = vmatprep.subr.bf16.mxu1 %v7390_v46  ;;  %v7454_v46 = vld [vmem:[%s11151_s1 + $0xfa0] ss:$16 sps:$4 sm:$0xff]  }
  0xbf   :  { %5140 = vmatpush2.bf16.msra.mxu0 %v7385_v48  ;;  %v7462_v48 = vld [vmem:[%s11151_s1 + $0xf84] ss:$16 sps:$4 sm:$0xff]  }
  0xc0   :  { %5181 = vmatpush2.bf16.msra.mxu1 %v7388_v51  ;;  %5191 = vmatprep.subr.bf16.mxu0 %v7393_v52  ;;  %v7457_v51 = vld [vmem:[%s11151_s1 + $0xd80] ss:$16 sps:$4 sm:$0xff]  }
  0xc1   :  { %5232 = vmatprep.subr.bf16.mxu1 %v7396_v53  ;;  %v7460_v52 = vld [vmem:[%s11151_s1 + $0xf80] ss:$16 sps:$4 sm:$0xff]   ;;  %v7465_v53 = vld [vmem:[%s11151_s1 + $0xd64] ss:$16 sps:$4 sm:$0xff]  }
  0xc2   :  { %5142 = vmatmul.mubr.bf16.vlgmr.msra.gmra.mxu0 %v8990_v50 }
  0xc3   :  { %5183 = vmatmul.mubr.bf16.vlgmr.msra.gmra.mxu1 %v9006_v35  ;;  %5192 = vmatpush1.bf16.msra.mxu0 %v7391_v55  ;;  %v7468_v55 = vld [vmem:[%s11151_s1 + $0xf64] ss:$16 sps:$4 sm:$0xff]  }
  0xc4   :  { %5233 = vmatpush1.bf16.msra.mxu1 %v7394_v56  ;;  %5193 = vmatprep.subr.bf16.mxu0 %v7399_v57  ;;  %v7463_v56 = vld [vmem:[%s11151_s1 + $0xd60] ss:$16 sps:$4 sm:$0xff]  }
  0xc5   :  { %5234 = vmatprep.subr.bf16.mxu1 %v7402_v58  ;;  %5223 = vmatprep.mubr.bf16.mxu0 %v9002_v54  ;;  %v7466_v57 = vld [vmem:[%s11151_s1 + $0xf60] ss:$16 sps:$4 sm:$0xff]   ;;  %v7471_v58 = vld [vmem:[%s11151_s1 + $0xd44] ss:$16 sps:$4 sm:$0xff]  }
  0xc6   :  { %5264 = vmatprep.mubr.bf16.mxu1 %v9022_v59 }
  0xc7   :  { %5194 = vmatpush1.bf16.msra.mxu0 %v7397_v61  ;;  %v7474_v61 = vld [vmem:[%s11151_s1 + $0xf44] ss:$16 sps:$4 sm:$0xff]  }
  0xc8   :  { %5235 = vmatpush1.bf16.msra.mxu1 %v7400_v62  ;;  %5195 = vmatprep.subr.bf16.mxu0 %v7405_v63  ;;  %v7469_v62 = vld [vmem:[%s11151_s1 + $0xd40] ss:$16 sps:$4 sm:$0xff]  }
  0xc9   :  { %5236 = vmatprep.subr.bf16.mxu1 %v7408_v1  ;;  %v7472_v63 = vld [vmem:[%s11151_s1 + $0xf40] ss:$16 sps:$4 sm:$0xff]  }
  0xca   :  { %v9181_v1 = vld [vmem:[%s11150_s0 + $0x10] sm:$0xff] }
  0xcb   :  { %5196 = vmatpush1.bf16.msra.mxu0 %v7403_v2  ;;  %v7477_v2 = vld [vmem:[%s11151_s1 + $0xd24] ss:$16 sps:$4 sm:$0xff]  }
  0xcc   :  { %5237 = vmatpush1.bf16.msra.mxu1 %v7406_v3  ;;  %5197 = vmatprep.subr.bf16.mxu0 %v7411_v4  ;;  %v7480_v3 = vld [vmem:[%s11151_s1 + $0xf24] ss:$16 sps:$4 sm:$0xff]   ;;  %v9191_v4 = vrot.slane %v9181_v1, %v8472_v49 }
  0xcd   :  { %5238 = vmatprep.subr.bf16.mxu1 %v7414_v5  ;;  %v7475_v5 = vld [vmem:[%s11151_s1 + $0xd20] ss:$16 sps:$4 sm:$0xff]  }
  0xcf   :  { %5198 = vmatpush1.bf16.msra.mxu0 %v7409_v7  ;;  %v7478_v7 = vld [vmem:[%s11151_s1 + $0xf20] ss:$16 sps:$4 sm:$0xff]  }
  0xd0   :  { %5239 = vmatpush1.bf16.msra.mxu1 %v7412_v8  ;;  %5199 = vmatprep.subr.bf16.mxu0 %v7417_v9  ;;  %v7483_v8 = vld [vmem:[%s11151_s1 + $0xd04] ss:$16 sps:$4 sm:$0xff]  }
  0xd1   :  { %5240 = vmatprep.subr.bf16.mxu1 %v7420_v10  ;;  %v7486_v9 = vld [vmem:[%s11151_s1 + $0xf04] ss:$16 sps:$4 sm:$0xff]   ;;  %v7481_v10 = vld [vmem:[%s11151_s1 + $0xd00] ss:$16 sps:$4 sm:$0xff]  }
  0xd3   :  { %5200 = vmatpush1.bf16.msra.mxu0 %v7415_v11  ;;  %v949_v11 = vcombine.high %v9191_v4, %v9191_v4 }
  0xd4   :  { %5241 = vmatpush1.bf16.msra.mxu1 %v7418_v12  ;;  %5201 = vmatprep.subr.bf16.mxu0 %v7423_v14  ;;  %v7484_v12 = vld [vmem:[%s11151_s1 + $0xf00] ss:$16 sps:$4 sm:$0xff]  }
  0xd5   :  { %5242 = vmatprep.subr.bf16.mxu1 %v7426_v15  ;;  %v810_v14 = vld [vmem:[%s11152_s2] sm:$0xf]  ;;  %v9218_v15 = vrot.slane %v8969_v39, %v8472_v49 }
  0xd7   :  { %5202 = vmatpush1.bf16.msra.mxu0 %v7421_v16  ;;  %v814_v16 = vsub.s32 0, %v8454_v42  ;;  %v9233_v39 = vcombine.high %v9218_v15, %v9218_v15 }
  0xd8   :  { %5243 = vmatpush1.bf16.msra.mxu1 %v7424_v19  ;;  %5203 = vmatprep.subr.bf16.mxu0 %v7429_v20  ;;  %v7490_v19 = vld [vmem:[%s11151_s1 + $0x10e4] ss:$16 sps:$4 sm:$0xff]  }
  0xd9   :  { %5244 = vmatprep.subr.bf16.mxu1 %v7432_v21  ;;  %v7493_v20 = vld [vmem:[%s11151_s1 + $0x12e4] ss:$16 sps:$4 sm:$0xff]   ;;  %v818_v21 = vsub.s32 1, %v8454_v42 }
  0xdb   :  { %5204 = vmatpush1.bf16.msra.mxu0 %v7427_v22  ;;  %v9229_v22 = vrot.slane %v949_v11, %v8472_v49  ;;  %v7521_v11 = vld [vmem:[%s11151_s1 + $0x1240] ss:$16 sps:$4 sm:$0xff]  }
  0xdc   :  { %5245 = vmatpush1.bf16.msra.mxu1 %v7430_v24  ;;  %5205 = vmatprep.subr.bf16.mxu0 %v7435_v25  ;;  %v7488_v24 = vld [vmem:[%s11151_s1 + $0x10e0] ss:$16 sps:$4 sm:$0xff]  }
  0xdd   :  { %5246 = vmatprep.subr.bf16.mxu1 %v7438_v27  ;;  %v7491_v25 = vld [vmem:[%s11151_s1 + $0x12e0] ss:$16 sps:$4 sm:$0xff]   ;;  %v815_v27 = vrot.slane %v810_v14, %v814_v16 }
  0xde   :  { %v7524_v16 = vld [vmem:[%s11151_s1 + $0x1020] ss:$16 sps:$4 sm:$0xff]  }
  0xdf   :  { %5206 = vmatpush1.bf16.msra.mxu0 %v7433_v28  ;;  %v7496_v28 = vld [vmem:[%s11151_s1 + $0x10c4] ss:$16 sps:$4 sm:$0xff]  }
  0xe0   :  { %5247 = vmatpush1.bf16.msra.mxu1 %v7436_v29  ;;  %5207 = vmatprep.subr.bf16.mxu0 %v7441_v30  ;;  %v7499_v29 = vld [vmem:[%s11151_s1 + $0x12c4] ss:$16 sps:$4 sm:$0xff]   ;;  %v819_v30 = vrot.slane %v810_v14, %v818_v21 }
  0xe1   :  { %5248 = vmatprep.subr.bf16.mxu1 %v7444_v31  ;;  %v9249_v31 = vcombine.high %v9229_v22, %v9229_v22  ;;  %v7529_v14 = vld [vmem:[%s11151_s1 + $0x1224] ss:$16 sps:$4 sm:$0xff]  }
  0xe2   :  { %v7535_v21 = vld [vmem:[%s11151_s1 + $0x1204] ss:$16 sps:$4 sm:$0xff]  }
  0xe3   :  { %5208 = vmatpush2.bf16.msra.mxu0 %v7439_v33 }
  0xe4   :  { %5249 = vmatpush2.bf16.msra.mxu1 %v7442_v34  ;;  %5209 = vmatprep.subr.bf16.mxu0 %v7447_v36  ;;  %v7494_v36 = vld [vmem:[%s11151_s1 + $0x10c0] ss:$16 sps:$4 sm:$0xff]  }
  0xe5   :  { %5250 = vmatprep.subr.bf16.mxu1 %v7450_v37  ;;  %v7497_v37 = vld [vmem:[%s11151_s1 + $0x12c0] ss:$16 sps:$4 sm:$0xff]  }
  0xe7   :  { %5210 = vmatpush2.bf16.msra.mxu0 %v7445_v38 }
  0xe8   :  { %5251 = vmatpush2.bf16.msra.mxu1 %v7448_v32  ;;  %5211 = vmatprep.subr.bf16.mxu0 %v7453_v40 }
  0xe9   :  { %5252 = vmatprep.subr.bf16.mxu1 %v7456_v44  ;;  %v7502_v44 = vld [vmem:[%s11151_s1 + $0x10a4] ss:$16 sps:$4 sm:$0xff]  }
  0xeb   :  { %5212 = vmatpush2.bf16.msra.mxu0 %v7451_v45  ;;  %v7505_v45 = vld [vmem:[%s11151_s1 + $0x12a4] ss:$16 sps:$4 sm:$0xff]  }
  0xec   :  { %5253 = vmatpush2.bf16.msra.mxu1 %v7454_v46  ;;  %5213 = vmatprep.subr.bf16.mxu0 %v7459_v47 }
  0xed   :  { %5254 = vmatprep.subr.bf16.mxu1 %v7462_v48  ;;  %v7500_v48 = vld [vmem:[%s11151_s1 + $0x10a0] ss:$16 sps:$4 sm:$0xff]  }
  0xef   :  { %5214 = vmatpush2.bf16.msra.mxu0 %v7457_v51  ;;  %v7503_v51 = vld [vmem:[%s11151_s1 + $0x12a0] ss:$16 sps:$4 sm:$0xff]  }
  0xf0   :  { %5255 = vmatpush2.bf16.msra.mxu1 %v7460_v52  ;;  %5215 = vmatprep.subr.bf16.mxu0 %v7465_v53 }
  0xf1   :  { %5256 = vmatprep.subr.bf16.mxu1 %v7468_v55 }
  0xf3   :  { %5216 = vmatpush2.bf16.msra.mxu0 %v7463_v56 }
  0xf4   :  { %5257 = vmatpush2.bf16.msra.mxu1 %v7466_v57  ;;  %5217 = vmatprep.subr.bf16.mxu0 %v7471_v58  ;;  %v7508_v58 = vld [vmem:[%s11151_s1 + $0x1084] ss:$16 sps:$4 sm:$0xff]  }
  0xf5   :  { %5258 = vmatprep.subr.bf16.mxu1 %v7474_v61  ;;  %v7511_v61 = vld [vmem:[%s11151_s1 + $0x1284] ss:$16 sps:$4 sm:$0xff]  }
  0xf7   :  { %5218 = vmatpush2.bf16.msra.mxu0 %v7469_v62  ;;  %v7506_v62 = vld [vmem:[%s11151_s1 + $0x1080] ss:$16 sps:$4 sm:$0xff]  }
  0xf8   :  { %5259 = vmatpush2.bf16.msra.mxu1 %v7472_v63  ;;  %5219 = vmatprep.subr.bf16.mxu0 %v7477_v2  ;;  %v7509_v63 = vld [vmem:[%s11151_s1 + $0x1280] ss:$16 sps:$4 sm:$0xff]   ;;  %v7514_v2 = vld [vmem:[%s11151_s1 + $0x1064] ss:$16 sps:$4 sm:$0xff]  }
  0xf9   :  { %5260 = vmatprep.subr.bf16.mxu1 %v7480_v3  ;;  %v7517_v3 = vld [vmem:[%s11151_s1 + $0x1264] ss:$16 sps:$4 sm:$0xff]  }
  0xfb   :  { %5220 = vmatpush2.bf16.msra.mxu0 %v7475_v5  ;;  %v7512_v5 = vld [vmem:[%s11151_s1 + $0x1060] ss:$16 sps:$4 sm:$0xff]  }
  0xfc   :  { %5261 = vmatpush2.bf16.msra.mxu1 %v7478_v7  ;;  %5221 = vmatprep.subr.bf16.mxu0 %v7483_v8  ;;  %v7515_v7 = vld [vmem:[%s11151_s1 + $0x1260] ss:$16 sps:$4 sm:$0xff]   ;;  %v7520_v8 = vld [vmem:[%s11151_s1 + $0x1044] ss:$16 sps:$4 sm:$0xff]  }
  0xfd   :  { %5262 = vmatprep.subr.bf16.mxu1 %v7486_v9  ;;  %v7523_v9 = vld [vmem:[%s11151_s1 + $0x1244] ss:$16 sps:$4 sm:$0xff]  }
  0xff   :  { %5222 = vmatpush2.bf16.msra.mxu0 %v7481_v10  ;;  %v7518_v10 = vld [vmem:[%s11151_s1 + $0x1040] ss:$16 sps:$4 sm:$0xff]  }
 0x100   :  { %5263 = vmatpush2.bf16.msra.mxu1 %v7484_v12  ;;  %5273 = vmatprep.subr.bf16.mxu0 %v7490_v19  ;;  %v7526_v12 = vld [vmem:[%s11151_s1 + $0x1024] ss:$16 sps:$4 sm:$0xff]   ;;  %v7527_v19 = vld [vmem:[%s11151_s1 + $0x1220] ss:$16 sps:$4 sm:$0xff]  }
 0x101   :  { %5314 = vmatprep.subr.bf16.mxu1 %v7493_v20  ;;  %v7532_v20 = vld [vmem:[%s11151_s1 + $0x1004] ss:$16 sps:$4 sm:$0xff]  }
 0x102   :  { %v4979_v33 = vpop.f32.mrf.mxu0  ;;  %5224 = vmatmul.mubr.bf16.vlgmr.msra.gmra.mxu0 %v9218_v15 }
 0x103   :  { %v5020_v34 = vpop.f32.mrf.mxu1  ;;  %5265 = vmatmul.mubr.bf16.vlgmr.msra.gmra.mxu1 %v9233_v39  ;;  %v4980_v38 = vadd.f32 %v4979_v33, %v815_v27  ;;  %5274 = vmatpush1.bf16.msra.mxu0 %v7488_v24  ;;  %v7530_v24 = vld [vmem:[%s11151_s1 + $0x1000] ss:$16 sps:$4 sm:$0xff]   ;;  %v7538_v27 = vld [vmem:[%s11151_s1 + $0x11e4] ss:$16 sps:$4 sm:$0xff]  }
 0x104   :  { %5315 = vmatpush1.bf16.msra.mxu1 %v7491_v25  ;;  %v4981_v32 = vpop.f32.mrf.mxu0  ;;  %5275 = vmatprep.subr.bf16.mxu0 %v7496_v28  ;;  %v7533_v25 = vld [vmem:[%s11151_s1 + $0x1200] ss:$16 sps:$4 sm:$0xff]   ;;  %v7541_v28 = vld [vmem:[%s11151_s1 + $0x13e4] ss:$16 sps:$4 sm:$0xff]  }
 0x105   :  { %v5022_v40 = vpop.f32.mrf.mxu1  ;;  %5316 = vmatprep.subr.bf16.mxu1 %v7499_v29  ;;  %v9265_v46 = vadd.f32 %v5020_v34, %v4980_v38  ;;  %v4982_v47 = vadd.f32 %v4981_v32, %v819_v30  ;;  %5305 = vmatprep.mubr.bf16.mxu0 %v9229_v22  ;;  %v7536_v29 = vld [vmem:[%s11151_s1 + $0x11e0] ss:$16 sps:$4 sm:$0xff]   ;;  %v7544_v33 = vld [vmem:[%s11151_s1 + $0x11c4] ss:$16 sps:$4 sm:$0xff]  }
 0x106   :  { %5346 = vmatprep.mubr.bf16.mxu1 %v9249_v31  ;;  %v4983_v52 = vpop.f32.mrf.mxu0  ;;  %v7539_v30 = vld [vmem:[%s11151_s1 + $0x13e0] ss:$16 sps:$4 sm:$0xff]   ;;  %v7547_v34 = vld [vmem:[%s11151_s1 + $0x13c4] ss:$16 sps:$4 sm:$0xff]  }
 0x107   :  { %v5024_v53 = vpop.f32.mrf.mxu1  ;;  %v9275_v55 = vadd.f32 %v5022_v40, %v4982_v47  ;;  %5276 = vmatpush1.bf16.msra.mxu0 %v7494_v36  ;;  %v7542_v36 = vld [vmem:[%s11151_s1 + $0x11c0] ss:$16 sps:$4 sm:$0xff]   ;;  %v7550_v38 = vld [vmem:[%s11151_s1 + $0x11a4] ss:$16 sps:$4 sm:$0xff]  }
 0x108   :  { %5317 = vmatpush1.bf16.msra.mxu1 %v7497_v37  ;;  %v4984_v56 = vpop.f32.mrf.mxu0  ;;  %5277 = vmatprep.subr.bf16.mxu0 %v7502_v44  ;;  %v7545_v37 = vld [vmem:[%s11151_s1 + $0x13c0] ss:$16 sps:$4 sm:$0xff]   ;;  %v7553_v32 = vld [vmem:[%s11151_s1 + $0x13a4] ss:$16 sps:$4 sm:$0xff]  }
 0x109   :  { %v5025_v57 = vpop.f32.mrf.mxu1  ;;  %5318 = vmatprep.subr.bf16.mxu1 %v7505_v45  ;;  %v7548_v40 = vld [vmem:[%s11151_s1 + $0x11a0] ss:$16 sps:$4 sm:$0xff]   ;;  %v7556_v45 = vld [vmem:[%s11151_s1 + $0x1184] ss:$16 sps:$4 sm:$0xff]  }
 0x10a   :  { %v7551_v44 = vld [vmem:[%s11151_s1 + $0x13a0] ss:$16 sps:$4 sm:$0xff]   ;;  %v7559_v47 = vld [vmem:[%s11151_s1 + $0x1384] ss:$16 sps:$4 sm:$0xff]  }
 0x10b   :  { %5278 = vmatpush1.bf16.msra.mxu0 %v7500_v48  ;;  %v7554_v48 = vld [vmem:[%s11151_s1 + $0x1180] ss:$16 sps:$4 sm:$0xff]   ;;  %v7562_v52 = vld [vmem:[%s11151_s1 + $0x1164] ss:$16 sps:$4 sm:$0xff]  }
 0x10c   :  { %5319 = vmatpush1.bf16.msra.mxu1 %v7503_v51  ;;  %5279 = vmatprep.subr.bf16.mxu0 %v7508_v58  ;;  %v7557_v51 = vld [vmem:[%s11151_s1 + $0x1380] ss:$16 sps:$4 sm:$0xff]   ;;  %v7565_v53 = vld [vmem:[%s11151_s1 + $0x1364] ss:$16 sps:$4 sm:$0xff]  }
 0x10d   :  { %5320 = vmatprep.subr.bf16.mxu1 %v7511_v61  ;;  %v7560_v56 = vld [vmem:[%s11151_s1 + $0x1160] ss:$16 sps:$4 sm:$0xff]   ;;  %v7568_v58 = vld [vmem:[%s11151_s1 + $0x1144] ss:$16 sps:$4 sm:$0xff]  }
 0x10e   :  { %v7563_v57 = vld [vmem:[%s11151_s1 + $0x1360] ss:$16 sps:$4 sm:$0xff]   ;;  %v7571_v61 = vld [vmem:[%s11151_s1 + $0x1344] ss:$16 sps:$4 sm:$0xff]  }
 0x10f   :  { %5280 = vmatpush1.bf16.msra.mxu0 %v7506_v62  ;;  %v934_v62 = vcombine.high %v9181_v1, %v9181_v1  ;;  %v7577_v1 = vld [vmem:[%s11151_s1 + $0x1324] ss:$16 sps:$4 sm:$0xff]  }
 0x110   :  { %5321 = vmatpush1.bf16.msra.mxu1 %v7509_v63  ;;  %5281 = vmatprep.subr.bf16.mxu0 %v7514_v2  ;;  %v7566_v63 = vld [vmem:[%s11151_s1 + $0x1140] ss:$16 sps:$4 sm:$0xff]  }
 0x111   :  { %5322 = vmatprep.subr.bf16.mxu1 %v7517_v3  ;;  %v7569_v2 = vld [vmem:[%s11151_s1 + $0x1340] ss:$16 sps:$4 sm:$0xff]   ;;  %v7574_v3 = vld [vmem:[%s11151_s1 + $0x1124] ss:$16 sps:$4 sm:$0xff]  }
 0x113   :  { %5282 = vmatpush1.bf16.msra.mxu0 %v7512_v5  ;;  %v9418_v5 = vrot.slane %v934_v62, %v8472_v49  ;;  %v7605_v62 = vld [vmem:[%s11151_s1 + $0x1680] ss:$16 sps:$4 sm:$0xff]  }
 0x114   :  { %5323 = vmatpush1.bf16.msra.mxu1 %v7515_v7  ;;  %5283 = vmatprep.subr.bf16.mxu0 %v7520_v8  ;;  %v7572_v7 = vld [vmem:[%s11151_s1 + $0x1120] ss:$16 sps:$4 sm:$0xff]  }
 0x115   :  { %5324 = vmatprep.subr.bf16.mxu1 %v7523_v9  ;;  %v7575_v8 = vld [vmem:[%s11151_s1 + $0x1320] ss:$16 sps:$4 sm:$0xff]   ;;  %v7580_v9 = vld [vmem:[%s11151_s1 + $0x1104] ss:$16 sps:$4 sm:$0xff]  }
 0x117   :  { %5284 = vmatpush1.bf16.msra.mxu0 %v7518_v10  ;;  %v7583_v10 = vld [vmem:[%s11151_s1 + $0x1304] ss:$16 sps:$4 sm:$0xff]  }
 0x118   :  { %5325 = vmatpush1.bf16.msra.mxu1 %v7521_v11  ;;  %5285 = vmatprep.subr.bf16.mxu0 %v7526_v12  ;;  %v950_v11 = vcombine.high %v9418_v5, %v9418_v5  ;;  %v9436_v12 = vrot.slane %v9191_v4, %v8472_v49  ;;  %v7589_v4 = vld [vmem:[%s11151_s1 + $0x16e4] ss:$16 sps:$4 sm:$0xff]  }
 0x119   :  { %5326 = vmatprep.subr.bf16.mxu1 %v7529_v14  ;;  %v7578_v14 = vld [vmem:[%s11151_s1 + $0x1100] ss:$16 sps:$4 sm:$0xff]  }
 0x11b   :  { %5286 = vmatpush1.bf16.msra.mxu0 %v7524_v16  ;;  %v7581_v16 = vld [vmem:[%s11151_s1 + $0x1300] ss:$16 sps:$4 sm:$0xff]  }
 0x11c   :  { %5327 = vmatpush1.bf16.msra.mxu1 %v7527_v19  ;;  %5287 = vmatprep.subr.bf16.mxu0 %v7532_v20  ;;  %v7586_v19 = vld [vmem:[%s11151_s1 + $0x14e4] ss:$16 sps:$4 sm:$0xff]   ;;  %v7584_v20 = vld [vmem:[%s11151_s1 + $0x14e0] ss:$16 sps:$4 sm:$0xff]  }
 0x11d   :  { %5328 = vmatprep.subr.bf16.mxu1 %v7535_v21  ;;  %v7587_v21 = vld [vmem:[%s11151_s1 + $0x16e0] ss:$16 sps:$4 sm:$0xff]  }
 0x11f   :  { %5288 = vmatpush1.bf16.msra.mxu0 %v7530_v24  ;;  %v9457_v24 = vrot.slane %v950_v11, %v8472_v49  ;;  %v7622_v11 = vld [vmem:[%s11151_s1 + $0x1424] ss:$16 sps:$4 sm:$0xff]  }
 0x120   :  { %5329 = vmatpush1.bf16.msra.mxu1 %v7533_v25  ;;  %5289 = vmatprep.subr.bf16.mxu0 %v7538_v27  ;;  %v9461_v25 = vcombine.high %v9436_v12, %v9436_v12  ;;  %v7592_v27 = vld [vmem:[%s11151_s1 + $0x14c4] ss:$16 sps:$4 sm:$0xff]  }
 0x121   :  { %5330 = vmatprep.subr.bf16.mxu1 %v7541_v28  ;;  %v7595_v28 = vld [vmem:[%s11151_s1 + $0x16c4] ss:$16 sps:$4 sm:$0xff]  }
 0x123   :  { %5290 = vmatpush2.bf16.msra.mxu0 %v7536_v29  ;;  %v7590_v29 = vld [vmem:[%s11151_s1 + $0x14c0] ss:$16 sps:$4 sm:$0xff]  }
 0x124   :  { %5331 = vmatpush2.bf16.msra.mxu1 %v7539_v30  ;;  %5291 = vmatprep.subr.bf16.mxu0 %v7544_v33  ;;  %v7593_v30 = vld [vmem:[%s11151_s1 + $0x16c0] ss:$16 sps:$4 sm:$0xff]   ;;  %v9477_v33 = vcombine.high %v9457_v24, %v9457_v24 }
 0x125   :  { %5332 = vmatprep.subr.bf16.mxu1 %v7547_v34 }
 0x127   :  { %5292 = vmatpush2.bf16.msra.mxu0 %v7542_v36 }
 0x128   :  { %5333 = vmatpush2.bf16.msra.mxu1 %v7545_v37  ;;  %5293 = vmatprep.subr.bf16.mxu0 %v7550_v38 }
 0x129   :  { %5334 = vmatprep.subr.bf16.mxu1 %v7553_v32 }
 0x12b   :  { %5294 = vmatpush2.bf16.msra.mxu0 %v7548_v40  ;;  %v7598_v40 = vld [vmem:[%s11151_s1 + $0x14a4] ss:$16 sps:$4 sm:$0xff]  }
 0x12c   :  { %5335 = vmatpush2.bf16.msra.mxu1 %v7551_v44  ;;  %5295 = vmatprep.subr.bf16.mxu0 %v7556_v45  ;;  %v7601_v44 = vld [vmem:[%s11151_s1 + $0x16a4] ss:$16 sps:$4 sm:$0xff]  }
 0x12d   :  { %5336 = vmatprep.subr.bf16.mxu1 %v7559_v47 }
 0x12f   :  { %5296 = vmatpush2.bf16.msra.mxu0 %v7554_v48  ;;  %v7599_v48 = vld [vmem:[%s11151_s1 + $0x16a0] ss:$16 sps:$4 sm:$0xff]  }
 0x130   :  { %5337 = vmatpush2.bf16.msra.mxu1 %v7557_v51  ;;  %5297 = vmatprep.subr.bf16.mxu0 %v7562_v52 }
 0x131   :  { %5338 = vmatprep.subr.bf16.mxu1 %v7565_v53 }
 0x133   :  { %5298 = vmatpush2.bf16.msra.mxu0 %v7560_v56 }
 0x134   :  { %5339 = vmatpush2.bf16.msra.mxu1 %v7563_v57  ;;  %5299 = vmatprep.subr.bf16.mxu0 %v7568_v58  ;;  %v7604_v57 = vld [vmem:[%s11151_s1 + $0x1484] ss:$16 sps:$4 sm:$0xff]  }
 0x135   :  { %5340 = vmatprep.subr.bf16.mxu1 %v7571_v61  ;;  %v7607_v58 = vld [vmem:[%s11151_s1 + $0x1684] ss:$16 sps:$4 sm:$0xff]   ;;  %v7602_v61 = vld [vmem:[%s11151_s1 + $0x1480] ss:$16 sps:$4 sm:$0xff]  }
 0x137   :  { %5300 = vmatpush2.bf16.msra.mxu0 %v7566_v63  ;;  %v7610_v63 = vld [vmem:[%s11151_s1 + $0x1464] ss:$16 sps:$4 sm:$0xff]  }
 0x138   :  { %5341 = vmatpush2.bf16.msra.mxu1 %v7569_v2  ;;  %5301 = vmatprep.subr.bf16.mxu0 %v7574_v3  ;;  %v7613_v2 = vld [vmem:[%s11151_s1 + $0x1664] ss:$16 sps:$4 sm:$0xff]   ;;  %v7608_v3 = vld [vmem:[%s11151_s1 + $0x1460] ss:$16 sps:$4 sm:$0xff]  }
 0x139   :  { %5342 = vmatprep.subr.bf16.mxu1 %v7577_v1  ;;  %v7611_v1 = vld [vmem:[%s11151_s1 + $0x1660] ss:$16 sps:$4 sm:$0xff]  }
 0x13b   :  { %5302 = vmatpush2.bf16.msra.mxu0 %v7572_v7  ;;  %v7616_v7 = vld [vmem:[%s11151_s1 + $0x1444] ss:$16 sps:$4 sm:$0xff]  }
 0x13c   :  { %5343 = vmatpush2.bf16.msra.mxu1 %v7575_v8  ;;  %5303 = vmatprep.subr.bf16.mxu0 %v7580_v9  ;;  %v7619_v8 = vld [vmem:[%s11151_s1 + $0x1644] ss:$16 sps:$4 sm:$0xff]   ;;  %v7614_v9 = vld [vmem:[%s11151_s1 + $0x1440] ss:$16 sps:$4 sm:$0xff]  }
 0x13d   :  { %5344 = vmatprep.subr.bf16.mxu1 %v7583_v10  ;;  %v7617_v10 = vld [vmem:[%s11151_s1 + $0x1640] ss:$16 sps:$4 sm:$0xff]  }
 0x13f   :  { %5304 = vmatpush2.bf16.msra.mxu0 %v7578_v14  ;;  %v7625_v14 = vld [vmem:[%s11151_s1 + $0x1624] ss:$16 sps:$4 sm:$0xff]  }
 0x140   :  { %5345 = vmatpush2.bf16.msra.mxu1 %v7581_v16  ;;  %5355 = vmatprep.subr.bf16.mxu0 %v7586_v19  ;;  %v7620_v16 = vld [vmem:[%s11151_s1 + $0x1420] ss:$16 sps:$4 sm:$0xff]  }
 0x141   :  { %5396 = vmatprep.subr.bf16.mxu1 %v7589_v4  ;;  %v7623_v19 = vld [vmem:[%s11151_s1 + $0x1620] ss:$16 sps:$4 sm:$0xff]   ;;  %v7628_v4 = vld [vmem:[%s11151_s1 + $0x1404] ss:$16 sps:$4 sm:$0xff]  }
 0x142   :  { %v5061_v34 = vpop.f32.mrf.mxu0  ;;  %5306 = vmatmul.mubr.bf16.vlgmr.msra.gmra.mxu0 %v9436_v12 }
 0x143   :  { %v5102_v36 = vpop.f32.mrf.mxu1  ;;  %5347 = vmatmul.mubr.bf16.vlgmr.msra.gmra.mxu1 %v9461_v25  ;;  %v5062_v37 = vadd.f32 %v5061_v34, %v9265_v46  ;;  %5356 = vmatpush1.bf16.msra.mxu0 %v7584_v20  ;;  %v7596_v46 = vld [vmem:[%s11151_s1 + $0x14a0] ss:$16 sps:$4 sm:$0xff]   ;;  %v7631_v20 = vld [vmem:[%s11151_s1 + $0x1604] ss:$16 sps:$4 sm:$0xff]  }
 0x144   :  { %5397 = vmatpush1.bf16.msra.mxu1 %v7587_v21  ;;  %v5063_v38 = vpop.f32.mrf.mxu0  ;;  %5357 = vmatprep.subr.bf16.mxu0 %v7592_v27  ;;  %v7626_v21 = vld [vmem:[%s11151_s1 + $0x1400] ss:$16 sps:$4 sm:$0xff]  }
 0x145   :  { %v5104_v32 = vpop.f32.mrf.mxu1  ;;  %5398 = vmatprep.subr.bf16.mxu1 %v7595_v28  ;;  %v9488_v45 = vadd.f32 %v5102_v36, %v5062_v37  ;;  %v5064_v47 = vadd.f32 %v5063_v38, %v9275_v55  ;;  %5387 = vmatprep.mubr.bf16.mxu0 %v9457_v24  ;;  %v7629_v27 = vld [vmem:[%s11151_s1 + $0x1600] ss:$16 sps:$4 sm:$0xff]   ;;  %v7634_v28 = vld [vmem:[%s11151_s1 + $0x15e4] ss:$16 sps:$4 sm:$0xff]  }
 0x146   :  { %5428 = vmatprep.mubr.bf16.mxu1 %v9477_v33  ;;  %v5065_v51 = vpop.f32.mrf.mxu0  ;;  %v7635_v34 = vld [vmem:[%s11151_s1 + $0x17e0] ss:$16 sps:$4 sm:$0xff]   ;;  %v7640_v36 = vld [vmem:[%s11151_s1 + $0x15c4] ss:$16 sps:$4 sm:$0xff]  }
 0x147   :  { %v5106_v52 = vpop.f32.mrf.mxu1  ;;  %v9499_v53 = vadd.f32 %v5104_v32, %v5064_v47  ;;  %5358 = vmatpush1.bf16.msra.mxu0 %v7590_v29  ;;  %v7637_v29 = vld [vmem:[%s11151_s1 + $0x17e4] ss:$16 sps:$4 sm:$0xff]   ;;  %v7638_v38 = vld [vmem:[%s11151_s1 + $0x15c0] ss:$16 sps:$4 sm:$0xff]  }
 0x148   :  { %5399 = vmatpush1.bf16.msra.mxu1 %v7593_v30  ;;  %v5066_v56 = vpop.f32.mrf.mxu0  ;;  %5359 = vmatprep.subr.bf16.mxu0 %v7598_v40  ;;  %v7632_v30 = vld [vmem:[%s11151_s1 + $0x15e0] ss:$16 sps:$4 sm:$0xff]   ;;  %v7643_v37 = vld [vmem:[%s11151_s1 + $0x17c4] ss:$16 sps:$4 sm:$0xff]  }
 0x149   :  { %v5107_v55 = vpop.f32.mrf.mxu1  ;;  %5400 = vmatprep.subr.bf16.mxu1 %v7601_v44  ;;  %v7641_v32 = vld [vmem:[%s11151_s1 + $0x17c0] ss:$16 sps:$4 sm:$0xff]   ;;  %v7646_v40 = vld [vmem:[%s11151_s1 + $0x15a4] ss:$16 sps:$4 sm:$0xff]  }
 0x14a   :  { %v7649_v44 = vld [vmem:[%s11151_s1 + $0x17a4] ss:$16 sps:$4 sm:$0xff]   ;;  %v7644_v47 = vld [vmem:[%s11151_s1 + $0x15a0] ss:$16 sps:$4 sm:$0xff]  }
 0x14b   :  { %5360 = vmatpush1.bf16.msra.mxu0 %v7596_v46  ;;  %v7647_v46 = vld [vmem:[%s11151_s1 + $0x17a0] ss:$16 sps:$4 sm:$0xff]   ;;  %v7655_v51 = vld [vmem:[%s11151_s1 + $0x1784] ss:$16 sps:$4 sm:$0xff]  }
 0x14c   :  { %5401 = vmatpush1.bf16.msra.mxu1 %v7599_v48  ;;  %5361 = vmatprep.subr.bf16.mxu0 %v7604_v57  ;;  %v7652_v48 = vld [vmem:[%s11151_s1 + $0x1584] ss:$16 sps:$4 sm:$0xff]   ;;  %v7650_v52 = vld [vmem:[%s11151_s1 + $0x1580] ss:$16 sps:$4 sm:$0xff]  }
 0x14d   :  { %5402 = vmatprep.subr.bf16.mxu1 %v7607_v58  ;;  %v7653_v56 = vld [vmem:[%s11151_s1 + $0x1780] ss:$16 sps:$4 sm:$0xff]   ;;  %v7658_v55 = vld [vmem:[%s11151_s1 + $0x1564] ss:$16 sps:$4 sm:$0xff]  }
 0x14e   :  { %v7661_v57 = vld [vmem:[%s11151_s1 + $0x1764] ss:$16 sps:$4 sm:$0xff]   ;;  %v7656_v58 = vld [vmem:[%s11151_s1 + $0x1560] ss:$16 sps:$4 sm:$0xff]  }
 0x14f   :  { %5362 = vmatpush1.bf16.msra.mxu0 %v7602_v61  ;;  %v7659_v61 = vld [vmem:[%s11151_s1 + $0x1760] ss:$16 sps:$4 sm:$0xff]  }
 0x150   :  { %5403 = vmatpush1.bf16.msra.mxu1 %v7605_v62  ;;  %5363 = vmatprep.subr.bf16.mxu0 %v7610_v63  ;;  %v7664_v62 = vld [vmem:[%s11151_s1 + $0x1544] ss:$16 sps:$4 sm:$0xff]  }
 0x151   :  { %5404 = vmatprep.subr.bf16.mxu1 %v7613_v2  ;;  %v7667_v63 = vld [vmem:[%s11151_s1 + $0x1744] ss:$16 sps:$4 sm:$0xff]   ;;  %v7662_v2 = vld [vmem:[%s11151_s1 + $0x1540] ss:$16 sps:$4 sm:$0xff]  }
 0x153   :  { %5364 = vmatpush1.bf16.msra.mxu0 %v7608_v3  ;;  %v7665_v3 = vld [vmem:[%s11151_s1 + $0x1740] ss:$16 sps:$4 sm:$0xff]  }
 0x154   :  { %5405 = vmatpush1.bf16.msra.mxu1 %v7611_v1  ;;  %5365 = vmatprep.subr.bf16.mxu0 %v7616_v7  ;;  %v7670_v1 = vld [vmem:[%s11151_s1 + $0x1524] ss:$16 sps:$4 sm:$0xff]  }
 0x155   :  { %5406 = vmatprep.subr.bf16.mxu1 %v7619_v8  ;;  %v7673_v7 = vld [vmem:[%s11151_s1 + $0x1724] ss:$16 sps:$4 sm:$0xff]   ;;  %v7668_v8 = vld [vmem:[%s11151_s1 + $0x1520] ss:$16 sps:$4 sm:$0xff]  }
 0x157   :  { %5366 = vmatpush1.bf16.msra.mxu0 %v7614_v9  ;;  %v7671_v9 = vld [vmem:[%s11151_s1 + $0x1720] ss:$16 sps:$4 sm:$0xff]  }
 0x158   :  { %5407 = vmatpush1.bf16.msra.mxu1 %v7617_v10  ;;  %5367 = vmatprep.subr.bf16.mxu0 %v7622_v11  ;;  %v7676_v10 = vld [vmem:[%s11151_s1 + $0x1504] ss:$16 sps:$4 sm:$0xff]  }
 0x159   :  { %5408 = vmatprep.subr.bf16.mxu1 %v7625_v14  ;;  %v7679_v11 = vld [vmem:[%s11151_s1 + $0x1704] ss:$16 sps:$4 sm:$0xff]   ;;  %v9653_v14 = vrot.slane %v9418_v5, %v8472_v49  ;;  %v7686_v5 = vld [vmem:[%s11151_s1 + $0xec] ss:$16 sps:$4 sm:$0xff]  }
 0x15b   :  { %5368 = vmatpush1.bf16.msra.mxu0 %v7620_v16  ;;  %v7674_v16 = vld [vmem:[%s11151_s1 + $0x1500] ss:$16 sps:$4 sm:$0xff]  }
 0x15c   :  { %5409 = vmatpush1.bf16.msra.mxu1 %v7623_v19  ;;  %5369 = vmatprep.subr.bf16.mxu0 %v7628_v4  ;;  %v7677_v19 = vld [vmem:[%s11151_s1 + $0x1700] ss:$16 sps:$4 sm:$0xff]   ;;  %v7683_v4 = vld [vmem:[%s11151_s1 + $0x1864] ss:$16 sps:$4 sm:$0xff]  }
 0x15d   :  { %5410 = vmatprep.subr.bf16.mxu1 %v7631_v20  ;;  %v7681_v20 = vld [vmem:[%s11151_s1 + $0x1860] ss:$16 sps:$4 sm:$0xff]  }
 0x15f   :  { %5370 = vmatpush1.bf16.msra.mxu0 %v7626_v21  ;;  %v7684_v21 = vld [vmem:[%s11151_s1 + $0xe8] ss:$16 sps:$4 sm:$0xff]  }
 0x160   :  { %5411 = vmatpush1.bf16.msra.mxu1 %v7629_v27  ;;  %5371 = vmatprep.subr.bf16.mxu0 %v7634_v28  ;;  %v9675_v27 = vcombine.high %v9653_v14, %v9653_v14  ;;  %v7689_v28 = vld [vmem:[%s11151_s1 + $0x1844] ss:$16 sps:$4 sm:$0xff]  }
 0x161   :  { %5412 = vmatprep.subr.bf16.mxu1 %v7637_v29  ;;  %v7692_v29 = vld [vmem:[%s11151_s1 + $0xcc] ss:$16 sps:$4 sm:$0xff]  }
 0x163   :  { %5372 = vmatpush2.bf16.msra.mxu0 %v7632_v30  ;;  %v7687_v30 = vld [vmem:[%s11151_s1 + $0x1840] ss:$16 sps:$4 sm:$0xff]  }
 0x164   :  { %5413 = vmatpush2.bf16.msra.mxu1 %v7635_v34  ;;  %5373 = vmatprep.subr.bf16.mxu0 %v7640_v36  ;;  %v7690_v34 = vld [vmem:[%s11151_s1 + $0xc8] ss:$16 sps:$4 sm:$0xff]  }
 0x165   :  { %5414 = vmatprep.subr.bf16.mxu1 %v7643_v37 }
 0x167   :  { %5374 = vmatpush2.bf16.msra.mxu0 %v7638_v38 }
 0x168   :  { %5415 = vmatpush2.bf16.msra.mxu1 %v7641_v32  ;;  %5375 = vmatprep.subr.bf16.mxu0 %v7646_v40 }
 0x169   :  { %5416 = vmatprep.subr.bf16.mxu1 %v7649_v44  ;;  %v7695_v44 = vld [vmem:[%s11151_s1 + $0x1824] ss:$16 sps:$4 sm:$0xff]  }
 0x16b   :  { %5376 = vmatpush2.bf16.msra.mxu0 %v7644_v47  ;;  %v7698_v47 = vld [vmem:[%s11151_s1 + $0xac] ss:$16 sps:$4 sm:$0xff]  }
 0x16c   :  { %5417 = vmatpush2.bf16.msra.mxu1 %v7647_v46  ;;  %5377 = vmatprep.subr.bf16.mxu0 %v7652_v48 }
 0x16d   :  { %5418 = vmatprep.subr.bf16.mxu1 %v7655_v51  ;;  %v7696_v51 = vld [vmem:[%s11151_s1 + $0xa8] ss:$16 sps:$4 sm:$0xff]  }
 0x16f   :  { %5378 = vmatpush2.bf16.msra.mxu0 %v7650_v52  ;;  %v8305_v52 = vmov 0  }
 0x170   :  { %5419 = vmatpush2.bf16.msra.mxu1 %v7653_v56  ;;  %5379 = vmatprep.subr.bf16.mxu0 %v7658_v55 }
 0x171   :  { %5420 = vmatprep.subr.bf16.mxu1 %v7661_v57 }
 0x173   :  { %5380 = vmatpush2.bf16.msra.mxu0 %v7656_v58 }
 0x174   :  { %5421 = vmatpush2.bf16.msra.mxu1 %v7659_v61  ;;  %5381 = vmatprep.subr.bf16.mxu0 %v7664_v62  ;;  %v7701_v61 = vld [vmem:[%s11151_s1 + $0x1804] ss:$16 sps:$4 sm:$0xff]   ;;  %v7704_v62 = vld [vmem:[%s11151_s1 + $0x8c] ss:$16 sps:$4 sm:$0xff]  }
 0x175   :  { %5422 = vmatprep.subr.bf16.mxu1 %v7667_v63  ;;  %v7702_v63 = vld [vmem:[%s11151_s1 + $0x88] ss:$16 sps:$4 sm:$0xff]  }
 0x177   :  { %5382 = vmatpush2.bf16.msra.mxu0 %v7662_v2  ;;  %v6241_v2 = vld.sshfl [vmem:[%s11150_s0 + $0x18] sm:$0x1 pattern:$0x75316420] }
 0x178   :  { %5423 = vmatpush2.bf16.msra.mxu1 %v7665_v3  ;;  %5383 = vmatprep.subr.bf16.mxu0 %v7670_v1  ;;  %v7707_v3 = vld [vmem:[%s11151_s1 + $0x6c] ss:$16 sps:$4 sm:$0xff]  }
 0x179   :  { %5424 = vmatprep.subr.bf16.mxu1 %v7673_v7  ;;  %v7710_v1 = vld [vmem:[%s11151_s1 + $0x2ec] ss:$16 sps:$4 sm:$0xff]   ;;  %v7705_v7 = vld [vmem:[%s11151_s1 + $0x68] ss:$16 sps:$4 sm:$0xff]  }
 0x17b   :  { %5384 = vmatpush2.bf16.msra.mxu0 %v7668_v8  ;;  %v7708_v8 = vld [vmem:[%s11151_s1 + $0x2e8] ss:$16 sps:$4 sm:$0xff]  }
 0x17c   :  { %5425 = vmatpush2.bf16.msra.mxu1 %v7671_v9  ;;  %5385 = vmatprep.subr.bf16.mxu0 %v7676_v10  ;;  %v9739_v9 = vrot.slane %v6241_v2, %v8472_v49  ;;  %v7713_v10 = vld [vmem:[%s11151_s1 + $0x4c] ss:$16 sps:$4 sm:$0xff]   ;;  %v7711_v49 = vld [vmem:[%s11151_s1 + $0x48] ss:$16 sps:$4 sm:$0xff]  }
 0x17d   :  { %5426 = vmatprep.subr.bf16.mxu1 %v7679_v11  ;;  %v7716_v11 = vld [vmem:[%s11151_s1 + $0x2cc] ss:$16 sps:$4 sm:$0xff]  }
 0x17e   :  { %v7761_v2 = vld [vmem:[%s11151_s1 + $0x14c] ss:$16 sps:$4 sm:$0xff]  }
 0x17f   :  { %5386 = vmatpush2.bf16.msra.mxu0 %v7674_v16  ;;  %v7714_v16 = vld [vmem:[%s11151_s1 + $0x2c8] ss:$16 sps:$4 sm:$0xff]  }
 0x180   :  { %5427 = vmatpush2.bf16.msra.mxu1 %v7677_v19  ;;  %5445 = vmatprep.subr.bf16.mxu0 %v7683_v4  ;;  %v7719_v19 = vld [vmem:[%s11151_s1 + $0x2c] ss:$16 sps:$4 sm:$0xff]  }
 0x181   :  { %5478 = vmatprep.subr.bf16.mxu1 %v7686_v5  ;;  %v7722_v4 = vld [vmem:[%s11151_s1 + $0x2ac] ss:$16 sps:$4 sm:$0xff]   ;;  %v7717_v5 = vld [vmem:[%s11151_s1 + $0x28] ss:$16 sps:$4 sm:$0xff]  }
 0x182   :  { %v5143_v36 = vpop.f32.mrf.mxu0  ;;  %5388 = vmatmul.mubr.bf16.vlgmr.msra.gmra.mxu0 %v9653_v14 }
 0x183   :  { %v5184_v37 = vpop.f32.mrf.mxu1  ;;  %5429 = vmatmul.mubr.bf16.vlgmr.msra.gmra.mxu1 %v9675_v27  ;;  %v5144_v38 = vadd.f32 %v5143_v36, %v9488_v45  ;;  %5446 = vmatpush1.bf16.msra.mxu0 %v7681_v20  ;;  %v7693_v45 = vld [vmem:[%s11151_s1 + $0x1820] ss:$16 sps:$4 sm:$0xff]   ;;  %v7720_v20 = vld [vmem:[%s11151_s1 + $0x2a8] ss:$16 sps:$4 sm:$0xff]  }
 0x184   :  { %5479 = vmatpush1.bf16.msra.mxu1 %v7684_v21  ;;  %v5145_v32 = vpop.f32.mrf.mxu0  ;;  %5447 = vmatprep.subr.bf16.mxu0 %v7689_v28  ;;  %v7725_v21 = vld [vmem:[%s11151_s1 + $0xc] ss:$16 sps:$4 sm:$0xff]   ;;  %v7723_v28 = vld [vmem:[%s11151_s1 + $0x8] ss:$16 sps:$4 sm:$0xff]  }
 0x185   :  { %v5186_v40 = vpop.f32.mrf.mxu1  ;;  %5480 = vmatprep.subr.bf16.mxu1 %v7692_v29  ;;  %v9698_v46 = vadd.f32 %v5184_v37, %v5144_v38  ;;  %v5146_v48 = vadd.f32 %v5145_v32, %v9499_v53  ;;  %5469 = vmatprep.mubr.bf16.mxu0 %v8305_v52  ;;  %v7726_v29 = vld [vmem:[%s11151_s1 + $0x288] ss:$16 sps:$4 sm:$0xff]   ;;  %v7737_v38 = vld [vmem:[%s11151_s1 + $0x1cc] ss:$16 sps:$4 sm:$0xff]  }
 0x186   :  { %5510 = vmatprep.mubr.bf16.mxu1 %v8500_v60  ;;  %v5147_v56 = vpop.f32.mrf.mxu0  ;;  %v7699_v60 = vld [vmem:[%s11151_s1 + $0x1800] ss:$16 sps:$4 sm:$0xff]   ;;  %v7729_v36 = vld [vmem:[%s11151_s1 + $0x1e8] ss:$16 sps:$4 sm:$0xff]   ;;  %v7740_v32 = vld [vmem:[%s11151_s1 + $0x24c] ss:$16 sps:$4 sm:$0xff]  }
 0x187   :  { %v5188_v55 = vpop.f32.mrf.mxu1  ;;  %v9709_v57 = vadd.f32 %v5186_v40, %v5146_v48  ;;  %5448 = vmatpush1.bf16.msra.mxu0 %v7687_v30  ;;  %v7731_v30 = vld [vmem:[%s11151_s1 + $0x1ec] ss:$16 sps:$4 sm:$0xff]   ;;  %v7732_v37 = vld [vmem:[%s11151_s1 + $0x268] ss:$16 sps:$4 sm:$0xff]  }
 0x188   :  { %5481 = vmatpush1.bf16.msra.mxu1 %v7690_v34  ;;  %v5148_v53 = vpop.f32.mrf.mxu0  ;;  %5449 = vmatprep.subr.bf16.mxu0 %v7695_v44  ;;  %v7734_v34 = vld [vmem:[%s11151_s1 + $0x26c] ss:$16 sps:$4 sm:$0xff]   ;;  %v7735_v40 = vld [vmem:[%s11151_s1 + $0x1c8] ss:$16 sps:$4 sm:$0xff]  }
 0x189   :  { %v5189_v58 = vpop.f32.mrf.mxu1  ;;  %5482 = vmatprep.subr.bf16.mxu1 %v7698_v47  ;;  %v7738_v44 = vld [vmem:[%s11151_s1 + $0x248] ss:$16 sps:$4 sm:$0xff]   ;;  %v7743_v47 = vld [vmem:[%s11151_s1 + $0x1ac] ss:$16 sps:$4 sm:$0xff]  }
 0x18a   :  { %v7746_v48 = vld [vmem:[%s11151_s1 + $0x22c] ss:$16 sps:$4 sm:$0xff]   ;;  %v7747_v53 = vld [vmem:[%s11151_s1 + $0x188] ss:$16 sps:$4 sm:$0xff]  }
 0x18b   :  { %5450 = vmatpush1.bf16.msra.mxu0 %v7693_v45  ;;  %v7741_v45 = vld [vmem:[%s11151_s1 + $0x1a8] ss:$16 sps:$4 sm:$0xff]   ;;  %v7749_v56 = vld [vmem:[%s11151_s1 + $0x18c] ss:$16 sps:$4 sm:$0xff]  }
 0x18c   :  { %5483 = vmatpush1.bf16.msra.mxu1 %v7696_v51  ;;  %5451 = vmatprep.subr.bf16.mxu0 %v7701_v61  ;;  %v7744_v51 = vld [vmem:[%s11151_s1 + $0x228] ss:$16 sps:$4 sm:$0xff]   ;;  %v7752_v55 = vld [vmem:[%s11151_s1 + $0x20c] ss:$16 sps:$4 sm:$0xff]  }
 0x18d   :  { %5484 = vmatprep.subr.bf16.mxu1 %v7704_v62  ;;  %v7750_v58 = vld [vmem:[%s11151_s1 + $0x208] ss:$16 sps:$4 sm:$0xff]   ;;  %v7755_v61 = vld [vmem:[%s11151_s1 + $0x16c] ss:$16 sps:$4 sm:$0xff]  }
 0x18e   :  { %v7758_v62 = vld [vmem:[%s11151_s1 + $0x3ec] ss:$16 sps:$4 sm:$0xff]  }
 0x18f   :  { %5452 = vmatpush1.bf16.msra.mxu0 %v7699_v60  ;;  %v7753_v60 = vld [vmem:[%s11151_s1 + $0x168] ss:$16 sps:$4 sm:$0xff]  }
 0x190   :  { %5485 = vmatpush1.bf16.msra.mxu1 %v7702_v63  ;;  %5519 = vmatprep.subr.bf16.mxu0 %v7710_v1  ;;  %v7756_v63 = vld [vmem:[%s11151_s1 + $0x3e8] ss:$16 sps:$4 sm:$0xff]  }
 0x191   :  { %5486 = vmatprep.subr.bf16.mxu1 %v7707_v3  ;;  %v7764_v3 = vld [vmem:[%s11151_s1 + $0x3cc] ss:$16 sps:$4 sm:$0xff]   ;;  %v7759_v1 = vld [vmem:[%s11151_s1 + $0x148] ss:$16 sps:$4 sm:$0xff]  }
 0x192   :  { %7026 = vmatmul.mubr.msk.bf16.vlgmr.msra.gmra.mxu0 %vm4941_vm0, %v9739_v9 }
 0x193   :  { %5520 = vmatpush1.bf16.msra.mxu0 %v7708_v8  ;;  %5551 = vmatprep.mubr.bf16.mxu0 %v8513_v0  ;;  %v7728_v0 = vld [vmem:[%s11151_s1 + $0x28c] ss:$16 sps:$4 sm:$0xff]  }
 0x194   :  { %5487 = vmatpush1.bf16.msra.mxu1 %v7705_v7  ;;  %5521 = vmatprep.subr.bf16.mxu0 %v7716_v11  ;;  %v7762_v7 = vld [vmem:[%s11151_s1 + $0x3c8] ss:$16 sps:$4 sm:$0xff]   ;;  %v7767_v8 = vld [vmem:[%s11151_s1 + $0x12c] ss:$16 sps:$4 sm:$0xff]  }
 0x195   :  { %5488 = vmatprep.subr.bf16.mxu1 %v7713_v10  ;;  %v7770_v10 = vld [vmem:[%s11151_s1 + $0x3ac] ss:$16 sps:$4 sm:$0xff]   ;;  %v7765_v11 = vld [vmem:[%s11151_s1 + $0x128] ss:$16 sps:$4 sm:$0xff]  }
 0x197   :  { %5522 = vmatpush1.bf16.msra.mxu0 %v7714_v16  ;;  %v7773_v16 = vld [vmem:[%s11151_s1 + $0x10c] ss:$16 sps:$4 sm:$0xff]  }
 0x198   :  { %5489 = vmatpush1.bf16.msra.mxu1 %v7711_v49  ;;  %5523 = vmatprep.subr.bf16.mxu0 %v7722_v4  ;;  %v7768_v49 = vld [vmem:[%s11151_s1 + $0x3a8] ss:$16 sps:$4 sm:$0xff]  }
 0x199   :  { %5490 = vmatprep.subr.bf16.mxu1 %v7719_v19  ;;  %v7776_v19 = vld [vmem:[%s11151_s1 + $0x38c] ss:$16 sps:$4 sm:$0xff]   ;;  %v7771_v4 = vld [vmem:[%s11151_s1 + $0x108] ss:$16 sps:$4 sm:$0xff]  }
 0x19b   :  { %5524 = vmatpush1.bf16.msra.mxu0 %v7720_v20  ;;  %v7779_v20 = vld [vmem:[%s11151_s1 + $0x36c] ss:$16 sps:$4 sm:$0xff]  }
 0x19c   :  { %5491 = vmatpush1.bf16.msra.mxu1 %v7717_v5  ;;  %5525 = vmatprep.subr.bf16.mxu0 %v7728_v0  ;;  %v7774_v5 = vld [vmem:[%s11151_s1 + $0x388] ss:$16 sps:$4 sm:$0xff]  }
 0x19d   :  { %5492 = vmatprep.subr.bf16.mxu1 %v7725_v21  ;;  %v7782_v21 = vld [vmem:[%s11151_s1 + $0x4ec] ss:$16 sps:$4 sm:$0xff]   ;;  %v7777_v0 = vld [vmem:[%s11151_s1 + $0x368] ss:$16 sps:$4 sm:$0xff]  }
 0x19f   :  { %5526 = vmatpush1.bf16.msra.mxu0 %v7726_v29  ;;  %v7785_v29 = vld [vmem:[%s11151_s1 + $0x34c] ss:$16 sps:$4 sm:$0xff]  }
 0x1a0   :  { %5493 = vmatpush1.bf16.msra.mxu1 %v7723_v28  ;;  %5527 = vmatprep.subr.bf16.mxu0 %v7734_v34  ;;  %v7780_v28 = vld [vmem:[%s11151_s1 + $0x4e8] ss:$16 sps:$4 sm:$0xff]  }
 0x1a1   :  { %5494 = vmatprep.subr.bf16.mxu1 %v7731_v30  ;;  %v7788_v30 = vld [vmem:[%s11151_s1 + $0x4cc] ss:$16 sps:$4 sm:$0xff]   ;;  %v7783_v34 = vld [vmem:[%s11151_s1 + $0x348] ss:$16 sps:$4 sm:$0xff]  }
 0x1a3   :  { %5528 = vmatpush1.bf16.msra.mxu0 %v7732_v37 }
 0x1a4   :  { %5495 = vmatpush2.bf16.msra.mxu1 %v7729_v36  ;;  %5529 = vmatprep.subr.bf16.mxu0 %v7740_v32  ;;  %v7786_v36 = vld [vmem:[%s11151_s1 + $0x4c8] ss:$16 sps:$4 sm:$0xff]  }
 0x1a5   :  { %5496 = vmatprep.subr.bf16.mxu1 %v7737_v38 }
 0x1a7   :  { %5530 = vmatpush1.bf16.msra.mxu0 %v7738_v44 }
 0x1a8   :  { %5497 = vmatpush2.bf16.msra.mxu1 %v7735_v40  ;;  %5531 = vmatprep.subr.bf16.mxu0 %v7746_v48  ;;  %v7794_v48 = vld [vmem:[%s11151_s1 + $0x4ac] ss:$16 sps:$4 sm:$0xff]  }
 0x1a9   :  { %5498 = vmatprep.subr.bf16.mxu1 %v7743_v47  ;;  %v7791_v47 = vld [vmem:[%s11151_s1 + $0x32c] ss:$16 sps:$4 sm:$0xff]  }
 0x1ab   :  { %5532 = vmatpush1.bf16.msra.mxu0 %v7744_v51  ;;  %v7792_v51 = vld [vmem:[%s11151_s1 + $0x4a8] ss:$16 sps:$4 sm:$0xff]  }
 0x1ac   :  { %5499 = vmatpush2.bf16.msra.mxu1 %v7741_v45  ;;  %5533 = vmatprep.subr.bf16.mxu0 %v7752_v55 }
 0x1ad   :  { %5500 = vmatprep.subr.bf16.mxu1 %v7749_v56 }
 0x1af   :  { %5534 = vmatpush1.bf16.msra.mxu0 %v7750_v58 }
 0x1b0   :  { %5501 = vmatpush2.bf16.msra.mxu1 %v7747_v53  ;;  %5535 = vmatprep.subr.bf16.mxu0 %v7758_v62  ;;  %v7800_v62 = vld [vmem:[%s11151_s1 + $0x48c] ss:$16 sps:$4 sm:$0xff]  }
 0x1b1   :  { %5502 = vmatprep.subr.bf16.mxu1 %v7755_v61 }
 0x1b3   :  { %5536 = vmatpush2.bf16.msra.mxu0 %v7756_v63 }
 0x1b4   :  { %5503 = vmatpush2.bf16.msra.mxu1 %v7753_v60  ;;  %5537 = vmatprep.subr.bf16.mxu0 %v7764_v3 }
 0x1b5   :  { %5504 = vmatprep.subr.bf16.mxu1 %v7761_v2 }
 0x1b7   :  { %5538 = vmatpush2.bf16.msra.mxu0 %v7762_v7 }
 0x1b8   :  { %5505 = vmatpush2.bf16.msra.mxu1 %v7759_v1  ;;  %5539 = vmatprep.subr.bf16.mxu0 %v7770_v10 }
 0x1b9   :  { %5506 = vmatprep.subr.bf16.mxu1 %v7767_v8 }
 0x1bb   :  { %5540 = vmatpush2.bf16.msra.mxu0 %v7768_v49 }
 0x1bc   :  { %5507 = vmatpush2.bf16.msra.mxu1 %v7765_v11  ;;  %5541 = vmatprep.subr.bf16.mxu0 %v7776_v19 }
 0x1bd   :  { %5508 = vmatprep.subr.bf16.mxu1 %v7773_v16 }
 0x1bf   :  { %5542 = vmatpush2.bf16.msra.mxu0 %v7774_v5 }
 0x1c0   :  { %5509 = vmatpush2.bf16.msra.mxu1 %v7771_v4  ;;  %5543 = vmatprep.subr.bf16.mxu0 %v7779_v20 }
 0x1c1   :  { %5560 = vmatprep.subr.bf16.mxu1 %v7782_v21 }
 0x1c2   :  { %v5225_v37 = vpop.f32.mrf.mxu0 }
 0x1c3   :  { %v5266_v38 = vpop.f32.mrf.mxu1  ;;  %5511 = vmatmul.mubr.bf16.vlgmr.msra.gmra.mxu1 %v8550_v13  ;;  %v5226_v32 = vadd.f32 %v5225_v37, %v9698_v46  ;;  %5544 = vmatpush2.bf16.msra.mxu0 %v7777_v0  ;;  %v7789_v46 = vld [vmem:[%s11151_s1 + $0x328] ss:$16 sps:$4 sm:$0xff]  }
 0x1c4   :  { %5561 = vmatpush1.bf16.msra.mxu1 %v7780_v28  ;;  %v5227_v40 = vpop.f32.mrf.mxu0  ;;  %5545 = vmatprep.subr.bf16.mxu0 %v7785_v29 }
 0x1c5   :  { %v5268_v44 = vpop.f32.mrf.mxu1  ;;  %5562 = vmatprep.subr.bf16.mxu1 %v7788_v30  ;;  %v9908_v45 = vadd.f32 %v5266_v38, %v5226_v32  ;;  %v5228_v13 = vadd.f32 %v5227_v40, %v9709_v57  ;;  %5592 = vmatprep.mubr.bf16.mxu1 %v8562_v17  ;;  %v7797_v57 = vld [vmem:[%s11151_s1 + $0x30c] ss:$16 sps:$4 sm:$0xff]  }
 0x1c6   :  { %v5229_v56 = vpop.f32.mrf.mxu0 }
 0x1c7   :  { %v5270_v55 = vpop.f32.mrf.mxu1  ;;  %v9918_v53 = vadd.f32 %v5268_v44, %v5228_v13  ;;  %5546 = vmatpush2.bf16.msra.mxu0 %v7783_v34 }
 0x1c8   :  { %5563 = vmatpush1.bf16.msra.mxu1 %v7786_v36  ;;  %v5230_v58 = vpop.f32.mrf.mxu0  ;;  %5547 = vmatprep.subr.bf16.mxu0 %v7791_v47 }
 0x1c9   :  { %v5271_v61 = vpop.f32.mrf.mxu1  ;;  %5564 = vmatprep.subr.bf16.mxu1 %v7794_v48 }
 0x1ca   :  { %10 = vsyncpa [#allocation3], 0  ;;  %v7795_v17 = vld [vmem:[%s11151_s1 + $0x308] ss:$16 sps:$4 sm:$0xff]   ;;  %v7803_v63 = vld [vmem:[%s11151_s1 + $0x46c] ss:$16 sps:$4 sm:$0xff]  }
 0x1cb   :  { %5548 = vmatpush2.bf16.msra.mxu0 %v7789_v46  ;;  %v7798_v60 = vld [vmem:[%s11151_s1 + $0x488] ss:$16 sps:$4 sm:$0xff]   ;;  %v7806_v2 = vld [vmem:[%s11151_s1 + $0x6ec] ss:$16 sps:$4 sm:$0xff]   ;;  %s8306_s24 = smov [#allocation2]  }
 0x1cc   :  { %5565 = vmatpush1.bf16.msra.mxu1 %v7792_v51  ;;  %5549 = vmatprep.subr.bf16.mxu0 %v7797_v57  ;;  %v7801_v3 = vld [vmem:[%s11151_s1 + $0x468] ss:$16 sps:$4 sm:$0xff]   ;;  %v7809_v7 = vld [vmem:[%s11151_s1 + $0x44c] ss:$16 sps:$4 sm:$0xff]   ;;  %s6233_s25 = sshll.u32 %s8306_s24, 4  ;;  %s6234_s25 = int_to_ptr.vmem [resolvable:$true] %s6233_s25 }
 0x1cd   :  { %5566 = vmatprep.subr.bf16.mxu1 %v7800_v62  ;;  %v7804_v1 = vld [vmem:[%s11151_s1 + $0x6e8] ss:$16 sps:$4 sm:$0xff]   ;;  %v7812_v8 = vld [vmem:[%s11151_s1 + $0x6cc] ss:$16 sps:$4 sm:$0xff]   ;;  %s8282_s26 = scalar_lea.vmem %s6234_s25, 32  ;;  %p8287_p1 = scmp.lt.s32.totalorder %s6234_s25, %s6234_s25 }
 0x1ce   :  { %v7807_v10 = vld [vmem:[%s11151_s1 + $0x448] ss:$16 sps:$4 sm:$0xff]   ;;  %v7815_v49 = vld [vmem:[%s11151_s1 + $0x42c] ss:$16 sps:$4 sm:$0xff]   ;;  %p8283_p0 = scmp.ne.s32.totalorder %s6234_s25, %s8282_s26  ;;  %p8288_p2 = scmp.lt.s32.totalorder %s8282_s26, %s8282_s26 }
 0x1cf   :  { %5550 = vmatpush2.bf16.msra.mxu0 %v7795_v17  ;;  %v7810_v11 = vld [vmem:[%s11151_s1 + $0x6c8] ss:$16 sps:$4 sm:$0xff]   ;;  %v7821_v4 = vld [vmem:[%s11151_s1 + $0x40c] ss:$16 sps:$4 sm:$0xff]  }
 0x1d0   :  { %5567 = vmatpush1.bf16.msra.mxu1 %v7798_v60  ;;  %5601 = vmatprep.subr.bf16.mxu0 %v7806_v2  ;;  %v7813_v16 = vld [vmem:[%s11151_s1 + $0x428] ss:$16 sps:$4 sm:$0xff]   ;;  %v7827_v21 = vld [vmem:[%s11151_s1 + $0x5ec] ss:$16 sps:$4 sm:$0xff]   ;;  %p8289_p3 = por %p8288_p2, %p8287_p1 }
 0x1d1   :  { %5568 = vmatprep.subr.bf16.mxu1 %v7803_v63  ;;  %v7816_v19 = vld [vmem:[%s11151_s1 + $0x6a8] ss:$16 sps:$4 sm:$0xff]   ;;  %v7830_v0 = vld [vmem:[%s11151_s1 + $0x66c] ss:$16 sps:$4 sm:$0xff]  }
 0x1d2   :  { %5552 = vmatmul.mubr.bf16.vlgmr.msra.gmra.mxu0 %v8566_v18  ;;  %v7818_v18 = vld [vmem:[%s11151_s1 + $0x6ac] ss:$16 sps:$4 sm:$0xff]   ;;  %v7819_v5 = vld [vmem:[%s11151_s1 + $0x408] ss:$16 sps:$4 sm:$0xff]   ;;  %p8290_p4 = pnand %p8289_p3, %p8283_p0 }
 0x1d3   :  { %5602 = vmatpush1.bf16.msra.mxu0 %v7804_v1  ;;  %5633 = vmatprep.mubr.bf16.mxu0 %v8582_v23  ;;  %v7824_v23 = vld [vmem:[%s11151_s1 + $0x68c] ss:$16 sps:$4 sm:$0xff]   ;;  %v7822_v20 = vld [vmem:[%s11151_s1 + $0x688] ss:$16 sps:$4 sm:$0xff]  }
 0x1d4   :  { %5569 = vmatpush1.bf16.msra.mxu1 %v7801_v3  ;;  %5603 = vmatprep.subr.bf16.mxu0 %v7812_v8  ;;  %v7825_v28 = vld [vmem:[%s11151_s1 + $0x5e8] ss:$16 sps:$4 sm:$0xff]   ;;  %v7833_v30 = vld [vmem:[%s11151_s1 + $0x5cc] ss:$16 sps:$4 sm:$0xff]  }
 0x1d5   :  { %5570 = vmatprep.subr.bf16.mxu1 %v7809_v7  ;;  %v7828_v29 = vld [vmem:[%s11151_s1 + $0x668] ss:$16 sps:$4 sm:$0xff]   ;;  %v7836_v34 = vld [vmem:[%s11151_s1 + $0x64c] ss:$16 sps:$4 sm:$0xff]  }
 0x1d6   :  { %v7831_v36 = vld [vmem:[%s11151_s1 + $0x5c8] ss:$16 sps:$4 sm:$0xff]   ;;  %v7839_v38 = vld [vmem:[%s11151_s1 + $0x5ac] ss:$16 sps:$4 sm:$0xff]  }
 0x1d7   :  { %5604 = vmatpush1.bf16.msra.mxu0 %v7810_v11  ;;  %v7834_v37 = vld [vmem:[%s11151_s1 + $0x648] ss:$16 sps:$4 sm:$0xff]   ;;  %v7842_v32 = vld [vmem:[%s11151_s1 + $0x62c] ss:$16 sps:$4 sm:$0xff]  }
 0x1d8   :  { %5571 = vmatpush1.bf16.msra.mxu1 %v7807_v10  ;;  %5605 = vmatprep.subr.bf16.mxu0 %v7818_v18  ;;  %v7837_v40 = vld [vmem:[%s11151_s1 + $0x5a8] ss:$16 sps:$4 sm:$0xff]   ;;  %v7845_v47 = vld [vmem:[%s11151_s1 + $0x58c] ss:$16 sps:$4 sm:$0xff]  }
 0x1d9   :  { %5572 = vmatprep.subr.bf16.mxu1 %v7815_v49  ;;  %v7840_v44 = vld [vmem:[%s11151_s1 + $0x628] ss:$16 sps:$4 sm:$0xff]   ;;  %v7848_v48 = vld [vmem:[%s11151_s1 + $0x60c] ss:$16 sps:$4 sm:$0xff]  }
 0x1da   :  { %v7843_v13 = vld [vmem:[%s11151_s1 + $0x588] ss:$16 sps:$4 sm:$0xff]   ;;  %v7851_v51 = vld [vmem:[%s11151_s1 + $0x56c] ss:$16 sps:$4 sm:$0xff]  }
 0x1db   :  { %5606 = vmatpush1.bf16.msra.mxu0 %v7816_v19  ;;  %v7846_v46 = vld [vmem:[%s11151_s1 + $0x608] ss:$16 sps:$4 sm:$0xff]   ;;  %v7854_v56 = vld [vmem:[%s11151_s1 + $0x7ec] ss:$16 sps:$4 sm:$0xff]  }
 0x1dc   :  { %5573 = vmatpush1.bf16.msra.mxu1 %v7813_v16  ;;  %5607 = vmatprep.subr.bf16.mxu0 %v7824_v23  ;;  %v7849_v55 = vld [vmem:[%s11151_s1 + $0x568] ss:$16 sps:$4 sm:$0xff]   ;;  %v7857_v61 = vld [vmem:[%s11151_s1 + $0x54c] ss:$16 sps:$4 sm:$0xff]  }
 0x1dd   :  { %5574 = vmatprep.subr.bf16.mxu1 %v7821_v4  ;;  %v7852_v58 = vld [vmem:[%s11151_s1 + $0x7e8] ss:$16 sps:$4 sm:$0xff]   ;;  %v7860_v57 = vld [vmem:[%s11151_s1 + $0x7cc] ss:$16 sps:$4 sm:$0xff]  }
 0x1de   :  { %v7855_v62 = vld [vmem:[%s11151_s1 + $0x548] ss:$16 sps:$4 sm:$0xff]   ;;  %v7863_v60 = vld [vmem:[%s11151_s1 + $0x52c] ss:$16 sps:$4 sm:$0xff]  }
 0x1df   :  { %5608 = vmatpush1.bf16.msra.mxu0 %v7822_v20  ;;  %v7858_v17 = vld [vmem:[%s11151_s1 + $0x7c8] ss:$16 sps:$4 sm:$0xff]   ;;  %v7866_v63 = vld [vmem:[%s11151_s1 + $0x7ac] ss:$16 sps:$4 sm:$0xff]  }
 0x1e0   :  { %5575 = vmatpush1.bf16.msra.mxu1 %v7819_v5  ;;  %5609 = vmatprep.subr.bf16.mxu0 %v7830_v0  ;;  %v7861_v2 = vld [vmem:[%s11151_s1 + $0x528] ss:$16 sps:$4 sm:$0xff]   ;;  %v7869_v1 = vld [vmem:[%s11151_s1 + $0x50c] ss:$16 sps:$4 sm:$0xff]  }
 0x1e1   :  { %5576 = vmatprep.subr.bf16.mxu1 %v7827_v21  ;;  %v7864_v3 = vld [vmem:[%s11151_s1 + $0x7a8] ss:$16 sps:$4 sm:$0xff]   ;;  %v7872_v7 = vld [vmem:[%s11151_s1 + $0x78c] ss:$16 sps:$4 sm:$0xff]  }
 0x1e2   :  { %v7867_v8 = vld [vmem:[%s11151_s1 + $0x508] ss:$16 sps:$4 sm:$0xff]   ;;  %v7875_v11 = vld [vmem:[%s11151_s1 + $0x76c] ss:$16 sps:$4 sm:$0xff]  }
 0x1e3   :  { %5610 = vmatpush1.bf16.msra.mxu0 %v7828_v29  ;;  %v7870_v10 = vld [vmem:[%s11151_s1 + $0x788] ss:$16 sps:$4 sm:$0xff]   ;;  %v7878_v49 = vld [vmem:[%s11151_s1 + $0x8ec] ss:$16 sps:$4 sm:$0xff]  }
 0x1e4   :  { %5577 = vmatpush2.bf16.msra.mxu1 %v7825_v28  ;;  %5611 = vmatprep.subr.bf16.mxu0 %v7836_v34  ;;  %v7873_v18 = vld [vmem:[%s11151_s1 + $0x768] ss:$16 sps:$4 sm:$0xff]   ;;  %v7881_v19 = vld [vmem:[%s11151_s1 + $0x74c] ss:$16 sps:$4 sm:$0xff]  }
 0x1e5   :  { %5578 = vmatprep.subr.bf16.mxu1 %v7833_v30  ;;  %v7876_v16 = vld [vmem:[%s11151_s1 + $0x8e8] ss:$16 sps:$4 sm:$0xff]   ;;  %v7884_v4 = vld [vmem:[%s11151_s1 + $0x8cc] ss:$16 sps:$4 sm:$0xff]  }
 0x1e6   :  { %v7879_v21 = vld [vmem:[%s11151_s1 + $0x748] ss:$16 sps:$4 sm:$0xff]  }
 0x1e7   :  { %5612 = vmatpush1.bf16.msra.mxu0 %v7834_v37  ;;  %v7882_v0 = vld [vmem:[%s11151_s1 + $0x8c8] ss:$16 sps:$4 sm:$0xff]  }
 0x1e8   :  { %5579 = vmatpush2.bf16.msra.mxu1 %v7831_v36  ;;  %5613 = vmatprep.subr.bf16.mxu0 %v7842_v32  ;;  %v7885_v32 = vld [vmem:[%s11151_s1 + $0x728] ss:$16 sps:$4 sm:$0xff]  }
 0x1e9   :  { %5580 = vmatprep.subr.bf16.mxu1 %v7839_v38 }
 0x1eb   :  { %5614 = vmatpush1.bf16.msra.mxu0 %v7840_v44 }
 0x1ec   :  { %5581 = vmatpush2.bf16.msra.mxu1 %v7837_v40  ;;  %5615 = vmatprep.subr.bf16.mxu0 %v7848_v48  ;;  %v7888_v40 = vld [vmem:[%s11151_s1 + $0x8a8] ss:$16 sps:$4 sm:$0xff]  }
 0x1ed   :  { %5582 = vmatprep.subr.bf16.mxu1 %v7845_v47  ;;  %v7891_v48 = vld [vmem:[%s11151_s1 + $0x708] ss:$16 sps:$4 sm:$0xff]  }
 0x1ef   :  { %5616 = vmatpush1.bf16.msra.mxu0 %v7846_v46  ;;  %v7899_v46 = vld [vmem:[%s11151_s1 + $0x86c] ss:$16 sps:$4 sm:$0xff]  }
 0x1f0   :  { %5583 = vmatpush2.bf16.msra.mxu1 %v7843_v13  ;;  %5617 = vmatprep.subr.bf16.mxu0 %v7854_v56  ;;  %v7894_v13 = vld [vmem:[%s11151_s1 + $0x888] ss:$16 sps:$4 sm:$0xff]  }
 0x1f1   :  { %5584 = vmatprep.subr.bf16.mxu1 %v7851_v51  ;;  %v7902_v51 = vld [vmem:[%s11151_s1 + $0xaec] ss:$16 sps:$4 sm:$0xff]   ;;  %v7897_v56 = vld [vmem:[%s11151_s1 + $0x868] ss:$16 sps:$4 sm:$0xff]  }
 0x1f3   :  { %5618 = vmatpush2.bf16.msra.mxu0 %v7852_v58  ;;  %v7905_v58 = vld [vmem:[%s11151_s1 + $0x84c] ss:$16 sps:$4 sm:$0xff]  }
 0x1f4   :  { %5585 = vmatpush2.bf16.msra.mxu1 %v7849_v55  ;;  %5619 = vmatprep.subr.bf16.mxu0 %v7860_v57  ;;  %v7900_v55 = vld [vmem:[%s11151_s1 + $0xae8] ss:$16 sps:$4 sm:$0xff]  }
 0x1f5   :  { %5586 = vmatprep.subr.bf16.mxu1 %v7857_v61  ;;  %v7908_v61 = vld [vmem:[%s11151_s1 + $0xacc] ss:$16 sps:$4 sm:$0xff]   ;;  %v7903_v57 = vld [vmem:[%s11151_s1 + $0x848] ss:$16 sps:$4 sm:$0xff]  }
 0x1f7   :  { %5620 = vmatpush2.bf16.msra.mxu0 %v7858_v17  ;;  %v7911_v17 = vld [vmem:[%s11151_s1 + $0x82c] ss:$16 sps:$4 sm:$0xff]  }
 0x1f8   :  { %5587 = vmatpush2.bf16.msra.mxu1 %v7855_v62  ;;  %5621 = vmatprep.subr.bf16.mxu0 %v7866_v63  ;;  %v7906_v62 = vld [vmem:[%s11151_s1 + $0xac8] ss:$16 sps:$4 sm:$0xff]  }
 0x1f9   :  { %5588 = vmatprep.subr.bf16.mxu1 %v7863_v60  ;;  %v7909_v60 = vld [vmem:[%s11151_s1 + $0x828] ss:$16 sps:$4 sm:$0xff]  }
 0x1fa   :  { %v7912_v63 = vld [vmem:[%s11151_s1 + $0xaa8] ss:$16 sps:$4 sm:$0xff]  }
 0x1fb   :  { %5622 = vmatpush2.bf16.msra.mxu0 %v7864_v3  ;;  %v7915_v3 = vld [vmem:[%s11151_s1 + $0x808] ss:$16 sps:$4 sm:$0xff]  }
 0x1fc   :  { %5589 = vmatpush2.bf16.msra.mxu1 %v7861_v2  ;;  %5623 = vmatprep.subr.bf16.mxu0 %v7872_v7  ;;  %v7917_v2 = vld [vmem:[%s11151_s1 + $0x80c] ss:$16 sps:$4 sm:$0xff]  }
 0x1fd   :  { %5590 = vmatprep.subr.bf16.mxu1 %v7869_v1  ;;  %v7918_v1 = vld [vmem:[%s11151_s1 + $0xa88] ss:$16 sps:$4 sm:$0xff]   ;;  %v7923_v7 = vld [vmem:[%s11151_s1 + $0x9ec] ss:$16 sps:$4 sm:$0xff]  }
 0x1ff   :  { %5624 = vmatpush2.bf16.msra.mxu0 %v7870_v10  ;;  %v7921_v10 = vld [vmem:[%s11151_s1 + $0x9e8] ss:$16 sps:$4 sm:$0xff]  }
 0x200   :  { %5591 = vmatpush2.bf16.msra.mxu1 %v7867_v8  ;;  %5625 = vmatprep.subr.bf16.mxu0 %v7875_v11  ;;  %v7926_v8 = vld [vmem:[%s11151_s1 + $0xa6c] ss:$16 sps:$4 sm:$0xff]   ;;  %v7924_v11 = vld [vmem:[%s11151_s1 + $0xa68] ss:$16 sps:$4 sm:$0xff]  }
 0x201   :  { %5642 = vmatprep.subr.bf16.mxu1 %v7878_v49  ;;  %v7929_v49 = vld [vmem:[%s11151_s1 + $0x9cc] ss:$16 sps:$4 sm:$0xff]  }
 0x202   :  { %v5307_v23 = vpop.f32.mrf.mxu0 }
 0x203   :  { %v5348_v5 = vpop.f32.mrf.mxu1  ;;  %5593 = vmatmul.mubr.bf16.vlgmr.msra.gmra.mxu1 %v8761_v26  ;;  %v5308_v20 = vadd.f32 %v5307_v23, %v9908_v45  ;;  %5626 = vmatpush2.bf16.msra.mxu0 %v7873_v18  ;;  %v7887_v26 = vld [vmem:[%s11151_s1 + $0x72c] ss:$16 sps:$4 sm:$0xff]  }
 0x204   :  { %5643 = vmatpush1.bf16.msra.mxu1 %v7876_v16  ;;  %v5309_v28 = vpop.f32.mrf.mxu0  ;;  %5627 = vmatprep.subr.bf16.mxu0 %v7881_v19  ;;  %v7890_v45 = vld [vmem:[%s11151_s1 + $0x8ac] ss:$16 sps:$4 sm:$0xff]   ;;  %v7927_v16 = vld [vmem:[%s11151_s1 + $0x9c8] ss:$16 sps:$4 sm:$0xff]  }
 0x205   :  { %v5350_v29 = vpop.f32.mrf.mxu1  ;;  %5644 = vmatprep.subr.bf16.mxu1 %v7884_v4  ;;  %v10110_v30 = vadd.f32 %v5348_v5, %v5308_v20  ;;  %v5310_v34 = vadd.f32 %v5309_v28, %v9918_v53  ;;  %5674 = vmatprep.mubr.bf16.mxu1 %v8814_v41  ;;  %v7893_v41 = vld [vmem:[%s11151_s1 + $0x70c] ss:$16 sps:$4 sm:$0xff]   ;;  %v7930_v19 = vld [vmem:[%s11151_s1 + $0xa48] ss:$16 sps:$4 sm:$0xff]  }
 0x206   :  { %v5311_v36 = vpop.f32.mrf.mxu0  ;;  %v7896_v53 = vld [vmem:[%s11151_s1 + $0x88c] ss:$16 sps:$4 sm:$0xff]   ;;  %v7933_v5 = vld [vmem:[%s11151_s1 + $0x9a8] ss:$16 sps:$4 sm:$0xff]  }
 0x207   :  { %v5352_v37 = vpop.f32.mrf.mxu1  ;;  %v10114_v38 = vadd.f32 %v5350_v29, %v5310_v34  ;;  %5628 = vmatpush2.bf16.msra.mxu0 %v7879_v21  ;;  %v7932_v18 = vld [vmem:[%s11151_s1 + $0xa4c] ss:$16 sps:$4 sm:$0xff]   ;;  %v7936_v20 = vld [vmem:[%s11151_s1 + $0xa28] ss:$16 sps:$4 sm:$0xff]  }
 0x208   :  { %5645 = vmatpush1.bf16.msra.mxu1 %v7882_v0  ;;  %v5312_v44 = vpop.f32.mrf.mxu0  ;;  %5629 = vmatprep.subr.bf16.mxu0 %v7887_v26  ;;  %v7935_v4 = vld [vmem:[%s11151_s1 + $0x9ac] ss:$16 sps:$4 sm:$0xff]   ;;  %v7939_v28 = vld [vmem:[%s11151_s1 + $0x988] ss:$16 sps:$4 sm:$0xff]  }
 0x209   :  { %v5353_v47 = vpop.f32.mrf.mxu1  ;;  %5646 = vmatprep.subr.bf16.mxu1 %v7890_v45  ;;  %v7938_v23 = vld [vmem:[%s11151_s1 + $0xa2c] ss:$16 sps:$4 sm:$0xff]   ;;  %v7942_v29 = vld [vmem:[%s11151_s1 + $0xa08] ss:$16 sps:$4 sm:$0xff]  }
 0x20a   :  { %v7941_v21 = vld [vmem:[%s11151_s1 + $0x98c] ss:$16 sps:$4 sm:$0xff]   ;;  %v7945_v34 = vld [vmem:[%s11151_s1 + $0x968] ss:$16 sps:$4 sm:$0xff]  }
 0x20b   :  { %5630 = vmatpush2.bf16.msra.mxu0 %v7885_v32  ;;  %v7944_v0 = vld [vmem:[%s11151_s1 + $0xa0c] ss:$16 sps:$4 sm:$0xff]   ;;  %v7948_v36 = vld [vmem:[%s11151_s1 + $0xbe8] ss:$16 sps:$4 sm:$0xff]  }
 0x20c   :  { %5647 = vmatpush1.bf16.msra.mxu1 %v7888_v40  ;;  %5631 = vmatprep.subr.bf16.mxu0 %v7893_v41  ;;  %v7947_v26 = vld [vmem:[%s11151_s1 + $0x96c] ss:$16 sps:$4 sm:$0xff]   ;;  %v7951_v40 = vld [vmem:[%s11151_s1 + $0x948] ss:$16 sps:$4 sm:$0xff]  }
 0x20d   :  { %5648 = vmatprep.subr.bf16.mxu1 %v7896_v53  ;;  %v7950_v45 = vld [vmem:[%s11151_s1 + $0xbec] ss:$16 sps:$4 sm:$0xff]   ;;  %v7954_v44 = vld [vmem:[%s11151_s1 + $0xbc8] ss:$16 sps:$4 sm:$0xff]  }
 0x20e   :  { %v7953_v37 = vld [vmem:[%s11151_s1 + $0x94c] ss:$16 sps:$4 sm:$0xff]   ;;  %v7957_v53 = vld [vmem:[%s11151_s1 + $0x928] ss:$16 sps:$4 sm:$0xff]  }
 0x20f   :  { %5632 = vmatpush2.bf16.msra.mxu0 %v7891_v48  ;;  %v7956_v32 = vld [vmem:[%s11151_s1 + $0xbcc] ss:$16 sps:$4 sm:$0xff]   ;;  %v7960_v48 = vld [vmem:[%s11151_s1 + $0xba8] ss:$16 sps:$4 sm:$0xff]  }
 0x210   :  { %5649 = vmatpush1.bf16.msra.mxu1 %v7894_v13  ;;  %5683 = vmatprep.subr.bf16.mxu0 %v7902_v51  ;;  %v7959_v47 = vld [vmem:[%s11151_s1 + $0x92c] ss:$16 sps:$4 sm:$0xff]   ;;  %v7963_v51 = vld [vmem:[%s11151_s1 + $0x908] ss:$16 sps:$4 sm:$0xff]  }
 0x211   :  { %5650 = vmatprep.subr.bf16.mxu1 %v7899_v46  ;;  %v7962_v41 = vld [vmem:[%s11151_s1 + $0xbac] ss:$16 sps:$4 sm:$0xff]  }
 0x212   :  { %5634 = vmatmul.mubr.bf16.vlgmr.msra.gmra.mxu0 %v8774_v6  ;;  %v7914_v6 = vld [vmem:[%s11151_s1 + $0xaac] ss:$16 sps:$4 sm:$0xff]  }
 0x213   :  { %5684 = vmatpush1.bf16.msra.mxu0 %v7900_v55  ;;  %5715 = vmatprep.mubr.bf16.mxu0 %v8819_v43  ;;  %v7920_v43 = vld [vmem:[%s11151_s1 + $0xa8c] ss:$16 sps:$4 sm:$0xff]  }
 0x214   :  { %5651 = vmatpush1.bf16.msra.mxu1 %v7897_v56  ;;  %5685 = vmatprep.subr.bf16.mxu0 %v7908_v61  ;;  %v7965_v13 = vld [vmem:[%s11151_s1 + $0x90c] ss:$16 sps:$4 sm:$0xff]   ;;  %v7966_v56 = vld [vmem:[%s11151_s1 + $0xb88] ss:$16 sps:$4 sm:$0xff]  }
 0x215   :  { %5652 = vmatprep.subr.bf16.mxu1 %v7905_v58  ;;  %v7968_v46 = vld [vmem:[%s11151_s1 + $0xb8c] ss:$16 sps:$4 sm:$0xff]   ;;  %v7969_v61 = vld [vmem:[%s11151_s1 + $0xb68] ss:$16 sps:$4 sm:$0xff]  }
 0x216   :  { %v7971_v55 = vld [vmem:[%s11151_s1 + $0xb6c] ss:$16 sps:$4 sm:$0xff]  }
 0x217   :  { %5686 = vmatpush1.bf16.msra.mxu0 %v7906_v62  ;;  %v7974_v58 = vld [vmem:[%s11151_s1 + $0xcec] ss:$16 sps:$4 sm:$0xff]  }
 0x218   :  { %5653 = vmatpush1.bf16.msra.mxu1 %v7903_v57  ;;  %5687 = vmatprep.subr.bf16.mxu0 %v7914_v6  ;;  %v7972_v57 = vld [vmem:[%s11151_s1 + $0xce8] ss:$16 sps:$4 sm:$0xff]   ;;  %v7977_v62 = vld [vmem:[%s11151_s1 + $0xb4c] ss:$16 sps:$4 sm:$0xff]  }
 0x219   :  { %5654 = vmatprep.subr.bf16.mxu1 %v7911_v17  ;;  %v7980_v17 = vld [vmem:[%s11151_s1 + $0xccc] ss:$16 sps:$4 sm:$0xff]  }
 0x21b   :  { %5688 = vmatpush1.bf16.msra.mxu0 %v7912_v63 }
 0x21c   :  { %5655 = vmatpush1.bf16.msra.mxu1 %v7909_v60  ;;  %5689 = vmatprep.subr.bf16.mxu0 %v7920_v43  ;;  %v7978_v43 = vld [vmem:[%s11151_s1 + $0xcc8] ss:$16 sps:$4 sm:$0xff]  }
 0x21d   :  { %5656 = vmatprep.subr.bf16.mxu1 %v7917_v2  ;;  %v7975_v2 = vld [vmem:[%s11151_s1 + $0xb48] ss:$16 sps:$4 sm:$0xff]  }
 0x21f   :  { %5690 = vmatpush1.bf16.msra.mxu0 %v7918_v1 }
 0x220   :  { %5657 = vmatpush1.bf16.msra.mxu1 %v7915_v3  ;;  %5691 = vmatprep.subr.bf16.mxu0 %v7926_v8 }
 0x221   :  { %5658 = vmatprep.subr.bf16.mxu1 %v7923_v7 }
 0x223   :  { %5692 = vmatpush1.bf16.msra.mxu0 %v7924_v11 }
 0x224   :  { %5659 = vmatpush2.bf16.msra.mxu1 %v7921_v10  ;;  %5693 = vmatprep.subr.bf16.mxu0 %v7932_v18  ;;  %v7981_v18 = vld [vmem:[%s11151_s1 + $0xb28] ss:$16 sps:$4 sm:$0xff]  }
 0x225   :  { %5660 = vmatprep.subr.bf16.mxu1 %v7929_v49 }
 0x227   :  { %5694 = vmatpush1.bf16.msra.mxu0 %v7930_v19 }
 0x228   :  { %5661 = vmatpush2.bf16.msra.mxu1 %v7927_v16  ;;  %5695 = vmatprep.subr.bf16.mxu0 %v7938_v23  ;;  %v7984_v16 = vld [vmem:[%s11151_s1 + $0xca8] ss:$16 sps:$4 sm:$0xff]  }
 0x229   :  { %5662 = vmatprep.subr.bf16.mxu1 %v7935_v4  ;;  %v7987_v23 = vld [vmem:[%s11151_s1 + $0xb08] ss:$16 sps:$4 sm:$0xff]  }
 0x22b   :  { %5696 = vmatpush1.bf16.msra.mxu0 %v7936_v20  ;;  %v7995_v20 = vld [vmem:[%s11151_s1 + $0xc6c] ss:$16 sps:$4 sm:$0xff]  }
 0x22c   :  { %5663 = vmatpush2.bf16.msra.mxu1 %v7933_v5  ;;  %5697 = vmatprep.subr.bf16.mxu0 %v7944_v0  ;;  %v7990_v5 = vld [vmem:[%s11151_s1 + $0xc88] ss:$16 sps:$4 sm:$0xff]  }
 0x22d   :  { %5664 = vmatprep.subr.bf16.mxu1 %v7941_v21  ;;  %v7998_v21 = vld [vmem:[%s11151_s1 + $0xeec] ss:$16 sps:$4 sm:$0xff]   ;;  %v7993_v0 = vld [vmem:[%s11151_s1 + $0xc68] ss:$16 sps:$4 sm:$0xff]  }
 0x22f   :  { %5698 = vmatpush1.bf16.msra.mxu0 %v7942_v29  ;;  %v8001_v29 = vld [vmem:[%s11151_s1 + $0xc4c] ss:$16 sps:$4 sm:$0xff]  }
 0x230   :  { %5665 = vmatpush2.bf16.msra.mxu1 %v7939_v28  ;;  %5699 = vmatprep.subr.bf16.mxu0 %v7950_v45  ;;  %v7996_v28 = vld [vmem:[%s11151_s1 + $0xee8] ss:$16 sps:$4 sm:$0xff]  }
 0x231   :  { %5666 = vmatprep.subr.bf16.mxu1 %v7947_v26  ;;  %v8004_v26 = vld [vmem:[%s11151_s1 + $0xecc] ss:$16 sps:$4 sm:$0xff]  }
 0x233   :  { %5700 = vmatpush2.bf16.msra.mxu0 %v7948_v36  ;;  %v7999_v36 = vld [vmem:[%s11151_s1 + $0xc48] ss:$16 sps:$4 sm:$0xff]  }
 0x234   :  { %5667 = vmatpush2.bf16.msra.mxu1 %v7945_v34  ;;  %5701 = vmatprep.subr.bf16.mxu0 %v7956_v32 }
 0x235   :  { %5668 = vmatprep.subr.bf16.mxu1 %v7953_v37  ;;  %v8002_v37 = vld [vmem:[%s11151_s1 + $0xec8] ss:$16 sps:$4 sm:$0xff]  }
 0x237   :  { %5702 = vmatpush2.bf16.msra.mxu0 %v7954_v44 }
 0x238   :  { %5669 = vmatpush2.bf16.msra.mxu1 %v7951_v40  ;;  %5703 = vmatprep.subr.bf16.mxu0 %v7962_v41  ;;  %v8007_v40 = vld [vmem:[%s11151_s1 + $0xc2c] ss:$16 sps:$4 sm:$0xff]   ;;  %v8005_v41 = vld [vmem:[%s11151_s1 + $0xc28] ss:$16 sps:$4 sm:$0xff]  }
 0x239   :  { %5670 = vmatprep.subr.bf16.mxu1 %v7959_v47 }
 0x23b   :  { %5704 = vmatpush2.bf16.msra.mxu0 %v7960_v48 }
 0x23c   :  { %5671 = vmatpush2.bf16.msra.mxu1 %v7957_v53  ;;  %5705 = vmatprep.subr.bf16.mxu0 %v7968_v46  ;;  %v8008_v53 = vld [vmem:[%s11151_s1 + $0xea8] ss:$16 sps:$4 sm:$0xff]  }
 0x23d   :  { %5672 = vmatprep.subr.bf16.mxu1 %v7965_v13  ;;  %v8013_v13 = vld [vmem:[%s11151_s1 + $0xc0c] ss:$16 sps:$4 sm:$0xff]   ;;  %v8011_v46 = vld [vmem:[%s11151_s1 + $0xc08] ss:$16 sps:$4 sm:$0xff]  }
 0x23f   :  { %5706 = vmatpush2.bf16.msra.mxu0 %v7966_v56  ;;  %v8019_v56 = vld [vmem:[%s11151_s1 + $0xdec] ss:$16 sps:$4 sm:$0xff]  }
 0x240   :  { %5673 = vmatpush2.bf16.msra.mxu1 %v7963_v51  ;;  %5707 = vmatprep.subr.bf16.mxu0 %v7971_v55  ;;  %v8014_v51 = vld [vmem:[%s11151_s1 + $0xe88] ss:$16 sps:$4 sm:$0xff]   ;;  %v8022_v55 = vld [vmem:[%s11151_s1 + $0xe6c] ss:$16 sps:$4 sm:$0xff]  }
 0x241   :  { %5724 = vmatprep.subr.bf16.mxu1 %v7974_v58  ;;  %v8017_v58 = vld [vmem:[%s11151_s1 + $0xde8] ss:$16 sps:$4 sm:$0xff]  }
 0x242   :  { %v5389_v6 = vpop.f32.mrf.mxu0 }
 0x243   :  { %v5430_v60 = vpop.f32.mrf.mxu1  ;;  %5675 = vmatmul.mubr.bf16.vlgmr.msra.gmra.mxu1 %v8990_v50  ;;  %v5390_v63 = vadd.f32 %v5389_v6, %v10110_v30  ;;  %5708 = vmatpush2.bf16.msra.mxu0 %v7969_v61  ;;  %v7983_v50 = vld [vmem:[%s11151_s1 + $0xb2c] ss:$16 sps:$4 sm:$0xff]   ;;  %v8020_v61 = vld [vmem:[%s11151_s1 + $0xe68] ss:$16 sps:$4 sm:$0xff]  }
 0x244   :  { %5725 = vmatpush1.bf16.msra.mxu1 %v7972_v57  ;;  %v5391_v3 = vpop.f32.mrf.mxu0  ;;  %5709 = vmatprep.subr.bf16.mxu0 %v7977_v62  ;;  %v7986_v30 = vld [vmem:[%s11151_s1 + $0xcac] ss:$16 sps:$4 sm:$0xff]   ;;  %v8026_v6 = vld [vmem:[%s11151_s1 + $0xe48] ss:$16 sps:$4 sm:$0xff]  }
 0x245   :  { %v5432_v1 = vpop.f32.mrf.mxu1  ;;  %5726 = vmatprep.subr.bf16.mxu1 %v7980_v17  ;;  %v5431_v7 = vadd.f32 %v5430_v60, %v5390_v63  ;;  %v5392_v8 = vadd.f32 %v5391_v3, %v10114_v38  ;;  %5756 = vmatprep.mubr.bf16.mxu1 %v9002_v54  ;;  %v7989_v54 = vld [vmem:[%s11151_s1 + $0xb0c] ss:$16 sps:$4 sm:$0xff]   ;;  %v8023_v17 = vld [vmem:[%s11151_s1 + $0xdc8] ss:$16 sps:$4 sm:$0xff]  }
 0x246   :  { %v5393_v10 = vpop.f32.mrf.mxu0  ;;  %v7992_v38 = vld [vmem:[%s11151_s1 + $0xc8c] ss:$16 sps:$4 sm:$0xff]  }
 0x247   :  { %v5434_v11 = vpop.f32.mrf.mxu1  ;;  %v5433_v49 = vadd.f32 %v5432_v1, %v5392_v8  ;;  %5710 = vmatpush2.bf16.msra.mxu0 %v7975_v2  ;;  %v8025_v57 = vld [vmem:[%s11151_s1 + $0xdcc] ss:$16 sps:$4 sm:$0xff]   ;;  %v8029_v2 = vld [vmem:[%s11151_s1 + $0xda8] ss:$16 sps:$4 sm:$0xff]  }
 0x248   :  { %5727 = vmatpush1.bf16.msra.mxu1 %v7978_v43  ;;  %v5394_v19 = vpop.f32.mrf.mxu0  ;;  %5711 = vmatprep.subr.bf16.mxu0 %v7983_v50  ;;  %v8028_v62 = vld [vmem:[%s11151_s1 + $0xe4c] ss:$16 sps:$4 sm:$0xff]   ;;  %v8032_v43 = vld [vmem:[%s11151_s1 + $0xe28] ss:$16 sps:$4 sm:$0xff]  }
 0x249   :  { %v5435_v4 = vpop.f32.mrf.mxu1  ;;  %5728 = vmatprep.subr.bf16.mxu1 %v7986_v30  ;;  %v8031_v60 = vld [vmem:[%s11151_s1 + $0xdac] ss:$16 sps:$4 sm:$0xff]   ;;  %v8035_v50 = vld [vmem:[%s11151_s1 + $0xd88] ss:$16 sps:$4 sm:$0xff]  }
 0x24a   :  { %v8034_v63 = vld [vmem:[%s11151_s1 + $0xe2c] ss:$16 sps:$4 sm:$0xff]   ;;  %v8038_v30 = vld [vmem:[%s11151_s1 + $0xe08] ss:$16 sps:$4 sm:$0xff]  }
 0x24b   :  { %5712 = vmatpush2.bf16.msra.mxu0 %v7981_v18  ;;  %v8037_v3 = vld [vmem:[%s11151_s1 + $0xd8c] ss:$16 sps:$4 sm:$0xff]   ;;  %v8041_v10 = vld [vmem:[%s11151_s1 + $0xd68] ss:$16 sps:$4 sm:$0xff]  }
 0x24c   :  { %5729 = vmatpush1.bf16.msra.mxu1 %v7984_v16  ;;  %5713 = vmatprep.subr.bf16.mxu0 %v7989_v54  ;;  %v8040_v1 = vld [vmem:[%s11151_s1 + $0xe0c] ss:$16 sps:$4 sm:$0xff]   ;;  %v8044_v11 = vld [vmem:[%s11151_s1 + $0xfe8] ss:$16 sps:$4 sm:$0xff]  }
 0x24d   :  { %5730 = vmatprep.subr.bf16.mxu1 %v7992_v38  ;;  %v8046_v8 = vld [vmem:[%s11151_s1 + $0xfec] ss:$16 sps:$4 sm:$0xff]   ;;  %v8047_v16 = vld [vmem:[%s11151_s1 + $0xd48] ss:$16 sps:$4 sm:$0xff]  }
 0x24e   :  { %v8052_v18 = vld [vmem:[%s11151_s1 + $0xfcc] ss:$16 sps:$4 sm:$0xff]   ;;  %v8050_v19 = vld [vmem:[%s11151_s1 + $0xfc8] ss:$16 sps:$4 sm:$0xff]  }
 0x24f   :  { %5714 = vmatpush2.bf16.msra.mxu0 %v7987_v23  ;;  %v8055_v4 = vld [vmem:[%s11151_s1 + $0xd2c] ss:$16 sps:$4 sm:$0xff]   ;;  %v8053_v38 = vld [vmem:[%s11151_s1 + $0xd28] ss:$16 sps:$4 sm:$0xff]  }
 0x250   :  { %5731 = vmatpush1.bf16.msra.mxu1 %v7990_v5  ;;  %5765 = vmatprep.subr.bf16.mxu0 %v7998_v21  ;;  %v8058_v54 = vld [vmem:[%s11151_s1 + $0xfac] ss:$16 sps:$4 sm:$0xff]   ;;  %v8056_v23 = vld [vmem:[%s11151_s1 + $0xfa8] ss:$16 sps:$4 sm:$0xff]  }
 0x251   :  { %5732 = vmatprep.subr.bf16.mxu1 %v7995_v20  ;;  %v8061_v5 = vld [vmem:[%s11151_s1 + $0xd0c] ss:$16 sps:$4 sm:$0xff]   ;;  %v8059_v21 = vld [vmem:[%s11151_s1 + $0xd08] ss:$16 sps:$4 sm:$0xff]  }
 0x252   :  { %v5471_v45 = vpop.f32.mrf.mxu0  ;;  %5716 = vmatmul.mubr.bf16.vlgmr.msra.gmra.mxu0 %v9006_v35  ;;  %v8010_v35 = vld [vmem:[%s11151_s1 + $0xeac] ss:$16 sps:$4 sm:$0xff]  }
 0x253   :  { %v10351_v34 = vadd.f32 %v5471_v45, %v5431_v7  ;;  %5766 = vmatpush1.bf16.msra.mxu0 %v7996_v28  ;;  %5797 = vmatprep.mubr.bf16.mxu0 %v9022_v59  ;;  %v8016_v59 = vld [vmem:[%s11151_s1 + $0xe8c] ss:$16 sps:$4 sm:$0xff]   ;;  %v8068_v45 = vld [vmem:[%s11151_s1 + $0x10e8] ss:$16 sps:$4 sm:$0xff]  }
 0x254   :  { %5733 = vmatpush1.bf16.msra.mxu1 %v7993_v0  ;;  %v5473_v32 = vpop.f32.mrf.mxu0  ;;  %5767 = vmatprep.subr.bf16.mxu0 %v8004_v26  ;;  %v8043_v7 = vld [vmem:[%s11151_s1 + $0xd6c] ss:$16 sps:$4 sm:$0xff]   ;;  %v8062_v0 = vld [vmem:[%s11151_s1 + $0xf88] ss:$16 sps:$4 sm:$0xff]  }
 0x255   :  { %5734 = vmatprep.subr.bf16.mxu1 %v8001_v29  ;;  %v10365_v44 = vadd.f32 %v5473_v32, %v5433_v49  ;;  %v8049_v49 = vld [vmem:[%s11151_s1 + $0xd4c] ss:$16 sps:$4 sm:$0xff]   ;;  %v8065_v26 = vld [vmem:[%s11151_s1 + $0xf68] ss:$16 sps:$4 sm:$0xff]  }
 0x256   :  { %v5475_v47 = vpop.f32.mrf.mxu0  ;;  %v8064_v20 = vld [vmem:[%s11151_s1 + $0xf8c] ss:$16 sps:$4 sm:$0xff]  }
 0x257   :  { %5768 = vmatpush1.bf16.msra.mxu0 %v8002_v37  ;;  %v8067_v28 = vld [vmem:[%s11151_s1 + $0xf6c] ss:$16 sps:$4 sm:$0xff]  }
 0x258   :  { %5735 = vmatpush1.bf16.msra.mxu1 %v7999_v36  ;;  %v5476_v48 = vpop.f32.mrf.mxu0  ;;  %5769 = vmatprep.subr.bf16.mxu0 %v8010_v35  ;;  %v8070_v29 = vld [vmem:[%s11151_s1 + $0x10ec] ss:$16 sps:$4 sm:$0xff]   ;;  %v8074_v35 = vld [vmem:[%s11151_s1 + $0x10c8] ss:$16 sps:$4 sm:$0xff]  }
 0x259   :  { %5736 = vmatprep.subr.bf16.mxu1 %v8007_v40  ;;  %v8073_v36 = vld [vmem:[%s11151_s1 + $0xf4c] ss:$16 sps:$4 sm:$0xff]   ;;  %v8071_v40 = vld [vmem:[%s11151_s1 + $0xf48] ss:$16 sps:$4 sm:$0xff]  }
 0x25a   :  { %v8076_v37 = vld [vmem:[%s11151_s1 + $0x10cc] ss:$16 sps:$4 sm:$0xff]   ;;  %v8077_v48 = vld [vmem:[%s11151_s1 + $0xf28] ss:$16 sps:$4 sm:$0xff]  }
 0x25b   :  { %5770 = vmatpush1.bf16.msra.mxu0 %v8008_v53 }
 0x25c   :  { %5737 = vmatpush1.bf16.msra.mxu1 %v8005_v41  ;;  %5771 = vmatprep.subr.bf16.mxu0 %v8016_v59  ;;  %v8079_v41 = vld [vmem:[%s11151_s1 + $0xf2c] ss:$16 sps:$4 sm:$0xff]  }
 0x25d   :  { %5738 = vmatprep.subr.bf16.mxu1 %v8013_v13  ;;  %v8080_v13 = vld [vmem:[%s11151_s1 + $0x10a8] ss:$16 sps:$4 sm:$0xff]  }
 0x25f   :  { %5772 = vmatpush1.bf16.msra.mxu0 %v8014_v51  ;;  %v822_v51 = vsub.s32 2, %v8454_v42 }
 0x260   :  { %5739 = vmatpush1.bf16.msra.mxu1 %v8011_v46  ;;  %5773 = vmatprep.subr.bf16.mxu0 %v8022_v55  ;;  %v8085_v46 = vld [vmem:[%s11151_s1 + $0xf0c] ss:$16 sps:$4 sm:$0xff]   ;;  %v8083_v55 = vld [vmem:[%s11151_s1 + $0xf08] ss:$16 sps:$4 sm:$0xff]  }
 0x261   :  { %5740 = vmatprep.subr.bf16.mxu1 %v8019_v56  ;;  %v826_v56 = vsub.s32 3, %v8454_v42  ;;  %v8094_v42 = vld [vmem:[%s11151_s1 + $0x12ec] ss:$16 sps:$4 sm:$0xff]  }
 0x263   :  { %5774 = vmatpush1.bf16.msra.mxu0 %v8020_v61  ;;  %v8091_v61 = vld [vmem:[%s11151_s1 + $0x106c] ss:$16 sps:$4 sm:$0xff]  }
 0x264   :  { %5741 = vmatpush2.bf16.msra.mxu1 %v8017_v58  ;;  %5775 = vmatprep.subr.bf16.mxu0 %v8028_v62  ;;  %v8086_v58 = vld [vmem:[%s11151_s1 + $0x1088] ss:$16 sps:$4 sm:$0xff]  }
 0x265   :  { %5742 = vmatprep.subr.bf16.mxu1 %v8025_v57  ;;  %v8281_v57 = vld [vmem:[%s11152_s2] sm:$0xf] }
 0x266   :  { %v823_v62 = vrot.slane %v8281_v57, %v822_v51  ;;  %v8146_v51 = vld [vmem:[%s11151_s1 + $0x13c8] ss:$16 sps:$4 sm:$0xff]  }
 0x267   :  { %5776 = vmatpush1.bf16.msra.mxu0 %v8026_v6  ;;  %v8089_v6 = vld [vmem:[%s11151_s1 + $0x1068] ss:$16 sps:$4 sm:$0xff]  }
 0x268   :  { %5743 = vmatpush2.bf16.msra.mxu1 %v8023_v17  ;;  %5777 = vmatprep.subr.bf16.mxu0 %v8034_v63  ;;  %v827_v17 = vrot.slane %v8281_v57, %v826_v56  ;;  %v8097_v63 = vld [vmem:[%s11151_s1 + $0x104c] ss:$16 sps:$4 sm:$0xff]  }
 0x269   :  { %5744 = vmatprep.subr.bf16.mxu1 %v8031_v60  ;;  %v8092_v60 = vld [vmem:[%s11151_s1 + $0x12e8] ss:$16 sps:$4 sm:$0xff]   ;;  %v8151_v56 = vld [vmem:[%s11151_s1 + $0x112c] ss:$16 sps:$4 sm:$0xff]  }
 0x26a   :  { %v8160_v57 = vld [vmem:[%s11151_s1 + $0x138c] ss:$16 sps:$4 sm:$0xff]  }
 0x26b   :  { %5778 = vmatpush1.bf16.msra.mxu0 %v8032_v43 }
 0x26c   :  { %5745 = vmatpush2.bf16.msra.mxu1 %v8029_v2  ;;  %5779 = vmatprep.subr.bf16.mxu0 %v8040_v1  ;;  %v8100_v2 = vld [vmem:[%s11151_s1 + $0x12cc] ss:$16 sps:$4 sm:$0xff]  }
 0x26d   :  { %5746 = vmatprep.subr.bf16.mxu1 %v8037_v3 }
 0x26f   :  { %5780 = vmatpush1.bf16.msra.mxu0 %v8038_v30  ;;  %v8095_v30 = vld [vmem:[%s11151_s1 + $0x1048] ss:$16 sps:$4 sm:$0xff]  }
 0x270   :  { %5747 = vmatpush2.bf16.msra.mxu1 %v8035_v50  ;;  %5781 = vmatprep.subr.bf16.mxu0 %v8046_v8 }
 0x271   :  { %5748 = vmatprep.subr.bf16.mxu1 %v8043_v7  ;;  %v8098_v7 = vld [vmem:[%s11151_s1 + $0x12c8] ss:$16 sps:$4 sm:$0xff]  }
 0x273   :  { %5782 = vmatpush2.bf16.msra.mxu0 %v8044_v11 }
 0x274   :  { %5749 = vmatpush2.bf16.msra.mxu1 %v8041_v10  ;;  %5783 = vmatprep.subr.bf16.mxu0 %v8052_v18  ;;  %v8106_v10 = vld [vmem:[%s11151_s1 + $0x12ac] ss:$16 sps:$4 sm:$0xff]   ;;  %v8101_v18 = vld [vmem:[%s11151_s1 + $0x1028] ss:$16 sps:$4 sm:$0xff]  }
 0x275   :  { %5750 = vmatprep.subr.bf16.mxu1 %v8049_v49 }
 0x277   :  { %5784 = vmatpush2.bf16.msra.mxu0 %v8050_v19 }
 0x278   :  { %5751 = vmatpush2.bf16.msra.mxu1 %v8047_v16  ;;  %5785 = vmatprep.subr.bf16.mxu0 %v8058_v54  ;;  %v8104_v16 = vld [vmem:[%s11151_s1 + $0x12a8] ss:$16 sps:$4 sm:$0xff]  }
 0x279   :  { %5752 = vmatprep.subr.bf16.mxu1 %v8055_v4  ;;  %v8109_v4 = vld [vmem:[%s11151_s1 + $0x100c] ss:$16 sps:$4 sm:$0xff]   ;;  %v8107_v54 = vld [vmem:[%s11151_s1 + $0x1008] ss:$16 sps:$4 sm:$0xff]  }
 0x27b   :  { %5786 = vmatpush2.bf16.msra.mxu0 %v8056_v23  ;;  %v8115_v23 = vld [vmem:[%s11151_s1 + $0x11ec] ss:$16 sps:$4 sm:$0xff]  }
 0x27c   :  { %5753 = vmatpush2.bf16.msra.mxu1 %v8053_v38  ;;  %5787 = vmatprep.subr.bf16.mxu0 %v8064_v20  ;;  %v8110_v38 = vld [vmem:[%s11151_s1 + $0x1288] ss:$16 sps:$4 sm:$0xff]  }
 0x27d   :  { %5754 = vmatprep.subr.bf16.mxu1 %v8061_v5  ;;  %v8118_v5 = vld [vmem:[%s11151_s1 + $0x126c] ss:$16 sps:$4 sm:$0xff]   ;;  %v8113_v20 = vld [vmem:[%s11151_s1 + $0x11e8] ss:$16 sps:$4 sm:$0xff]  }
 0x27f   :  { %5788 = vmatpush2.bf16.msra.mxu0 %v8062_v0  ;;  %v8121_v0 = vld [vmem:[%s11151_s1 + $0x11cc] ss:$16 sps:$4 sm:$0xff]  }
 0x280   :  { %5755 = vmatpush2.bf16.msra.mxu1 %v8059_v21  ;;  %5789 = vmatprep.subr.bf16.mxu0 %v8067_v28  ;;  %v8116_v21 = vld [vmem:[%s11151_s1 + $0x1268] ss:$16 sps:$4 sm:$0xff]   ;;  %v8124_v28 = vld [vmem:[%s11151_s1 + $0x124c] ss:$16 sps:$4 sm:$0xff]  }
 0x281   :  { %5806 = vmatprep.subr.bf16.mxu1 %v8070_v29  ;;  %v8119_v29 = vld [vmem:[%s11151_s1 + $0x11c8] ss:$16 sps:$4 sm:$0xff]  }
 0x283   :  { %v5512_v32 = vpop.f32.mrf.mxu1  ;;  %5757 = vmatmul.mubr.bf16.vlgmr.msra.gmra.mxu1 %v9218_v15  ;;  %5790 = vmatpush2.bf16.msra.mxu0 %v8065_v26  ;;  %v8082_v15 = vld [vmem:[%s11151_s1 + $0x10ac] ss:$16 sps:$4 sm:$0xff]   ;;  %v8122_v26 = vld [vmem:[%s11151_s1 + $0x1248] ss:$16 sps:$4 sm:$0xff]  }
 0x284   :  { %5807 = vmatpush1.bf16.msra.mxu1 %v8068_v45  ;;  %5791 = vmatprep.subr.bf16.mxu0 %v8073_v36  ;;  %v5513_v43 = vadd.f32 %v5512_v32, %v823_v62  ;;  %v8127_v45 = vld [vmem:[%s11151_s1 + $0x11ac] ss:$16 sps:$4 sm:$0xff]   ;;  %v8128_v32 = vld [vmem:[%s11151_s1 + $0x1228] ss:$16 sps:$4 sm:$0xff]  }
 0x285   :  { %v5514_v47 = vpop.f32.mrf.mxu1  ;;  %5808 = vmatprep.subr.bf16.mxu1 %v8076_v37  ;;  %5838 = vmatprep.mubr.bf16.mxu1 %v9229_v22  ;;  %v8088_v22 = vld [vmem:[%s11151_s1 + $0x108c] ss:$16 sps:$4 sm:$0xff]   ;;  %v8125_v37 = vld [vmem:[%s11151_s1 + $0x11a8] ss:$16 sps:$4 sm:$0xff]  }
 0x286   :  { %v5515_v1 = vadd.f32 %v5514_v47, %v827_v17  ;;  %v8130_v36 = vld [vmem:[%s11151_s1 + $0x122c] ss:$16 sps:$4 sm:$0xff]   ;;  %v8131_v47 = vld [vmem:[%s11151_s1 + $0x1188] ss:$16 sps:$4 sm:$0xff]  }
 0x287   :  { %v5516_v53 = vpop.f32.mrf.mxu1  ;;  %5792 = vmatpush2.bf16.msra.mxu0 %v8071_v40  ;;  %v8133_v40 = vld [vmem:[%s11151_s1 + $0x118c] ss:$16 sps:$4 sm:$0xff]   ;;  %v8155_v62 = vld [vmem:[%s11151_s1 + $0x1108] ss:$16 sps:$4 sm:$0xff]  }
 0x288   :  { %5809 = vmatpush1.bf16.msra.mxu1 %v8074_v35  ;;  %5793 = vmatprep.subr.bf16.mxu0 %v8079_v41  ;;  %v8136_v35 = vld [vmem:[%s11151_s1 + $0x120c] ss:$16 sps:$4 sm:$0xff]   ;;  %v8134_v41 = vld [vmem:[%s11151_s1 + $0x1208] ss:$16 sps:$4 sm:$0xff]  }
 0x289   :  { %v5517_v59 = vpop.f32.mrf.mxu1  ;;  %5810 = vmatprep.subr.bf16.mxu1 %v8082_v15  ;;  %v8139_v15 = vld [vmem:[%s11151_s1 + $0x116c] ss:$16 sps:$4 sm:$0xff]   ;;  %v8158_v17 = vld [vmem:[%s11151_s1 + $0x1388] ss:$16 sps:$4 sm:$0xff]  }
 0x28a   :  { %v8142_v53 = vld [vmem:[%s11151_s1 + $0x13ec] ss:$16 sps:$4 sm:$0xff]  }
 0x28b   :  { %5794 = vmatpush2.bf16.msra.mxu0 %v8077_v48  ;;  %v8137_v48 = vld [vmem:[%s11151_s1 + $0x1168] ss:$16 sps:$4 sm:$0xff]   ;;  %v8145_v59 = vld [vmem:[%s11151_s1 + $0x114c] ss:$16 sps:$4 sm:$0xff]  }
 0x28c   :  { %5811 = vmatpush1.bf16.msra.mxu1 %v8080_v13  ;;  %5795 = vmatprep.subr.bf16.mxu0 %v8085_v46  ;;  %v8140_v13 = vld [vmem:[%s11151_s1 + $0x13e8] ss:$16 sps:$4 sm:$0xff]   ;;  %v8148_v46 = vld [vmem:[%s11151_s1 + $0x13cc] ss:$16 sps:$4 sm:$0xff]  }
 0x28d   :  { %5812 = vmatprep.subr.bf16.mxu1 %v8088_v22  ;;  %v8143_v22 = vld [vmem:[%s11151_s1 + $0x1148] ss:$16 sps:$4 sm:$0xff]  }
 0x28f   :  { %5796 = vmatpush2.bf16.msra.mxu0 %v8083_v55  ;;  %v8154_v55 = vld [vmem:[%s11151_s1 + $0x13ac] ss:$16 sps:$4 sm:$0xff]  }
 0x290   :  { %5813 = vmatpush1.bf16.msra.mxu1 %v8086_v58  ;;  %5847 = vmatprep.subr.bf16.mxu0 %v8094_v42  ;;  %v8149_v58 = vld [vmem:[%s11151_s1 + $0x1128] ss:$16 sps:$4 sm:$0xff]   ;;  %v8157_v42 = vld [vmem:[%s11151_s1 + $0x110c] ss:$16 sps:$4 sm:$0xff]  }
 0x291   :  { %5814 = vmatprep.subr.bf16.mxu1 %v8091_v61  ;;  %v8152_v61 = vld [vmem:[%s11151_s1 + $0x13a8] ss:$16 sps:$4 sm:$0xff]  }
 0x292   :  { %v5553_v3 = vpop.f32.mrf.mxu0  ;;  %5798 = vmatmul.mubr.bf16.vlgmr.msra.gmra.mxu0 %v9233_v39  ;;  %v8103_v39 = vld [vmem:[%s11151_s1 + $0x102c] ss:$16 sps:$4 sm:$0xff]  }
 0x293   :  { %v10556_v50 = vadd.f32 %v5553_v3, %v5513_v43  ;;  %5848 = vmatpush1.bf16.msra.mxu0 %v8092_v60  ;;  %5879 = vmatprep.mubr.bf16.mxu0 %v9249_v31  ;;  %v8112_v31 = vld [vmem:[%s11151_s1 + $0x128c] ss:$16 sps:$4 sm:$0xff]  }
 0x294   :  { %5815 = vmatpush1.bf16.msra.mxu1 %v8089_v6  ;;  %v5555_v8 = vpop.f32.mrf.mxu0  ;;  %5849 = vmatprep.subr.bf16.mxu0 %v8100_v2  ;;  %v8163_v6 = vld [vmem:[%s11151_s1 + $0x136c] ss:$16 sps:$4 sm:$0xff]   ;;  %v8164_v2 = vld [vmem:[%s11151_s1 + $0x14e8] ss:$16 sps:$4 sm:$0xff]  }
 0x295   :  { %5816 = vmatprep.subr.bf16.mxu1 %v8097_v63  ;;  %v10570_v11 = vadd.f32 %v5555_v8, %v5515_v1  ;;  %v8166_v60 = vld [vmem:[%s11151_s1 + $0x14ec] ss:$16 sps:$4 sm:$0xff]   ;;  %v8161_v63 = vld [vmem:[%s11151_s1 + $0x1368] ss:$16 sps:$4 sm:$0xff]  }
 0x296   :  { %v5557_v49 = vpop.f32.mrf.mxu0  ;;  %v8169_v43 = vld [vmem:[%s11151_s1 + $0x134c] ss:$16 sps:$4 sm:$0xff]   ;;  %v8170_v8 = vld [vmem:[%s11151_s1 + $0x14c8] ss:$16 sps:$4 sm:$0xff]  }
 0x297   :  { %5850 = vmatpush1.bf16.msra.mxu0 %v8098_v7  ;;  %v8172_v3 = vld [vmem:[%s11151_s1 + $0x14cc] ss:$16 sps:$4 sm:$0xff]   ;;  %v8167_v7 = vld [vmem:[%s11151_s1 + $0x1348] ss:$16 sps:$4 sm:$0xff]  }
 0x298   :  { %5817 = vmatpush1.bf16.msra.mxu1 %v8095_v30  ;;  %v5558_v19 = vpop.f32.mrf.mxu0  ;;  %5851 = vmatprep.subr.bf16.mxu0 %v8106_v10  ;;  %v8175_v10 = vld [vmem:[%s11151_s1 + $0x132c] ss:$16 sps:$4 sm:$0xff]  }
 0x299   :  { %5818 = vmatprep.subr.bf16.mxu1 %v8103_v39 }
 0x29b   :  { %5852 = vmatpush1.bf16.msra.mxu0 %v8104_v16  ;;  %v8176_v16 = vld [vmem:[%s11151_s1 + $0x14a8] ss:$16 sps:$4 sm:$0xff]  }
 0x29c   :  { %5819 = vmatpush1.bf16.msra.mxu1 %v8101_v18  ;;  %5853 = vmatprep.subr.bf16.mxu0 %v8112_v31  ;;  %v8173_v18 = vld [vmem:[%s11151_s1 + $0x1328] ss:$16 sps:$4 sm:$0xff]  }
 0x29d   :  { %5820 = vmatprep.subr.bf16.mxu1 %v8109_v4  ;;  %v8179_v4 = vld [vmem:[%s11151_s1 + $0x1308] ss:$16 sps:$4 sm:$0xff]  }
 0x29e   :  { %v8182_v31 = vld [vmem:[%s11151_s1 + $0x1488] ss:$16 sps:$4 sm:$0xff]  }
 0x29f   :  { %5854 = vmatpush1.bf16.msra.mxu0 %v8110_v38  ;;  %v8190_v38 = vld [vmem:[%s11151_s1 + $0x16ec] ss:$16 sps:$4 sm:$0xff]  }
 0x2a0   :  { %5821 = vmatpush1.bf16.msra.mxu1 %v8107_v54  ;;  %5855 = vmatprep.subr.bf16.mxu0 %v8118_v5  ;;  %v8187_v54 = vld [vmem:[%s11151_s1 + $0x146c] ss:$16 sps:$4 sm:$0xff]   ;;  %v8188_v5 = vld [vmem:[%s11151_s1 + $0x16e8] ss:$16 sps:$4 sm:$0xff]  }
 0x2a1   :  { %5822 = vmatprep.subr.bf16.mxu1 %v8115_v23  ;;  %v8185_v23 = vld [vmem:[%s11151_s1 + $0x1468] ss:$16 sps:$4 sm:$0xff]  }
 0x2a3   :  { %5856 = vmatpush1.bf16.msra.mxu0 %v8116_v21  ;;  %v8196_v21 = vld [vmem:[%s11151_s1 + $0x16cc] ss:$16 sps:$4 sm:$0xff]  }
 0x2a4   :  { %5823 = vmatpush2.bf16.msra.mxu1 %v8113_v20  ;;  %5857 = vmatprep.subr.bf16.mxu0 %v8124_v28  ;;  %v8193_v20 = vld [vmem:[%s11151_s1 + $0x144c] ss:$16 sps:$4 sm:$0xff]  }
 0x2a5   :  { %5824 = vmatprep.subr.bf16.mxu1 %v8121_v0 }
 0x2a7   :  { %5858 = vmatpush1.bf16.msra.mxu0 %v8122_v26  ;;  %v8194_v26 = vld [vmem:[%s11151_s1 + $0x16c8] ss:$16 sps:$4 sm:$0xff]  }
 0x2a8   :  { %5825 = vmatpush2.bf16.msra.mxu1 %v8119_v29  ;;  %5859 = vmatprep.subr.bf16.mxu0 %v8130_v36  ;;  %v8191_v29 = vld [vmem:[%s11151_s1 + $0x1448] ss:$16 sps:$4 sm:$0xff]   ;;  %v8199_v36 = vld [vmem:[%s11151_s1 + $0x142c] ss:$16 sps:$4 sm:$0xff]  }
 0x2a9   :  { %5826 = vmatprep.subr.bf16.mxu1 %v8127_v45 }
 0x2ab   :  { %5860 = vmatpush1.bf16.msra.mxu0 %v8128_v32 }
 0x2ac   :  { %5827 = vmatpush2.bf16.msra.mxu1 %v8125_v37  ;;  %5861 = vmatprep.subr.bf16.mxu0 %v8136_v35  ;;  %v8200_v35 = vld [vmem:[%s11151_s1 + $0x16a8] ss:$16 sps:$4 sm:$0xff]  }
 0x2ad   :  { %5828 = vmatprep.subr.bf16.mxu1 %v8133_v40  ;;  %v8197_v40 = vld [vmem:[%s11151_s1 + $0x1428] ss:$16 sps:$4 sm:$0xff]  }
 0x2af   :  { %5862 = vmatpush1.bf16.msra.mxu0 %v8134_v41  ;;  %v8205_v41 = vld [vmem:[%s11151_s1 + $0x140c] ss:$16 sps:$4 sm:$0xff]  }
 0x2b0   :  { %5829 = vmatpush2.bf16.msra.mxu1 %v8131_v47  ;;  %5863 = vmatprep.subr.bf16.mxu0 %v8142_v53  ;;  %v8206_v53 = vld [vmem:[%s11151_s1 + $0x1688] ss:$16 sps:$4 sm:$0xff]  }
 0x2b1   :  { %5830 = vmatprep.subr.bf16.mxu1 %v8139_v15  ;;  %v8203_v15 = vld [vmem:[%s11151_s1 + $0x1408] ss:$16 sps:$4 sm:$0xff]  }
 0x2b3   :  { %5864 = vmatpush2.bf16.msra.mxu0 %v8140_v13  ;;  %v8214_v13 = vld [vmem:[%s11151_s1 + $0x166c] ss:$16 sps:$4 sm:$0xff]  }
 0x2b4   :  { %5831 = vmatpush2.bf16.msra.mxu1 %v8137_v48  ;;  %5865 = vmatprep.subr.bf16.mxu0 %v8148_v46  ;;  %v8211_v48 = vld [vmem:[%s11151_s1 + $0x15ec] ss:$16 sps:$4 sm:$0xff]   ;;  %v8212_v46 = vld [vmem:[%s11151_s1 + $0x1668] ss:$16 sps:$4 sm:$0xff]  }
 0x2b5   :  { %5832 = vmatprep.subr.bf16.mxu1 %v8145_v59  ;;  %v8209_v59 = vld [vmem:[%s11151_s1 + $0x15e8] ss:$16 sps:$4 sm:$0xff]  }
 0x2b7   :  { %5866 = vmatpush2.bf16.msra.mxu0 %v8146_v51  ;;  %v8220_v51 = vld [vmem:[%s11151_s1 + $0x164c] ss:$16 sps:$4 sm:$0xff]  }
 0x2b8   :  { %5833 = vmatpush2.bf16.msra.mxu1 %v8143_v22  ;;  %5867 = vmatprep.subr.bf16.mxu0 %v8154_v55  ;;  %v8217_v22 = vld [vmem:[%s11151_s1 + $0x15cc] ss:$16 sps:$4 sm:$0xff]   ;;  %v8218_v55 = vld [vmem:[%s11151_s1 + $0x1648] ss:$16 sps:$4 sm:$0xff]  }
 0x2b9   :  { %5834 = vmatprep.subr.bf16.mxu1 %v8151_v56  ;;  %v8215_v56 = vld [vmem:[%s11151_s1 + $0x15c8] ss:$16 sps:$4 sm:$0xff]  }
 0x2bb   :  { %5868 = vmatpush2.bf16.msra.mxu0 %v8152_v61  ;;  %v8226_v61 = vld [vmem:[%s11151_s1 + $0x162c] ss:$16 sps:$4 sm:$0xff]  }
 0x2bc   :  { %5835 = vmatpush2.bf16.msra.mxu1 %v8149_v58  ;;  %5869 = vmatprep.subr.bf16.mxu0 %v8160_v57  ;;  %v8223_v58 = vld [vmem:[%s11151_s1 + $0x15ac] ss:$16 sps:$4 sm:$0xff]   ;;  %v8224_v57 = vld [vmem:[%s11151_s1 + $0x1628] ss:$16 sps:$4 sm:$0xff]  }
 0x2bd   :  { %5836 = vmatprep.subr.bf16.mxu1 %v8157_v42  ;;  %v8221_v42 = vld [vmem:[%s11151_s1 + $0x15a8] ss:$16 sps:$4 sm:$0xff]  }
 0x2bf   :  { %5870 = vmatpush2.bf16.msra.mxu0 %v8158_v17  ;;  %v8232_v17 = vld [vmem:[%s11151_s1 + $0x160c] ss:$16 sps:$4 sm:$0xff]  }
 0x2c0   :  { %5837 = vmatpush2.bf16.msra.mxu1 %v8155_v62  ;;  %5871 = vmatprep.subr.bf16.mxu0 %v8163_v6  ;;  %v8229_v62 = vld [vmem:[%s11151_s1 + $0x158c] ss:$16 sps:$4 sm:$0xff]   ;;  %v8227_v6 = vld [vmem:[%s11151_s1 + $0x1588] ss:$16 sps:$4 sm:$0xff]  }
 0x2c1   :  { %5888 = vmatprep.subr.bf16.mxu1 %v8166_v60  ;;  %v8230_v60 = vld [vmem:[%s11151_s1 + $0x1608] ss:$16 sps:$4 sm:$0xff]  }
 0x2c3   :  { %v5594_v1 = vpop.f32.mrf.mxu1  ;;  %5839 = vmatmul.mubr.bf16.vlgmr.msra.gmra.mxu1 %v9436_v12  ;;  %5872 = vmatpush2.bf16.msra.mxu0 %v8161_v63  ;;  %v8178_v12 = vld [vmem:[%s11151_s1 + $0x14ac] ss:$16 sps:$4 sm:$0xff]  }
 0x2c4   :  { %v5595_v30 = vadd.f32 %v5594_v1, %v10556_v50  ;;  %5889 = vmatpush1.bf16.msra.mxu1 %v8164_v2  ;;  %5873 = vmatprep.subr.bf16.mxu0 %v8169_v43  ;;  %v8235_v63 = vld [vmem:[%s11151_s1 + $0x156c] ss:$16 sps:$4 sm:$0xff]   ;;  %v8233_v43 = vld [vmem:[%s11151_s1 + $0x1568] ss:$16 sps:$4 sm:$0xff]  }
 0x2c5   :  { %v5596_v39 = vpop.f32.mrf.mxu1  ;;  %5890 = vmatprep.subr.bf16.mxu1 %v8172_v3  ;;  %5920 = vmatprep.mubr.bf16.mxu1 %v9457_v24  ;;  %v8184_v24 = vld [vmem:[%s11151_s1 + $0x148c] ss:$16 sps:$4 sm:$0xff]   ;;  %v8236_v3 = vld [vmem:[%s11151_s1 + $0x17e8] ss:$16 sps:$4 sm:$0xff]  }
 0x2c6   :  { %v5597_v50 = vadd.f32 %v5596_v39, %v10570_v11  ;;  %v8181_v11 = vld [vmem:[%s11151_s1 + $0x130c] ss:$16 sps:$4 sm:$0xff]  }
 0x2c7   :  { %v5598_v49 = vpop.f32.mrf.mxu1  ;;  %5874 = vmatpush2.bf16.msra.mxu0 %v8167_v7  ;;  %v8238_v2 = vld [vmem:[%s11151_s1 + $0x17ec] ss:$16 sps:$4 sm:$0xff]   ;;  %v8239_v7 = vld [vmem:[%s11151_s1 + $0x1548] ss:$16 sps:$4 sm:$0xff]  }
 0x2c8   :  { %5891 = vmatpush1.bf16.msra.mxu1 %v8170_v8  ;;  %5875 = vmatprep.subr.bf16.mxu0 %v8175_v10  ;;  %v8241_v1 = vld [vmem:[%s11151_s1 + $0x154c] ss:$16 sps:$4 sm:$0xff]   ;;  %v8242_v8 = vld [vmem:[%s11151_s1 + $0x17c8] ss:$16 sps:$4 sm:$0xff]  }
 0x2c9   :  { %v5599_v19 = vpop.f32.mrf.mxu1  ;;  %5892 = vmatprep.subr.bf16.mxu1 %v8178_v12  ;;  %v8247_v39 = vld [vmem:[%s11151_s1 + $0x152c] ss:$16 sps:$4 sm:$0xff]   ;;  %v8245_v12 = vld [vmem:[%s11151_s1 + $0x1528] ss:$16 sps:$4 sm:$0xff]  }
 0x2ca   :  { %v8250_v10 = vld [vmem:[%s11151_s1 + $0x17ac] ss:$16 sps:$4 sm:$0xff]   ;;  %v8254_v19 = vld [vmem:[%s11151_s1 + $0x1788] ss:$16 sps:$4 sm:$0xff]  }
 0x2cb   :  { %5876 = vmatpush2.bf16.msra.mxu0 %v8173_v18  ;;  %v8253_v49 = vld [vmem:[%s11151_s1 + $0x150c] ss:$16 sps:$4 sm:$0xff]  }
 0x2cc   :  { %5893 = vmatpush1.bf16.msra.mxu1 %v8176_v16  ;;  %5877 = vmatprep.subr.bf16.mxu0 %v8181_v11  ;;  %v8256_v18 = vld [vmem:[%s11151_s1 + $0x178c] ss:$16 sps:$4 sm:$0xff]   ;;  %v8251_v16 = vld [vmem:[%s11151_s1 + $0x1508] ss:$16 sps:$4 sm:$0xff]  }
 0x2cd   :  { %5894 = vmatprep.subr.bf16.mxu1 %v8184_v24  ;;  %v8259_v11 = vld [vmem:[%s11151_s1 + $0x176c] ss:$16 sps:$4 sm:$0xff]  }
 0x2ce   :  { %v8262_v24 = vld [vmem:[%s11151_s1 + $0x186c] ss:$16 sps:$4 sm:$0xff]  }
 0x2cf   :  { %5878 = vmatpush2.bf16.msra.mxu0 %v8179_v4  ;;  %v8257_v4 = vld [vmem:[%s11151_s1 + $0x1768] ss:$16 sps:$4 sm:$0xff]  }
 0x2d0   :  { %5895 = vmatpush1.bf16.msra.mxu1 %v8182_v31  ;;  %5929 = vmatprep.subr.bf16.mxu0 %v8190_v38  ;;  %v8260_v31 = vld [vmem:[%s11151_s1 + $0x1868] ss:$16 sps:$4 sm:$0xff]   ;;  %v8268_v38 = vld [vmem:[%s11151_s1 + $0x184c] ss:$16 sps:$4 sm:$0xff]  }
 0x2d1   :  { %5896 = vmatprep.subr.bf16.mxu1 %v8187_v54  ;;  %v8265_v54 = vld [vmem:[%s11151_s1 + $0x174c] ss:$16 sps:$4 sm:$0xff]  }
 0x2d2   :  { %v5635_v0 = vpop.f32.mrf.mxu0  ;;  %5880 = vmatmul.mubr.bf16.vlgmr.msra.gmra.mxu0 %v9461_v25  ;;  %v8202_v25 = vld [vmem:[%s11151_s1 + $0x16ac] ss:$16 sps:$4 sm:$0xff]  }
 0x2d3   :  { %v10758_v28 = vadd.f32 %v5635_v0, %v5595_v30  ;;  %5930 = vmatpush1.bf16.msra.mxu0 %v8188_v5  ;;  %5961 = vmatprep.mubr.bf16.mxu0 %v9477_v33  ;;  %v8208_v33 = vld [vmem:[%s11151_s1 + $0x168c] ss:$16 sps:$4 sm:$0xff]  }
 0x2d4   :  { %5897 = vmatpush1.bf16.msra.mxu1 %v8185_v23  ;;  %v5637_v45 = vpop.f32.mrf.mxu0  ;;  %5931 = vmatprep.subr.bf16.mxu0 %v8196_v21  ;;  %v8244_v30 = vld [vmem:[%s11151_s1 + $0x17cc] ss:$16 sps:$4 sm:$0xff]   ;;  %v8266_v21 = vld [vmem:[%s11151_s1 + $0x1848] ss:$16 sps:$4 sm:$0xff]  }
 0x2d5   :  { %5898 = vmatprep.subr.bf16.mxu1 %v8193_v20  ;;  %v10772_v37 = vadd.f32 %v5637_v45, %v5597_v50  ;;  %v8248_v50 = vld [vmem:[%s11151_s1 + $0x17a8] ss:$16 sps:$4 sm:$0xff]  }
 0x2d6   :  { %v5639_v32 = vpop.f32.mrf.mxu0  ;;  %v8263_v20 = vld [vmem:[%s11151_s1 + $0x1748] ss:$16 sps:$4 sm:$0xff]  }
 0x2d7   :  { %5932 = vmatpush1.bf16.msra.mxu0 %v8194_v26  ;;  %v8269_v45 = vld [vmem:[%s11151_s1 + $0x1728] ss:$16 sps:$4 sm:$0xff]  }
 0x2d8   :  { %5899 = vmatpush1.bf16.msra.mxu1 %v8191_v29  ;;  %v5640_v47 = vpop.f32.mrf.mxu0  ;;  %5933 = vmatprep.subr.bf16.mxu0 %v8202_v25  ;;  %v8271_v29 = vld [vmem:[%s11151_s1 + $0x172c] ss:$16 sps:$4 sm:$0xff]   ;;  %v8275_v32 = vld [vmem:[%s11151_s1 + $0x1708] ss:$16 sps:$4 sm:$0xff]  }
 0x2d9   :  { %5900 = vmatprep.subr.bf16.mxu1 %v8199_v36  ;;  %v8272_v36 = vld [vmem:[%s11151_s1 + $0x1828] ss:$16 sps:$4 sm:$0xff]  }
 0x2da   :  { %v6030_v47 = vld [vmem:[%s11153_s3 + $0x78] sm:$0xff] }
 0x2db   :  { %5934 = vmatpush1.bf16.msra.mxu0 %v8200_v35  ;;  %v6046_v35 = vld [vmem:[%s11153_s3 + $0xf8] sm:$0xff] }
 0x2dc   :  { %5901 = vmatpush1.bf16.msra.mxu1 %v8197_v40  ;;  %5935 = vmatprep.subr.bf16.mxu0 %v8208_v33  ;;  %v8278_v40 = vld [vmem:[%s11151_s1 + $0x1808] ss:$16 sps:$4 sm:$0xff]   ;;  %v6045_v33 = vld [vmem:[%s11153_s3 + $0xf0] sm:$0xff] }
 0x2dd   :  { %5902 = vmatprep.subr.bf16.mxu1 %v8205_v41  ;;  %v6012_v41 = vmax.f32 %v10365_v44, 0.0  ;;  %v6044_v44 = vld [vmem:[%s11153_s3 + $0xe8] sm:$0xff] }
 0x2df   :  { %5936 = vmatpush1.bf16.msra.mxu0 %v8206_v53  ;;  %v6029_v53 = vld [vmem:[%s11153_s3 + $0x70] sm:$0xff] }
 0x2e0   :  { %5903 = vmatpush1.bf16.msra.mxu1 %v8203_v15  ;;  %5937 = vmatprep.subr.bf16.mxu0 %v8214_v13 }
 0x2e1   :  { %5904 = vmatprep.subr.bf16.mxu1 %v8211_v48 }
 0x2e3   :  { %5938 = vmatpush1.bf16.msra.mxu0 %v8212_v46 }
 0x2e4   :  { %5905 = vmatpush2.bf16.msra.mxu1 %v8209_v59  ;;  %5939 = vmatprep.subr.bf16.mxu0 %v8220_v51  ;;  %v6042_v51 = vld [vmem:[%s11153_s3 + $0xd8] sm:$0xff] }
 0x2e5   :  { %5906 = vmatprep.subr.bf16.mxu1 %v8217_v22  ;;  %v6027_v22 = vld [vmem:[%s11153_s3 + $0x60] sm:$0xff] }
 0x2e7   :  { %5940 = vmatpush1.bf16.msra.mxu0 %v8218_v55 }
 0x2e8   :  { %5907 = vmatpush2.bf16.msra.mxu1 %v8215_v56  ;;  %5941 = vmatprep.subr.bf16.mxu0 %v8226_v61  ;;  %v6026_v56 = vld [vmem:[%s11153_s3 + $0x58] sm:$0xff] }
 0x2e9   :  { %5908 = vmatprep.subr.bf16.mxu1 %v8223_v58  ;;  %v6078_v58 = vld [vmem:[%s11153_s3 + $0x1f8] sm:$0xff] }
 0x2ea   :  { %v6062_v61 = vld [vmem:[%s11153_s3 + $0x178] sm:$0xff] }
 0x2eb   :  { %5942 = vmatpush1.bf16.msra.mxu0 %v8224_v57  ;;  %v6041_v57 = vld [vmem:[%s11153_s3 + $0xd0] sm:$0xff] }
 0x2ec   :  { %5909 = vmatpush2.bf16.msra.mxu1 %v8221_v42  ;;  %5943 = vmatprep.subr.bf16.mxu0 %v8232_v17  ;;  %v6077_v42 = vld [vmem:[%s11153_s3 + $0x1f0] sm:$0xff] }
 0x2ed   :  { %5910 = vmatprep.subr.bf16.mxu1 %v8229_v62  ;;  %v6061_v62 = vld [vmem:[%s11153_s3 + $0x170] sm:$0xff] }
 0x2ee   :  { %v6025_v17 = vld [vmem:[%s11153_s3 + $0x50] sm:$0xff] }
 0x2ef   :  { %5944 = vmatpush1.bf16.msra.mxu0 %v8230_v60  ;;  %v6040_v60 = vld [vmem:[%s11153_s3 + $0xc8] sm:$0xff] }
 0x2f0   :  { %5911 = vmatpush2.bf16.msra.mxu1 %v8227_v6  ;;  %5945 = vmatprep.subr.bf16.mxu0 %v8238_v2  ;;  %v6076_v6 = vld [vmem:[%s11153_s3 + $0x1e8] sm:$0xff] }
 0x2f1   :  { %5912 = vmatprep.subr.bf16.mxu1 %v8235_v63  ;;  %v6060_v63 = vld [vmem:[%s11153_s3 + $0x168] sm:$0xff] }
 0x2f2   :  { %v6024_v2 = vld [vmem:[%s11153_s3 + $0x48] sm:$0xff] }
 0x2f3   :  { %5946 = vmatpush2.bf16.msra.mxu0 %v8236_v3  ;;  %v6023_v3 = vld [vmem:[%s11153_s3 + $0x40] sm:$0xff] }
 0x2f4   :  { %5913 = vmatpush2.bf16.msra.mxu1 %v8233_v43  ;;  %5947 = vmatprep.subr.bf16.mxu0 %v8244_v30  ;;  %v6039_v43 = vld [vmem:[%s11153_s3 + $0xc0] sm:$0xff]  ;;  %v6022_v30 = vld [vmem:[%s11153_s3 + $0x38] sm:$0xff] }
 0x2f5   :  { %5914 = vmatprep.subr.bf16.mxu1 %v8241_v1  ;;  %v6038_v1 = vld [vmem:[%s11153_s3 + $0xb8] sm:$0xff] }
 0x2f7   :  { %5948 = vmatpush2.bf16.msra.mxu0 %v8242_v8  ;;  %v6021_v8 = vld [vmem:[%s11153_s3 + $0x30] sm:$0xff] }
 0x2f8   :  { %5915 = vmatpush2.bf16.msra.mxu1 %v8239_v7  ;;  %5949 = vmatprep.subr.bf16.mxu0 %v8250_v10  ;;  %v6037_v7 = vld [vmem:[%s11153_s3 + $0xb0] sm:$0xff]  ;;  %v6020_v10 = vld [vmem:[%s11153_s3 + $0x28] sm:$0xff] }
 0x2f9   :  { %5916 = vmatprep.subr.bf16.mxu1 %v8247_v39  ;;  %v6036_v39 = vld [vmem:[%s11153_s3 + $0xa8] sm:$0xff] }
 0x2fb   :  { %5950 = vmatpush2.bf16.msra.mxu0 %v8248_v50  ;;  %v6019_v50 = vld [vmem:[%s11153_s3 + $0x20] sm:$0xff] }
 0x2fc   :  { %5917 = vmatpush2.bf16.msra.mxu1 %v8245_v12  ;;  %5951 = vmatprep.subr.bf16.mxu0 %v8256_v18  ;;  %v6035_v12 = vld [vmem:[%s11153_s3 + $0xa0] sm:$0xff]  ;;  %v6018_v18 = vld [vmem:[%s11153_s3 + $0x18] sm:$0xff] }
 0x2fd   :  { %5918 = vmatprep.subr.bf16.mxu1 %v8253_v49  ;;  %v6034_v49 = vld [vmem:[%s11153_s3 + $0x98] sm:$0xff] }
 0x2ff   :  { %5952 = vmatpush2.bf16.msra.mxu0 %v8254_v19  ;;  %v6017_v19 = vld [vmem:[%s11153_s3 + $0x10] sm:$0xff] }
 0x300   :  { %5919 = vmatpush2.bf16.msra.mxu1 %v8251_v16  ;;  %5953 = vmatprep.subr.bf16.mxu0 %v8259_v11  ;;  %v6033_v16 = vld [vmem:[%s11153_s3 + $0x90] sm:$0xff]  ;;  %v6032_v11 = vld [vmem:[%s11153_s3 + $0x88] sm:$0xff] }
 0x301   :  { %5978 = vmatprep.subr.bf16.mxu1 %v8262_v24  ;;  %v6016_v24 = vld [vmem:[%s11153_s3 + $0x8] sm:$0xff] }
 0x303   :  { %v5676_v23 = vpop.f32.mrf.mxu1  ;;  %5921 = vmatmul.mubr.bf16.vlgmr.msra.gmra.mxu1 %v9653_v14  ;;  %5954 = vmatpush2.bf16.msra.mxu0 %v8257_v4  ;;  %v8274_v14 = vld [vmem:[%s11151_s1 + $0x182c] ss:$16 sps:$4 sm:$0xff]   ;;  %v6031_v4 = vld [vmem:[%s11153_s3 + $0x80] sm:$0xff] }
 0x304   :  { %v5677_v5 = vadd.f32 %v5676_v23, %v10758_v28  ;;  %5979 = vmatpush1.bf16.msra.mxu1 %v8260_v31  ;;  %5955 = vmatprep.subr.bf16.mxu0 %v8265_v54  ;;  %v6015_v31 = vld [vmem:[%s11153_s3] sm:$0xff]  ;;  %v6011_v54 = vmax.f32 %v10351_v34, 0.0  ;;  %v6074_v34 = vld [vmem:[%s11153_s3 + $0x1d8] sm:$0xff] }
 0x305   :  { %v5678_v0 = vpop.f32.mrf.mxu1  ;;  %5980 = vmatprep.subr.bf16.mxu1 %v8268_v38  ;;  %6002 = vmatprep.mubr.bf16.mxu1 %v8305_v52  ;;  %v8280_v52 = vld [vmem:[%s11151_s1 + $0x180c] ss:$16 sps:$4 sm:$0xff]   ;;  %v6075_v38 = vld [vmem:[%s11153_s3 + $0x1e0] sm:$0xff] }
 0x306   :  { %v5679_v28 = vadd.f32 %v5678_v0, %v10772_v37  ;;  %v8277_v37 = vld [vmem:[%s11151_s1 + $0x170c] ss:$16 sps:$4 sm:$0xff]  }
 0x307   :  { %v5680_v26 = vpop.f32.mrf.mxu1  ;;  %5956 = vmatpush2.bf16.msra.mxu0 %v8263_v20  ;;  %v6058_v0 = vld [vmem:[%s11153_s3 + $0x158] sm:$0xff] }
 0x308   :  { %5981 = vmatpush1.bf16.msra.mxu1 %v8266_v21  ;;  %5957 = vmatprep.subr.bf16.mxu0 %v8271_v29  ;;  %v6057_v26 = vld [vmem:[%s11153_s3 + $0x150] sm:$0xff] }
 0x309   :  { %v5681_v25 = vpop.f32.mrf.mxu1  ;;  %5982 = vmatprep.subr.bf16.mxu1 %v8274_v14  ;;  %v6073_v14 = vld [vmem:[%s11153_s3 + $0x1d0] sm:$0xff] }
 0x30a   :  { %v6056_v25 = vld [vmem:[%s11153_s3 + $0x148] sm:$0xff] }
 0x30b   :  { %5958 = vmatpush2.bf16.msra.mxu0 %v8269_v45  ;;  %v6072_v45 = vld [vmem:[%s11153_s3 + $0x1c8] sm:$0xff] }
 0x30c   :  { %5983 = vmatpush1.bf16.msra.mxu1 %v8272_v36  ;;  %5959 = vmatprep.subr.bf16.mxu0 %v8277_v37  ;;  %v6071_v37 = vld [vmem:[%s11153_s3 + $0x1c0] sm:$0xff] }
 0x30d   :  { %5984 = vmatprep.subr.bf16.mxu1 %v8280_v52  ;;  %v6055_v52 = vld [vmem:[%s11153_s3 + $0x140] sm:$0xff] }
 0x30f   :  { %5960 = vmatpush2.bf16.msra.mxu0 %v8275_v32  ;;  %v6070_v32 = vld [vmem:[%s11153_s3 + $0x1b8] sm:$0xff] }
 0x310   :  { %5985 = vmatpush1.bf16.msra.mxu1 %v8278_v40  ;;  %7029 = vmatprep.subr.mxu0 %v6046_v35  ;;  %v6054_v40 = vld [vmem:[%s11153_s3 + $0x138] sm:$0xff]  ;;  %v6069_v35 = vld [vmem:[%s11153_s3 + $0x1b0] sm:$0xff] }
 0x311   :  { %7064 = vmatprep.subr.mxu1 %v6078_v58  ;;  %v6048_v58 = vld [vmem:[%s11153_s3 + $0x108] sm:$0xff] }
 0x312   :  { %v5717_v15 = vpop.f32.mrf.mxu0  ;;  %5962 = vmatmul.mubr.bf16.vlgmr.msra.gmra.mxu0 %v9675_v27  ;;  %v6028_v27 = vld [vmem:[%s11153_s3 + $0x68] sm:$0xff] }
 0x313   :  { %7027 = vmatmul.mubr.msk.bf16.vlgmr.msra.gmra.mxu1 %vm4941_vm0, %v9739_v9  ;;  %v10957_v48 = vadd.f32 %v5717_v15, %v5677_v5  ;;  %7030 = vmatpush3.msra.mxu0 %v6030_v47  ;;  %v6043_v9 = vld [vmem:[%s11153_s3 + $0xe0] sm:$0xff]  ;;  %v6053_v47 = vld [vmem:[%s11153_s3 + $0x130] sm:$0xff] }
 0x314   :  { %6150 = vmatprep.mubr.f32.mxu0 %v6012_v41  ;;  %v5719_v13 = vpop.f32.mrf.mxu0  ;;  %7031 = vmatprep.subr.mxu0 %v6045_v33  ;;  %v6059_v5 = vld [vmem:[%s11153_s3 + $0x160] sm:$0xff]  ;;  %v6068_v41 = vld [vmem:[%s11153_s3 + $0x1a8] sm:$0xff] }
 0x315   :  { %v10965_v59 = vadd.f32 %v5719_v13, %v5679_v28  ;;  %7032 = vmatpush3.msra.mxu0 %v6029_v53  ;;  %7065 = vmatpush3.msra.mxu1 %v6062_v61  ;;  %v6052_v33 = vld [vmem:[%s11153_s3 + $0x128] sm:$0xff]  ;;  %v6067_v15 = vld [vmem:[%s11153_s3 + $0x1a0] sm:$0xff]  ;;  %v6066_v13 = vld [vmem:[%s11153_s3 + $0x198] sm:$0xff] }
 0x316   :  { %v5721_v46 = vpop.f32.mrf.mxu0  ;;  %7033 = vmatprep.subr.mxu0 %v6044_v44  ;;  %7066 = vmatprep.subr.mxu1 %v6077_v42  ;;  %v6063_v61 = vld [vmem:[%s11153_s3 + $0x180] sm:$0xff] }
 0x317   :  { %7034 = vmatpush3.msra.mxu0 %v6028_v27  ;;  %7067 = vmatpush3.msra.mxu1 %v6061_v62  ;;  %v6065_v46 = vld [vmem:[%s11153_s3 + $0x190] sm:$0xff]  ;;  %v6047_v42 = vld [vmem:[%s11153_s3 + $0x100] sm:$0xff] }
 0x318   :  { %v5722_v55 = vpop.f32.mrf.mxu0  ;;  %7035 = vmatprep.subr.mxu0 %v6043_v9  ;;  %7068 = vmatprep.subr.mxu1 %v6076_v6 }
 0x319   :  { %7036 = vmatpush3.msra.mxu0 %v6027_v22  ;;  %7069 = vmatpush3.msra.mxu1 %v6060_v63 }
 0x31a   :  { %7037 = vmatprep.subr.mxu0 %v6042_v51  ;;  %7070 = vmatprep.subr.mxu1 %v6075_v38  ;;  %v6049_v51 = vld [vmem:[%s11153_s3 + $0x110] sm:$0xff] }
 0x31b   :  { %7038 = vmatpush3.msra.mxu0 %v6026_v56  ;;  %7071 = vmatpush3.msra.mxu1 %v6059_v5  ;;  %v6064_v56 = vld [vmem:[%s11153_s3 + $0x188] sm:$0xff] }
 0x31c   :  { %7039 = vmatprep.subr.mxu0 %v6041_v57  ;;  %7072 = vmatprep.subr.mxu1 %v6074_v34 }
 0x31d   :  { %7040 = vmatpush3.msra.mxu0 %v6025_v17  ;;  %7073 = vmatpush3.msra.mxu1 %v6058_v0 }
 0x31e   :  { %7041 = vmatprep.subr.mxu0 %v6040_v60  ;;  %7074 = vmatprep.subr.mxu1 %v6073_v14 }
 0x31f   :  { %7042 = vmatpush3.msra.mxu0 %v6024_v2  ;;  %7075 = vmatpush3.msra.mxu1 %v6057_v26 }
 0x320   :  { %7043 = vmatprep.subr.mxu0 %v6039_v43  ;;  %7076 = vmatprep.subr.mxu1 %v6072_v45 }
 0x321   :  { %7044 = vmatpush3.msra.mxu0 %v6023_v3  ;;  %7077 = vmatpush3.msra.mxu1 %v6056_v25 }
 0x322   :  { %7045 = vmatprep.subr.mxu0 %v6038_v1  ;;  %7078 = vmatprep.subr.mxu1 %v6071_v37 }
 0x323   :  { %7046 = vmatpush3.msra.mxu0 %v6022_v30  ;;  %7079 = vmatpush3.msra.mxu1 %v6055_v52 }
 0x324   :  { %7047 = vmatprep.subr.mxu0 %v6037_v7  ;;  %7080 = vmatprep.subr.mxu1 %v6070_v32 }
 0x325   :  { %7048 = vmatpush3.msra.mxu0 %v6021_v8  ;;  %7081 = vmatpush3.msra.mxu1 %v6054_v40 }
 0x326   :  { %7049 = vmatprep.subr.mxu0 %v6036_v39  ;;  %7082 = vmatprep.subr.mxu1 %v6069_v35 }
 0x327   :  { %7050 = vmatpush3.msra.mxu0 %v6020_v10  ;;  %7083 = vmatpush3.msra.mxu1 %v6053_v47 }
 0x328   :  { %7051 = vmatprep.subr.mxu0 %v6035_v12  ;;  %7084 = vmatprep.subr.mxu1 %v6068_v41 }
 0x329   :  { %7052 = vmatpush3.msra.mxu0 %v6019_v50  ;;  %7085 = vmatpush3.msra.mxu1 %v6052_v33 }
 0x32a   :  { %7053 = vmatprep.subr.mxu0 %v6034_v49  ;;  %7086 = vmatprep.subr.mxu1 %v6067_v15 }
 0x32b   :  { %7054 = vmatpush3.msra.mxu0 %v6018_v18 }
 0x32c   :  { %7055 = vmatprep.subr.mxu0 %v6033_v16 }
 0x32d   :  { %7056 = vmatpush3.msra.mxu0 %v6017_v19 }
 0x32e   :  { %7057 = vmatprep.subr.mxu0 %v6032_v11 }
 0x32f   :  { %7058 = vmatpush3.msra.mxu0 %v6016_v24 }
 0x330   :  { %7059 = vmatprep.subr.mxu0 %v6031_v4 }
 0x331   :  { %7060 = vmatpush3.msra.mxu0 %v6015_v31 }
 0x332   :  { %6151 = vmatmul.mubr.f32.vlgmr.msra.gmra.mxu0 %v6011_v54 }
 0x343   :  { %v5758_v23 = vpop.f32.mrf.mxu1 }
 0x344   :  { %v5759_v20 = vadd.f32 %v5758_v23, %v10957_v48  ;;  %v6051_v48 = vld [vmem:[%s11153_s3 + $0x120] sm:$0xff] }
 0x345   :  { %v5760_v21 = vpop.f32.mrf.mxu1  ;;  %7087 = vmatpush3.msra.mxu1 %v6051_v48 }
 0x346   :  { %v5761_v29 = vadd.f32 %v5760_v21, %v10965_v59  ;;  %7088 = vmatprep.subr.mxu1 %v6066_v13  ;;  %v6050_v59 = vld [vmem:[%s11153_s3 + $0x118] sm:$0xff] }
 0x347   :  { %v5762_v28 = vpop.f32.mrf.mxu1  ;;  %7089 = vmatpush3.msra.mxu1 %v6050_v59 }
 0x348   :  { %7090 = vmatprep.subr.mxu1 %v6065_v46  ;;  %v7028_v28 = vld [vmem:[%s11154_s4] ss:$0 sm:$0xff] }
 0x349   :  { %v5763_v36 = vpop.f32.mrf.mxu1  ;;  %7091 = vmatpush3.msra.mxu1 %v6049_v51 }
 0x34a   :  { %7092 = vmatprep.subr.mxu1 %v6064_v56 }
 0x34b   :  { %7093 = vmatpush3.msra.mxu1 %v6048_v58 }
 0x34c   :  { %7094 = vmatprep.subr.mxu1 %v6063_v61 }
 0x34d   :  { %7095 = vmatpush3.msra.mxu1 %v6047_v42 }
 0x352   :  { %v5799_v53 = vpop.f32.mrf.mxu0 }
 0x353   :  { %v5800_v44 = vadd.f32 %v5799_v53, %v5759_v20 }
 0x354   :  { %v5801_v27 = vpop.f32.mrf.mxu0 }
 0x355   :  { %v5802_v9 = vadd.f32 %v5801_v27, %v5761_v29 }
 0x356   :  { %v5803_v22 = vpop.f32.mrf.mxu0 }
 0x358   :  { %v5804_v55 = vpop.f32.mrf.mxu0 }
 0x383   :  { %v5840_v57 = vpop.f32.mrf.mxu1 }
 0x384   :  { %v5841_v62 = vadd.f32 %v5840_v57, %v5800_v44 }
 0x385   :  { %v5842_v17 = vpop.f32.mrf.mxu1 }
 0x386   :  { %v5843_v6 = vadd.f32 %v5842_v17, %v5802_v9 }
 0x387   :  { %v5844_v60 = vpop.f32.mrf.mxu1 }
 0x389   :  { %v5845_v63 = vpop.f32.mrf.mxu1 }
 0x392   :  { %v5881_v2 = vpop.f32.mrf.mxu0 }
 0x393   :  { %v5882_v10 = vadd.f32 %v5881_v2, %v5841_v62 }
 0x394   :  { %v5883_v43 = vpop.f32.mrf.mxu0 }
 0x395   :  { %v5884_v12 = vadd.f32 %v5883_v43, %v5843_v6 }
 0x396   :  { %v5885_v3 = vpop.f32.mrf.mxu0 }
 0x398   :  { %v5886_v1 = vpop.f32.mrf.mxu0 }
 0x3c3   :  { %v5922_v30 = vpop.f32.mrf.mxu1 }
 0x3c4   :  { %v5923_v50 = vadd.f32 %v5922_v30, %v5882_v10 }
 0x3c5   :  { %v5924_v7 = vpop.f32.mrf.mxu1 }
 0x3c6   :  { %v5925_v16 = vadd.f32 %v5924_v7, %v5884_v12 }
 0x3c7   :  { %v5926_v8 = vpop.f32.mrf.mxu1 }
 0x3c9   :  { %v5927_v39 = vpop.f32.mrf.mxu1 }
 0x3d2   :  { %v5963_v49 = vpop.f32.mrf.mxu0 }
 0x3d3   :  { %v6004_v18 = vpop.f32.mrf.mxu1  ;;  %v5964_v19 = vadd.f32 %v5963_v49, %v5923_v50 }
 0x3d4   :  { %v5965_v11 = vpop.f32.mrf.mxu0 }
 0x3d5   :  { %v6006_v24 = vpop.f32.mrf.mxu1  ;;  %v5966_v4 = vadd.f32 %v5965_v11, %v5925_v16  ;;  %v6005_v31 = vadd.f32 %v6004_v18, %v5964_v19 }
 0x3d6   :  { %v5967_v54 = vpop.f32.mrf.mxu0 }
 0x3d7   :  { %v6008_v38 = vpop.f32.mrf.mxu1  ;;  %v6007_v23 = vadd.f32 %v6006_v24, %v5966_v4  ;;  %v6013_v21 = vmax.f32 %v6005_v31, 0.0 }
 0x3d8   :  { %v5968_v5 = vpop.f32.mrf.mxu0 }
 0x3d9   :  { %v6009_v20 = vpop.f32.mrf.mxu1  ;;  %v6014_v34 = vmax.f32 %v6007_v23, 0.0 }
 0x3db   :  { %6220 = vmatprep.mubr.f32.mxu1 %v6014_v34 }
 0x3dc   :  { %6221 = vmatmul.mubr.f32.vlgmr.msra.gmra.mxu1 %v6013_v21 }
 0x3f2   :  { %v7061_v0 = vpop.f32.mrf.mxu0 }
 0x3f4   :  { %v7062_v29 = vpop.f32.mrf.mxu0 }
 0x3f5   :  { %v7063_v14 = vadd.f32 %v7062_v29, %v7061_v0 }
 0x3f7   :  { %v6153_v36 = vadd.f32 %v7063_v14, %v7028_v28 }
 0x49c   :  { %v7096_v26 = vpop.f32.mrf.mxu1 }
 0x49e   :  { %v7097_v45 = vpop.f32.mrf.mxu1 }
 0x49f   :  { %v7098_v25 = vadd.f32 %v7097_v45, %v7096_v26 }
 0x4a1   :  { %v6223_v37 = vadd.f32 %v7098_v25, %v6153_v36 }
 0x4a3   :  { %6226 = vst [vmem:[#allocation2] sm:$0x3] %v6223_v37 }
 0x4a4   :  { %8293 = shalt.err (!%p8290_p4)
}
 0x4a5   :  { %6236 = dma.vmem_to_hbm [thread:$0]  %s6234_s25, 32, %s11155_s5, [#allocation3]  }
 0x4a6   :  { %8302 = dma.done.wait [#allocation3], 32  }
 0x4a7   :  { %8303 = vsyncadd [#allocation3], 4294967264 }
 0x4a8   :  { %6240 = vsyncpa [#allocation3], 1 }

</bundles_post_ra>
